<compile_context>
chip_gen: v5e
topology: v5e:2x2
jax: 0.10.0
libtpu: 0.0.40
codegen_flags: <defaults>
</compile_context>

<pallas_src>
import functools

import jax
import jax.numpy as jnp
from jax.experimental import pallas as pl
from jax.experimental.pallas import tpu as pltpu

LEAKY_SLOPE = 0.01   # PyTorch nn.LeakyReLU default
LN_EPS = 1e-5        # nn.LayerNorm default
BN_EPS = 1e-5        # nn.BatchNorm1d default
HIDDEN_SIZE = 2048   # hard-coded in _AttentionLayer
LANE = 128
SUBLANE = 8

_LAYER_KEYS = ("wqkv", "bqkv", "w0", "b0", "ln1_g", "ln1_b",
               "wm1", "bm1", "wm2", "bm2", "ln2_g", "ln2_b")


def _round_up(x, m):
    return ((x + m - 1) // m) * m


# ---------------------------------------------------------------------------
# in-kernel helpers (pure jnp, traced inside the Pallas kernel)
# ---------------------------------------------------------------------------
def _leaky_relu(x):
    return jnp.where(x >= 0, x, LEAKY_SLOPE * x)


def _layer_norm(x, gamma, beta, n_real):
    # Padded feature columns are exactly zero, so sum(x)/n_real and
    # sum(x*x)/n_real reproduce the statistics over the *real* D features.
    inv_n = 1.0 / float(n_real)
    mean = jnp.sum(x, axis=-1, keepdims=True) * inv_n
    var = jnp.sum(x * x, axis=-1, keepdims=True) * inv_n - mean * mean
    var = jnp.maximum(var, 0.0)
    return (x - mean) * jax.lax.rsqrt(var + LN_EPS) * gamma + beta


def _mm(a, b):
    # bf16 MXU operands, f32 accumulate (weights are stored bf16).
    return jnp.dot(a.astype(jnp.bfloat16), b, preferred_element_type=jnp.float32)


# ---------------------------------------------------------------------------
# fused Pallas kernel: embedding (at layer step 0) + one attention layer/step
# ---------------------------------------------------------------------------
def _transformer_kernel(x_ref, pos_ref,
                        cew1_ref, ceb1_ref, cew2_ref, ceb2_ref,
                        wqkv_ref, bqkv_ref, w0_ref, b0_ref, g1_ref, be1_ref,
                        wm1_ref, bm1_ref, wm2_ref, bm2_ref, g2_ref, be2_ref,
                        out_ref, h_ref, *, d_model, t_actual):
    layer = pl.program_id(1)
    n_layers = pl.num_programs(1)
    bt, tp, fp = x_ref.shape          # batch tile, padded seq (incl. CLS), padded feat
    d = h_ref.shape[-1]               # padded model dim (lane-dense)
    rows = bt * tp

    # ---- c_embedding + positional add (once per batch tile) ---------------
    @pl.when(layer == 0)
    def _embed():
        x = x_ref[...].reshape(rows, fp)
        h = _leaky_relu(_mm(x, cew1_ref[...]) + ceb1_ref[...])   # BN folded into w/b
        e = _mm(h, cew2_ref[...]) + ceb2_ref[...]
        h_ref[...] = e.reshape(bt, tp, d) + pos_ref[...][None]

    # ---- one _AttentionLayer on the VMEM-resident activation --------------
    x3 = h_ref[...]                                  # (bt, tp, d) f32
    xf = x3.reshape(rows, d)                         # relayout-free (tp % 8 == 0)

    # fused q|k|v projection: one (rows, d) x (d, 3d) matmul
    qkv = _mm(xf, wqkv_ref[0]) + bqkv_ref[0]         # (rows, 3d) f32
    qb = qkv[:, :d].reshape(bt, tp, d).astype(jnp.bfloat16)
    kb = qkv[:, d:2 * d].reshape(bt, tp, d).astype(jnp.bfloat16)
    vb = qkv[:, 2 * d:].reshape(bt, tp, d).astype(jnp.bfloat16)

    # scores = q @ k^T (no 1/sqrt(d) scaling, no causal mask — as in reference);
    # mask padded key columns introduced by the T -> Tp sublane padding.
    scores = jnp.einsum('bqd,bkd->bqk', qb, kb,
                        preferred_element_type=jnp.float32)      # (bt, tp, tp)
    key_ok = jax.lax.broadcasted_iota(jnp.int32, (1, tp), 1) < t_actual
    scores = jnp.where(key_ok[None], scores, -1e30)
    scores = scores - jnp.max(scores, axis=-1, keepdims=True)
    p = jnp.exp(scores)
    probs = p * pl.reciprocal(jnp.sum(p, axis=-1, keepdims=True), approx=True)
    att = jnp.einsum('bqk,bkd->bqd', probs.astype(jnp.bfloat16), vb,
                     preferred_element_type=jnp.float32)         # (bt, tp, d)

    y = _layer_norm(x3 + att, g1_ref[0], be1_ref[0], d_model)    # (bt, tp, d) f32

    # ---- intermediate layers: full-sequence w0 / MLP / LN2 -----------------
    @pl.when(layer < n_layers - 1)
    def _full_layer():
        e = _mm(y.reshape(rows, d), w0_ref[0]) + b0_ref[0]                 # (rows, d)
        hid = _leaky_relu(_mm(e, wm1_ref[0]) + bm1_ref[0]).astype(jnp.bfloat16)
        logits = _mm(hid, wm2_ref[0]) + bm2_ref[0]                         # (rows, d)
        out = _layer_norm(_leaky_relu(logits + e), g2_ref[0], be2_ref[0], d_model)
        h_ref[...] = out.reshape(bt, tp, d)

    # ---- last layer fast path: only CLS rows feed the final output --------
    @pl.when(layer == n_layers - 1)
    def _last_layer():
        y_cls = y[:, 0, :]                                                 # (bt, d)
        e = _mm(y_cls, w0_ref[0]) + b0_ref[0]
        hid = _leaky_relu(_mm(e, wm1_ref[0]) + bm1_ref[0]).astype(jnp.bfloat16)
        logits = _mm(hid, wm2_ref[0]) + bm2_ref[0]
        out = _layer_norm(_leaky_relu(logits + e), g2_ref[0], be2_ref[0], d_model)
        out_ref[0] = out                                                   # (bt, d)


# ---------------------------------------------------------------------------
# per-generation tile / VMEM policy
# ---------------------------------------------------------------------------
def _chip_caps():
    kind = ""
    try:
        kind = jax.devices()[0].device_kind.lower()
    except Exception:
        pass
    if "v7" in kind:
        # 64 MiB VMEM, 2 TensorCores -> need >= 2 batch tiles to use both.
        return {"vmem_cap": 46 << 20, "target_rows": 512, "min_tiles": 2}
    if "v5" in kind:
        # v5e: ~250 FLOP/byte crossover; 128 MiB VMEM.
        return {"vmem_cap": 96 << 20, "target_rows": 384, "min_tiles": 1}
    # v6e (and default): ~650 FLOP/byte crossover; 128 MiB VMEM.
    return {"vmem_cap": 96 << 20, "target_rows": 768, "min_tiles": 1}


def _vmem_bytes_estimate(bt, tp, fp, dp):
    rows = bt * tp
    # bf16 per-layer weights (qkv fused) + f32 biases/LN params, double-buffered
    w_layer = 2 * (3 * dp * dp + dp * dp + dp * HIDDEN_SIZE + HIDDEN_SIZE * dp)
    small_layer = 4 * (3 * dp + HIDDEN_SIZE + 6 * dp)
    per_layer = 2 * (w_layer + small_layer)
    x_tile = 2 * 4 * bt * tp * fp                       # f32 input tile, double-buffered
    embed = 2 * (fp * dp + dp * dp) + 4 * 2 * dp + 4 * tp * dp
    h_scr = 4 * bt * tp * dp                            # resident activation scratch
    out_t = 2 * 4 * bt * dp
    inter = (4 * rows * 3 * dp                          # qkv f32
             + 2 * 4 * bt * tp * tp                     # scores + probs f32
             + 2 * rows * HIDDEN_SIZE                   # MLP hidden bf16
             + 4 * 4 * rows * dp)                       # att / y / e / logits f32
    return per_layer + x_tile + embed + h_scr + out_t + inter


def _pick_batch_tile(batch, tp, fp, dp, caps):
    bt = max(1, caps["target_rows"] // tp)
    bt = min(bt, batch)
    if caps.get("min_tiles", 1) > 1 and batch > 1:
        bt = min(bt, max(1, -(-batch // caps["min_tiles"])))   # guarantee >= 2 tiles
    while bt > 1 and _vmem_bytes_estimate(bt, tp, fp, dp) > int(0.85 * caps["vmem_cap"]):
        bt -= 1
    return bt


# ---------------------------------------------------------------------------
# pallas_call wrapper
# ---------------------------------------------------------------------------
def transformer_forward(inputs, params, *, dim, batch_tile=None):
    B, S, F = inputs.shape
    T = S + 1
    Dp = params["ce_w2"].shape[0]          # padded model dim (lane-dense)
    Fp = params["ce_w1"].shape[0]          # padded feature dim
    L = params["wqkv"].shape[0]
    Tp = _round_up(T, SUBLANE)

    caps = _chip_caps()
    bt = batch_tile or _pick_batch_tile(B, Tp, Fp, Dp, caps)
    Bp = _round_up(B, bt)                  # pad batch instead of degrading to bt=1
    nb = Bp // bt

    # host-side glue (tiny): CLS prepend, batch / seq / feature zero-padding
    cls = jnp.broadcast_to(params["cls"], (B, 1, F))
    x = jnp.concatenate([cls, inputs], axis=1)                        # (B, T, F)
    x = jnp.pad(x, ((0, Bp - B), (0, Tp - T), (0, Fp - F)))           # lane/sublane dense
    pos = jnp.pad(params["pos_emb"][:T], ((0, Tp - T), (0, 0)))       # (Tp, Dp)

    def rep(arr):
        nd = arr.ndim
        return pl.BlockSpec(arr.shape, lambda b, l, _nd=nd: (0,) * _nd)

    def per_layer(arr):
        nd = arr.ndim
        return pl.BlockSpec((1,) + arr.shape[1:],
                            lambda b, l, _nd=nd: (l,) + (0,) * (_nd - 1))

    layer_args = [params[k] for k in _LAYER_KEYS]
    in_specs = ([pl.BlockSpec((bt, Tp, Fp), lambda b, l: (b, 0, 0)),
                 rep(pos),
                 rep(params["ce_w1"]), rep(params["ce_b1"]),
                 rep(params["ce_w2"]), rep(params["ce_b2"])]
                + [per_layer(a) for a in layer_args])

    est = _vmem_bytes_estimate(bt, Tp, Fp, Dp)
    vmem_limit = int(min(max(int(est * 1.5) + (8 << 20), 32 << 20), caps["vmem_cap"]))

    kernel = functools.partial(_transformer_kernel, d_model=dim, t_actual=T)

    out = pl.pallas_call(
        kernel,
        out_shape=jax.ShapeDtypeStruct((nb, bt, Dp), jnp.float32),
        grid_spec=pltpu.PrefetchScalarGridSpec(
            num_scalar_prefetch=0,
            grid=(nb, L),                           # (batch tiles, layers)
            in_specs=in_specs,
            out_specs=pl.BlockSpec((1, bt, Dp), lambda b, l: (b, 0, 0)),
            scratch_shapes=[pltpu.VMEM((bt, Tp, Dp), jnp.float32)],  # resident activation
        ),
        compiler_params=pltpu.CompilerParams(
            dimension_semantics=("parallel", "arbitrary"),
            vmem_limit_bytes=vmem_limit),
    )(x, pos, params["ce_w1"], params["ce_b1"],
      params["ce_w2"], params["ce_b2"], *layer_args)

    return out.reshape(Bp, Dp)[:B, :dim]


# ---------------------------------------------------------------------------
# parameter init (deterministic, PyTorch-style fan-in uniform for Linears).
# D / feature dims are zero-padded to 128 lanes; q/k/v weights are fused into
# one (Dp, 3*Dp) matrix; eval-mode BN is folded into the preceding Linear;
# MXU weights stored as bf16.
# ---------------------------------------------------------------------------
def _linear(key, fan_in, fan_out):
    kw, kb = jax.random.split(key)
    bound = 1.0 / float(fan_in) ** 0.5
    w = jax.random.uniform(kw, (fan_in, fan_out), jnp.float32, -bound, bound)
    b = jax.random.uniform(kb, (1, fan_out), jnp.float32, -bound, bound)
    return w, b


def init_params(key, dim, n_layers, max_seq_length, input_size):
    bn_scale = 1.0 / (1.0 + BN_EPS) ** 0.5   # eval BN, default running stats
    dp = _round_up(dim, LANE)
    fp = _round_up(input_size, LANE)
    pad_d = dp - dim

    def padw_d(w):            # pad both dims (dim -> dp)
        return jnp.pad(w, ((0, pad_d), (0, pad_d)))

    def padb_d(b):            # pad output dim (dim -> dp)
        return jnp.pad(b, ((0, 0), (0, pad_d)))

    keys = jax.random.split(key, 4 + n_layers)
    p = {}
    p["cls"] = jax.random.normal(keys[0], (1, 1, input_size), jnp.float32)
    pos = jax.random.normal(keys[1], (max_seq_length, dim), jnp.float32)
    p["pos_emb"] = jnp.pad(pos, ((0, 0), (0, pad_d)))

    w1, b1 = _linear(keys[2], input_size, dim)
    w1 = jnp.pad(w1, ((0, fp - input_size), (0, pad_d)))
    p["ce_w1"] = (w1 * bn_scale).astype(jnp.bfloat16)          # BN folded
    p["ce_b1"] = padb_d(b1) * bn_scale
    w2, b2 = _linear(keys[3], dim, dim)
    p["ce_w2"] = padw_d(w2).astype(jnp.bfloat16)
    p["ce_b2"] = padb_d(b2)

    stacked = {k: [] for k in _LAYER_KEYS}
    for li in range(n_layers):
        lk = jax.random.split(keys[4 + li], 6)
        wq, bq = _linear(lk[0], dim, dim)
        wk, bk = _linear(lk[1], dim, dim)
        wv, bv = _linear(lk[2], dim, dim)
        wqkv = jnp.concatenate([padw_d(wq), padw_d(wk), padw_d(wv)], axis=1)
        bqkv = jnp.concatenate([padb_d(bq), padb_d(bk), padb_d(bv)], axis=1)
        w0, b0 = _linear(lk[3], dim, dim)
        wm1, bm1 = _linear(lk[4], dim, HIDDEN_SIZE)
        wm2, bm2 = _linear(lk[5], HIDDEN_SIZE, dim)
        vals = dict(
            wqkv=wqkv.astype(jnp.bfloat16), bqkv=bqkv,
            w0=padw_d(w0).astype(jnp.bfloat16), b0=padb_d(b0),
            ln1_g=jnp.pad(jnp.ones((1, dim), jnp.float32), ((0, 0), (0, pad_d))),
            ln1_b=jnp.zeros((1, dp), jnp.float32),
            wm1=(jnp.pad(wm1, ((0, pad_d), (0, 0))) * bn_scale).astype(jnp.bfloat16),
            bm1=bm1 * bn_scale,
            wm2=jnp.pad(wm2, ((0, 0), (0, pad_d))).astype(jnp.bfloat16),
            bm2=padb_d(bm2),
            ln2_g=jnp.pad(jnp.ones((1, dim), jnp.float32), ((0, 0), (0, pad_d))),
            ln2_b=jnp.zeros((1, dp), jnp.float32),
        )
        for k in _LAYER_KEYS:
            stacked[k].append(vals[k])
    for k in _LAYER_KEYS:
        p[k] = jnp.stack(stacked[k], axis=0)                  # (L, ...)
    return p


if __name__ == "__main__":
    # small, module-consistent shapes
    B, S = 2, 8
    INPUT_SIZE = 6
    DIM = 32
    N_LAYERS = 2
    MAX_SEQ = 16   # >= S + 1

    key = jax.random.PRNGKey(0)
    k_param, k_in = jax.random.split(key)
    params = init_params(k_param, DIM, N_LAYERS, MAX_SEQ, INPUT_SIZE)
    inputs = jax.random.normal(k_in, (B, S, INPUT_SIZE), jnp.float32)

    fwd = jax.jit(lambda x, p: transformer_forward(x, p, dim=DIM))
    out = jax.block_until_ready(fwd(inputs, params))
    assert out.shape == (B, DIM), out.shape
    assert bool(jnp.all(jnp.isfinite(out)))
    print("KERNEL_OK")
</pallas_src>

<mosaic_0001>
module attributes {stable_mosaic.version = 11 : i64} {
  func.func @_transformer_kernel(%arg0: i32, %arg1: i32, %arg2: memref<2x16x128xf32, #tpu.memory_space<vmem>>, %arg3: memref<16x128xf32, #tpu.memory_space<vmem>>, %arg4: memref<128x128xbf16, #tpu.memory_space<vmem>>, %arg5: memref<1x128xf32, #tpu.memory_space<vmem>>, %arg6: memref<128x128xbf16, #tpu.memory_space<vmem>>, %arg7: memref<1x128xf32, #tpu.memory_space<vmem>>, %arg8: memref<1x128x384xbf16, #tpu.memory_space<vmem>>, %arg9: memref<1x1x384xf32, #tpu.memory_space<vmem>>, %arg10: memref<1x128x128xbf16, #tpu.memory_space<vmem>>, %arg11: memref<1x1x128xf32, #tpu.memory_space<vmem>>, %arg12: memref<1x1x128xf32, #tpu.memory_space<vmem>>, %arg13: memref<1x1x128xf32, #tpu.memory_space<vmem>>, %arg14: memref<1x128x2048xbf16, #tpu.memory_space<vmem>>, %arg15: memref<1x1x2048xf32, #tpu.memory_space<vmem>>, %arg16: memref<1x2048x128xbf16, #tpu.memory_space<vmem>>, %arg17: memref<1x1x128xf32, #tpu.memory_space<vmem>>, %arg18: memref<1x1x128xf32, #tpu.memory_space<vmem>>, %arg19: memref<1x1x128xf32, #tpu.memory_space<vmem>>, %arg20: memref<1x2x128xf32, #tpu.memory_space<vmem>>, %arg21: memref<2x16x128xf32, #tpu.memory_space<vmem>>) attributes {dimension_semantics = [#tpu.dimension_semantics<parallel>, #tpu.dimension_semantics<arbitrary>], iteration_bounds = array<i64: 1, 2>, scalar_prefetch = 0 : i64, scratch_operands = 1 : i64, tpu.core_type = #tpu.core_type<tc>, window_params = [{transform_indices = @transform_0, window_bounds = array<i64: 2, 16, 128>}, {pipeline_mode = #tpu.pipeline_mode<synchronous>, transform_indices = @transform_1, window_bounds = array<i64: 16, 128>}, {pipeline_mode = #tpu.pipeline_mode<synchronous>, transform_indices = @transform_2, window_bounds = array<i64: 128, 128>}, {pipeline_mode = #tpu.pipeline_mode<synchronous>, transform_indices = @transform_3, window_bounds = array<i64: 1, 128>}, {pipeline_mode = #tpu.pipeline_mode<synchronous>, transform_indices = @transform_4, window_bounds = array<i64: 128, 128>}, {pipeline_mode = #tpu.pipeline_mode<synchronous>, transform_indices = @transform_5, window_bounds = array<i64: 1, 128>}, {transform_indices = @transform_6, window_bounds = array<i64: 1, 128, 384>}, {transform_indices = @transform_7, window_bounds = array<i64: 1, 1, 384>}, {transform_indices = @transform_8, window_bounds = array<i64: 1, 128, 128>}, {transform_indices = @transform_9, window_bounds = array<i64: 1, 1, 128>}, {transform_indices = @transform_10, window_bounds = array<i64: 1, 1, 128>}, {transform_indices = @transform_11, window_bounds = array<i64: 1, 1, 128>}, {transform_indices = @transform_12, window_bounds = array<i64: 1, 128, 2048>}, {transform_indices = @transform_13, window_bounds = array<i64: 1, 1, 2048>}, {transform_indices = @transform_14, window_bounds = array<i64: 1, 2048, 128>}, {transform_indices = @transform_15, window_bounds = array<i64: 1, 1, 128>}, {transform_indices = @transform_16, window_bounds = array<i64: 1, 1, 128>}, {transform_indices = @transform_17, window_bounds = array<i64: 1, 1, 128>}, {transform_indices = @transform_18, window_bounds = array<i64: 1, 2, 128>}]} {
    %c0_i32 = arith.constant 0 : i32
    %0 = arith.cmpi eq, %arg1, %c0_i32 : i32
    %1 = arith.extui %0 : i1 to i32
    %c0_i32_0 = arith.constant 0 : i32
    %2 = arith.cmpi ne, %1, %c0_i32_0 : i32
    scf.if %2 {
      %c0_29 = arith.constant 0 : index
      %c0_30 = arith.constant 0 : index
      %c0_31 = arith.constant 0 : index
      %80 = vector.load %arg2[%c0_29, %c0_30, %c0_31] : memref<2x16x128xf32, #tpu.memory_space<vmem>>, vector<2x16x128xf32>
      %81 = vector.shape_cast %80 : vector<2x16x128xf32> to vector<32x128xf32>
      %c0_32 = arith.constant 0 : index
      %c0_33 = arith.constant 0 : index
      %82 = vector.load %arg4[%c0_32, %c0_33] : memref<128x128xbf16, #tpu.memory_space<vmem>>, vector<128x128xbf16>
      %83 = arith.truncf %81 : vector<32x128xf32> to vector<32x128xbf16>
      %cst_34 = arith.constant dense<0.000000e+00> : vector<32x128xf32>
      %84 = tpu.matmul %83, %82, %cst_34 {dimension_numbers = #tpu.dot_dimension_numbers<[1], [0], [0], [1], [0, 0, 1, 1], [], []>} : vector<32x128xbf16>, vector<128x128xbf16>, vector<32x128xf32> -> vector<32x128xf32>
      %c0_35 = arith.constant 0 : index
      %c0_36 = arith.constant 0 : index
      %85 = vector.load %arg5[%c0_35, %c0_36] : memref<1x128xf32, #tpu.memory_space<vmem>>, vector<1x128xf32>
      %86 = vector.broadcast %85 : vector<1x128xf32> to vector<32x128xf32>
      %87 = arith.addf %84, %86 : vector<32x128xf32>
      %cst_37 = arith.constant 0.000000e+00 : f32
      %88 = vector.broadcast %cst_37 : f32 to vector<32x128xf32>
      %89 = arith.cmpf oge, %87, %88 : vector<32x128xf32>
      %cst_38 = arith.constant 0.00999999977 : f32
      %90 = vector.broadcast %cst_38 : f32 to vector<32x128xf32>
      %91 = arith.mulf %90, %87 : vector<32x128xf32>
      %92 = arith.select %89, %87, %91 : vector<32x128xi1>, vector<32x128xf32>
      %c0_39 = arith.constant 0 : index
      %c0_40 = arith.constant 0 : index
      %93 = vector.load %arg6[%c0_39, %c0_40] : memref<128x128xbf16, #tpu.memory_space<vmem>>, vector<128x128xbf16>
      %94 = arith.truncf %92 : vector<32x128xf32> to vector<32x128xbf16>
      %cst_41 = arith.constant dense<0.000000e+00> : vector<32x128xf32>
      %95 = tpu.matmul %94, %93, %cst_41 {dimension_numbers = #tpu.dot_dimension_numbers<[1], [0], [0], [1], [0, 0, 1, 1], [], []>} : vector<32x128xbf16>, vector<128x128xbf16>, vector<32x128xf32> -> vector<32x128xf32>
      %c0_42 = arith.constant 0 : index
      %c0_43 = arith.constant 0 : index
      %96 = vector.load %arg7[%c0_42, %c0_43] : memref<1x128xf32, #tpu.memory_space<vmem>>, vector<1x128xf32>
      %97 = vector.broadcast %96 : vector<1x128xf32> to vector<32x128xf32>
      %98 = arith.addf %95, %97 : vector<32x128xf32>
      %99 = vector.shape_cast %98 : vector<32x128xf32> to vector<2x16x128xf32>
      %c0_44 = arith.constant 0 : index
      %c0_45 = arith.constant 0 : index
      %100 = vector.load %arg3[%c0_44, %c0_45] : memref<16x128xf32, #tpu.memory_space<vmem>>, vector<16x128xf32>
      %101 = vector.shape_cast %100 : vector<16x128xf32> to vector<1x16x128xf32>
      %102 = vector.broadcast %101 : vector<1x16x128xf32> to vector<2x16x128xf32>
      %103 = arith.addf %99, %102 : vector<2x16x128xf32>
      %c0_46 = arith.constant 0 : index
      %c0_47 = arith.constant 0 : index
      %c0_48 = arith.constant 0 : index
      %104 = vector.load %arg21[%c0_46, %c0_47, %c0_48] : memref<2x16x128xf32, #tpu.memory_space<vmem>>, vector<2x16x128xf32>
      tpu.vector_store %arg21[%c0_46, %c0_47, %c0_48], %103 {strides = array<i32>} : memref<2x16x128xf32, #tpu.memory_space<vmem>>, vector<2x16x128xf32>,
    } else {
    }
    %c0 = arith.constant 0 : index
    %c0_1 = arith.constant 0 : index
    %c0_2 = arith.constant 0 : index
    %3 = vector.load %arg21[%c0, %c0_1, %c0_2] : memref<2x16x128xf32, #tpu.memory_space<vmem>>, vector<2x16x128xf32>
    %4 = vector.shape_cast %3 : vector<2x16x128xf32> to vector<32x128xf32>
    %c0_3 = arith.constant 0 : index
    %c0_4 = arith.constant 0 : index
    %c0_5 = arith.constant 0 : index
    %5 = vector.load %arg8[%c0_3, %c0_4, %c0_5] : memref<1x128x384xbf16, #tpu.memory_space<vmem>>, vector<1x128x384xbf16>
    %6 = vector.shape_cast %5 : vector<1x128x384xbf16> to vector<128x384xbf16>
    %7 = arith.truncf %4 : vector<32x128xf32> to vector<32x128xbf16>
    %cst = arith.constant dense<0.000000e+00> : vector<32x384xf32>
    %8 = tpu.matmul %7, %6, %cst {dimension_numbers = #tpu.dot_dimension_numbers<[1], [0], [0], [1], [0, 0, 1, 1], [], []>} : vector<32x128xbf16>, vector<128x384xbf16>, vector<32x384xf32> -> vector<32x384xf32>
    %c0_6 = arith.constant 0 : index
    %c0_7 = arith.constant 0 : index
    %c0_8 = arith.constant 0 : index
    %9 = vector.load %arg9[%c0_6, %c0_7, %c0_8] : memref<1x1x384xf32, #tpu.memory_space<vmem>>, vector<1x1x384xf32>
    %10 = vector.shape_cast %9 : vector<1x1x384xf32> to vector<1x384xf32>
    %11 = vector.broadcast %10 : vector<1x384xf32> to vector<32x384xf32>
    %12 = arith.addf %8, %11 : vector<32x384xf32>
    %13 = vector.extract_strided_slice %12 {offsets = [0, 0], sizes = [32, 128], strides = [1, 1]} : vector<32x384xf32> to vector<32x128xf32>
    %14 = vector.shape_cast %13 : vector<32x128xf32> to vector<2x16x128xf32>
    %15 = arith.truncf %14 : vector<2x16x128xf32> to vector<2x16x128xbf16>
    %16 = vector.extract_strided_slice %12 {offsets = [0, 128], sizes = [32, 128], strides = [1, 1]} : vector<32x384xf32> to vector<32x128xf32>
    %17 = vector.shape_cast %16 : vector<32x128xf32> to vector<2x16x128xf32>
    %18 = arith.truncf %17 : vector<2x16x128xf32> to vector<2x16x128xbf16>
    %19 = vector.extract_strided_slice %12 {offsets = [0, 256], sizes = [32, 128], strides = [1, 1]} : vector<32x384xf32> to vector<32x128xf32>
    %20 = vector.shape_cast %19 : vector<32x128xf32> to vector<2x16x128xf32>
    %21 = arith.truncf %20 : vector<2x16x128xf32> to vector<2x16x128xbf16>
    "tpu.trace_start"() <{level = 10 : i32, message = "bqd,bkd->bqk"}> : () -> ()
    %cst_9 = arith.constant dense<0.000000e+00> : vector<2x16x16xf32>
    %22 = tpu.matmul %15, %18, %cst_9 {dimension_numbers = #tpu.dot_dimension_numbers<[2], [2], [1], [1], [0, 0, 0, 1, 1, 1], [0], [0]>} : vector<2x16x128xbf16>, vector<2x16x128xbf16>, vector<2x16x16xf32> -> vector<2x16x16xf32>
    "tpu.trace_stop"() : () -> ()
    %23 = tpu.iota {dimensions = array<i32: 1>} : vector<1x16xi32>
    %c9_i32 = arith.constant 9 : i32
    %24 = vector.broadcast %c9_i32 : i32 to vector<1x16xi32>
    %25 = arith.cmpi slt, %23, %24 : vector<1x16xi32>
    %26 = vector.shape_cast %25 : vector<1x16xi1> to vector<1x1x16xi1>
    %cst_10 = arith.constant -1.000000e+30 : f32
    %27 = vector.shape_cast %26 : vector<1x1x16xi1> to vector<1x1x16xi1>
    %28 = vector.broadcast %27 : vector<1x1x16xi1> to vector<2x16x16xi1>
    %29 = vector.broadcast %cst_10 : f32 to vector<2x16x16xf32>
    %30 = arith.select %28, %22, %29 : vector<2x16x16xi1>, vector<2x16x16xf32>
    %cst_11 = arith.constant dense<0xFF800000> : vector<2x16xf32>
    %31 = vector.multi_reduction <maximumf>, %30, %cst_11 [2] : vector<2x16x16xf32> to vector<2x16xf32>
    %32 = vector.shape_cast %31 : vector<2x16xf32> to vector<2x16x1xf32>
    %33 = vector.broadcast %32 : vector<2x16x1xf32> to vector<2x16x16xf32>
    %34 = arith.subf %30, %33 : vector<2x16x16xf32>
    %35 = math.exp %34 : vector<2x16x16xf32>
    %cst_12 = arith.constant dense<0.000000e+00> : vector<2x16xf32>
    %36 = vector.multi_reduction <add>, %35, %cst_12 [2] : vector<2x16x16xf32> to vector<2x16xf32>
    %37 = vector.shape_cast %36 : vector<2x16xf32> to vector<2x16x1xf32>
    %38 = tpu.reciprocal %37 {approx = true} : vector<2x16x1xf32> -> vector<2x16x1xf32>
    %39 = vector.broadcast %38 : vector<2x16x1xf32> to vector<2x16x16xf32>
    %40 = arith.mulf %35, %39 : vector<2x16x16xf32>
    %41 = arith.truncf %40 : vector<2x16x16xf32> to vector<2x16x16xbf16>
    "tpu.trace_start"() <{level = 10 : i32, message = "bqk,bkd->bqd"}> : () -> ()
    %cst_13 = arith.constant dense<0.000000e+00> : vector<2x16x128xf32>
    %42 = tpu.matmul %41, %21, %cst_13 {dimension_numbers = #tpu.dot_dimension_numbers<[2], [1], [1], [2], [0, 0, 0, 1, 1, 2], [0], [0]>} : vector<2x16x16xbf16>, vector<2x16x128xbf16>, vector<2x16x128xf32> -> vector<2x16x128xf32>
    "tpu.trace_stop"() : () -> ()
    %43 = arith.addf %3, %42 : vector<2x16x128xf32>
    %c0_14 = arith.constant 0 : index
    %c0_15 = arith.constant 0 : index
    %c0_16 = arith.constant 0 : index
    %44 = vector.load %arg12[%c0_14, %c0_15, %c0_16] : memref<1x1x128xf32, #tpu.memory_space<vmem>>, vector<1x1x128xf32>
    %45 = vector.shape_cast %44 : vector<1x1x128xf32> to vector<1x128xf32>
    %c0_17 = arith.constant 0 : index
    %c0_18 = arith.constant 0 : index
    %c0_19 = arith.constant 0 : index
    %46 = vector.load %arg13[%c0_17, %c0_18, %c0_19] : memref<1x1x128xf32, #tpu.memory_space<vmem>>, vector<1x1x128xf32>
    %47 = vector.shape_cast %46 : vector<1x1x128xf32> to vector<1x128xf32>
    %cst_20 = arith.constant dense<0.000000e+00> : vector<2x16xf32>
    %48 = vector.multi_reduction <add>, %43, %cst_20 [2] : vector<2x16x128xf32> to vector<2x16xf32>
    %49 = vector.shape_cast %48 : vector<2x16xf32> to vector<2x16x1xf32>
    %cst_21 = arith.constant 3.125000e-02 : f32
    %50 = vector.broadcast %cst_21 : f32 to vector<2x16x1xf32>
    %51 = arith.mulf %49, %50 : vector<2x16x1xf32>
    %52 = arith.mulf %43, %43 : vector<2x16x128xf32>
    %cst_22 = arith.constant dense<0.000000e+00> : vector<2x16xf32>
    %53 = vector.multi_reduction <add>, %52, %cst_22 [2] : vector<2x16x128xf32> to vector<2x16xf32>
    %54 = vector.shape_cast %53 : vector<2x16xf32> to vector<2x16x1xf32>
    %cst_23 = arith.constant 3.125000e-02 : f32
    %55 = vector.broadcast %cst_23 : f32 to vector<2x16x1xf32>
    %56 = arith.mulf %54, %55 : vector<2x16x1xf32>
    %57 = arith.mulf %51, %51 : vector<2x16x1xf32>
    %58 = arith.subf %56, %57 : vector<2x16x1xf32>
    %cst_24 = arith.constant 0.000000e+00 : f32
    %59 = vector.broadcast %cst_24 : f32 to vector<2x16x1xf32>
    %60 = arith.maximumf %58, %59 : vector<2x16x1xf32>
    %61 = vector.broadcast %51 : vector<2x16x1xf32> to vector<2x16x128xf32>
    %62 = arith.subf %43, %61 : vector<2x16x128xf32>
    %cst_25 = arith.constant 9.99999974E-6 : f32
    %63 = vector.broadcast %cst_25 : f32 to vector<2x16x1xf32>
    %64 = arith.addf %60, %63 : vector<2x16x1xf32>
    %65 = math.rsqrt %64 : vector<2x16x1xf32>
    %66 = vector.broadcast %65 : vector<2x16x1xf32> to vector<2x16x128xf32>
    %67 = arith.mulf %62, %66 : vector<2x16x128xf32>
    %68 = vector.shape_cast %45 : vector<1x128xf32> to vector<1x1x128xf32>
    %69 = vector.broadcast %68 : vector<1x1x128xf32> to vector<2x16x128xf32>
    %70 = arith.mulf %67, %69 : vector<2x16x128xf32>
    %71 = vector.shape_cast %47 : vector<1x128xf32> to vector<1x1x128xf32>
    %72 = vector.broadcast %71 : vector<1x1x128xf32> to vector<2x16x128xf32>
    %73 = arith.addf %70, %72 : vector<2x16x128xf32>
    %c1_i32 = arith.constant 1 : i32
    %74 = arith.cmpi slt, %arg1, %c1_i32 : i32
    %75 = arith.extui %74 : i1 to i32
    %c0_i32_26 = arith.constant 0 : i32
    %76 = arith.cmpi ne, %75, %c0_i32_26 : i32
    scf.if %76 {
      %80 = vector.shape_cast %73 : vector<2x16x128xf32> to vector<32x128xf32>
      %c0_29 = arith.constant 0 : index
      %c0_30 = arith.constant 0 : index
      %c0_31 = arith.constant 0 : index
      %81 = vector.load %arg10[%c0_29, %c0_30, %c0_31] : memref<1x128x128xbf16, #tpu.memory_space<vmem>>, vector<1x128x128xbf16>
      %82 = vector.shape_cast %81 : vector<1x128x128xbf16> to vector<128x128xbf16>
      %83 = arith.truncf %80 : vector<32x128xf32> to vector<32x128xbf16>
      %cst_32 = arith.constant dense<0.000000e+00> : vector<32x128xf32>
      %84 = tpu.matmul %83, %82, %cst_32 {dimension_numbers = #tpu.dot_dimension_numbers<[1], [0], [0], [1], [0, 0, 1, 1], [], []>} : vector<32x128xbf16>, vector<128x128xbf16>, vector<32x128xf32> -> vector<32x128xf32>
      %c0_33 = arith.constant 0 : index
      %c0_34 = arith.constant 0 : index
      %c0_35 = arith.constant 0 : index
      %85 = vector.load %arg11[%c0_33, %c0_34, %c0_35] : memref<1x1x128xf32, #tpu.memory_space<vmem>>, vector<1x1x128xf32>
      %86 = vector.shape_cast %85 : vector<1x1x128xf32> to vector<1x128xf32>
      %87 = vector.broadcast %86 : vector<1x128xf32> to vector<32x128xf32>
      %88 = arith.addf %84, %87 : vector<32x128xf32>
      %c0_36 = arith.constant 0 : index
      %c0_37 = arith.constant 0 : index
      %c0_38 = arith.constant 0 : index
      %89 = vector.load %arg14[%c0_36, %c0_37, %c0_38] : memref<1x128x2048xbf16, #tpu.memory_space<vmem>>, vector<1x128x2048xbf16>
      %90 = vector.shape_cast %89 : vector<1x128x2048xbf16> to vector<128x2048xbf16>
      %91 = arith.truncf %88 : vector<32x128xf32> to vector<32x128xbf16>
      %cst_39 = arith.constant dense<0.000000e+00> : vector<32x2048xf32>
      %92 = tpu.matmul %91, %90, %cst_39 {dimension_numbers = #tpu.dot_dimension_numbers<[1], [0], [0], [1], [0, 0, 1, 1], [], []>} : vector<32x128xbf16>, vector<128x2048xbf16>, vector<32x2048xf32> -> vector<32x2048xf32>
      %c0_40 = arith.constant 0 : index
      %c0_41 = arith.constant 0 : index
      %c0_42 = arith.constant 0 : index
      %93 = vector.load %arg15[%c0_40, %c0_41, %c0_42] : memref<1x1x2048xf32, #tpu.memory_space<vmem>>, vector<1x1x2048xf32>
      %94 = vector.shape_cast %93 : vector<1x1x2048xf32> to vector<1x2048xf32>
      %95 = vector.broadcast %94 : vector<1x2048xf32> to vector<32x2048xf32>
      %96 = arith.addf %92, %95 : vector<32x2048xf32>
      %cst_43 = arith.constant 0.000000e+00 : f32
      %97 = vector.broadcast %cst_43 : f32 to vector<32x2048xf32>
      %98 = arith.cmpf oge, %96, %97 : vector<32x2048xf32>
      %cst_44 = arith.constant 0.00999999977 : f32
      %99 = vector.broadcast %cst_44 : f32 to vector<32x2048xf32>
      %100 = arith.mulf %99, %96 : vector<32x2048xf32>
      %101 = arith.select %98, %96, %100 : vector<32x2048xi1>, vector<32x2048xf32>
      %102 = arith.truncf %101 : vector<32x2048xf32> to vector<32x2048xbf16>
      %c0_45 = arith.constant 0 : index
      %c0_46 = arith.constant 0 : index
      %c0_47 = arith.constant 0 : index
      %103 = vector.load %arg16[%c0_45, %c0_46, %c0_47] : memref<1x2048x128xbf16, #tpu.memory_space<vmem>>, vector<1x2048x128xbf16>
      %104 = vector.shape_cast %103 : vector<1x2048x128xbf16> to vector<2048x128xbf16>
      %cst_48 = arith.constant dense<0.000000e+00> : vector<32x128xf32>
      %105 = tpu.matmul %102, %104, %cst_48 {dimension_numbers = #tpu.dot_dimension_numbers<[1], [0], [0], [1], [0, 0, 1, 1], [], []>} : vector<32x2048xbf16>, vector<2048x128xbf16>, vector<32x128xf32> -> vector<32x128xf32>
      %c0_49 = arith.constant 0 : index
      %c0_50 = arith.constant 0 : index
      %c0_51 = arith.constant 0 : index
      %106 = vector.load %arg17[%c0_49, %c0_50, %c0_51] : memref<1x1x128xf32, #tpu.memory_space<vmem>>, vector<1x1x128xf32>
      %107 = vector.shape_cast %106 : vector<1x1x128xf32> to vector<1x128xf32>
      %108 = vector.broadcast %107 : vector<1x128xf32> to vector<32x128xf32>
      %109 = arith.addf %105, %108 : vector<32x128xf32>
      %110 = arith.addf %109, %88 : vector<32x128xf32>
      %cst_52 = arith.constant 0.000000e+00 : f32
      %111 = vector.broadcast %cst_52 : f32 to vector<32x128xf32>
      %112 = arith.cmpf oge, %110, %111 : vector<32x128xf32>
      %cst_53 = arith.constant 0.00999999977 : f32
      %113 = vector.broadcast %cst_53 : f32 to vector<32x128xf32>
      %114 = arith.mulf %113, %110 : vector<32x128xf32>
      %115 = arith.select %112, %110, %114 : vector<32x128xi1>, vector<32x128xf32>
      %c0_54 = arith.constant 0 : index
      %c0_55 = arith.constant 0 : index
      %c0_56 = arith.constant 0 : index
      %116 = vector.load %arg18[%c0_54, %c0_55, %c0_56] : memref<1x1x128xf32, #tpu.memory_space<vmem>>, vector<1x1x128xf32>
      %117 = vector.shape_cast %116 : vector<1x1x128xf32> to vector<1x128xf32>
      %c0_57 = arith.constant 0 : index
      %c0_58 = arith.constant 0 : index
      %c0_59 = arith.constant 0 : index
      %118 = vector.load %arg19[%c0_57, %c0_58, %c0_59] : memref<1x1x128xf32, #tpu.memory_space<vmem>>, vector<1x1x128xf32>
      %119 = vector.shape_cast %118 : vector<1x1x128xf32> to vector<1x128xf32>
      %cst_60 = arith.constant dense<0.000000e+00> : vector<32xf32>
      %120 = vector.multi_reduction <add>, %115, %cst_60 [1] : vector<32x128xf32> to vector<32xf32>
      %121 = vector.shape_cast %120 : vector<32xf32> to vector<32x1xf32>
      %cst_61 = arith.constant 3.125000e-02 : f32
      %122 = vector.broadcast %cst_61 : f32 to vector<32x1xf32>
      %123 = arith.mulf %121, %122 : vector<32x1xf32>
      %124 = arith.mulf %115, %115 : vector<32x128xf32>
      %cst_62 = arith.constant dense<0.000000e+00> : vector<32xf32>
      %125 = vector.multi_reduction <add>, %124, %cst_62 [1] : vector<32x128xf32> to vector<32xf32>
      %126 = vector.shape_cast %125 : vector<32xf32> to vector<32x1xf32>
      %cst_63 = arith.constant 3.125000e-02 : f32
      %127 = vector.broadcast %cst_63 : f32 to vector<32x1xf32>
      %128 = arith.mulf %126, %127 : vector<32x1xf32>
      %129 = arith.mulf %123, %123 : vector<32x1xf32>
      %130 = arith.subf %128, %129 : vector<32x1xf32>
      %cst_64 = arith.constant 0.000000e+00 : f32
      %131 = vector.broadcast %cst_64 : f32 to vector<32x1xf32>
      %132 = arith.maximumf %130, %131 : vector<32x1xf32>
      %133 = vector.broadcast %123 : vector<32x1xf32> to vector<32x128xf32>
      %134 = arith.subf %115, %133 : vector<32x128xf32>
      %cst_65 = arith.constant 9.99999974E-6 : f32
      %135 = vector.broadcast %cst_65 : f32 to vector<32x1xf32>
      %136 = arith.addf %132, %135 : vector<32x1xf32>
      %137 = math.rsqrt %136 : vector<32x1xf32>
      %138 = vector.broadcast %137 : vector<32x1xf32> to vector<32x128xf32>
      %139 = arith.mulf %134, %138 : vector<32x128xf32>
      %140 = vector.broadcast %117 : vector<1x128xf32> to vector<32x128xf32>
      %141 = arith.mulf %139, %140 : vector<32x128xf32>
      %142 = vector.broadcast %119 : vector<1x128xf32> to vector<32x128xf32>
      %143 = arith.addf %141, %142 : vector<32x128xf32>
      %144 = vector.shape_cast %143 : vector<32x128xf32> to vector<2x16x128xf32>
      %c0_66 = arith.constant 0 : index
      %c0_67 = arith.constant 0 : index
      %c0_68 = arith.constant 0 : index
      %145 = vector.load %arg21[%c0_66, %c0_67, %c0_68] : memref<2x16x128xf32, #tpu.memory_space<vmem>>, vector<2x16x128xf32>
      tpu.vector_store %arg21[%c0_66, %c0_67, %c0_68], %144 {strides = array<i32>} : memref<2x16x128xf32, #tpu.memory_space<vmem>>, vector<2x16x128xf32>,
    } else {
    }
    %c1_i32_27 = arith.constant 1 : i32
    %77 = arith.cmpi eq, %arg1, %c1_i32_27 : i32
    %78 = arith.extui %77 : i1 to i32
    %c0_i32_28 = arith.constant 0 : i32
    %79 = arith.cmpi ne, %78, %c0_i32_28 : i32
    scf.if %79 {
      %80 = vector.extract_strided_slice %73 {offsets = [0, 0, 0], sizes = [2, 1, 128], strides = [1, 1, 1]} : vector<2x16x128xf32> to vector<2x1x128xf32>
      %81 = vector.shape_cast %80 : vector<2x1x128xf32> to vector<2x128xf32>
      %c0_29 = arith.constant 0 : index
      %c0_30 = arith.constant 0 : index
      %c0_31 = arith.constant 0 : index
      %82 = vector.load %arg10[%c0_29, %c0_30, %c0_31] : memref<1x128x128xbf16, #tpu.memory_space<vmem>>, vector<1x128x128xbf16>
      %83 = vector.shape_cast %82 : vector<1x128x128xbf16> to vector<128x128xbf16>
      %84 = arith.truncf %81 : vector<2x128xf32> to vector<2x128xbf16>
      %cst_32 = arith.constant dense<0.000000e+00> : vector<2x128xf32>
      %85 = tpu.matmul %84, %83, %cst_32 {dimension_numbers = #tpu.dot_dimension_numbers<[1], [0], [0], [1], [0, 0, 1, 1], [], []>} : vector<2x128xbf16>, vector<128x128xbf16>, vector<2x128xf32> -> vector<2x128xf32>
      %c0_33 = arith.constant 0 : index
      %c0_34 = arith.constant 0 : index
      %c0_35 = arith.constant 0 : index
      %86 = vector.load %arg11[%c0_33, %c0_34, %c0_35] : memref<1x1x128xf32, #tpu.memory_space<vmem>>, vector<1x1x128xf32>
      %87 = vector.shape_cast %86 : vector<1x1x128xf32> to vector<1x128xf32>
      %88 = vector.broadcast %87 : vector<1x128xf32> to vector<2x128xf32>
      %89 = arith.addf %85, %88 : vector<2x128xf32>
      %c0_36 = arith.constant 0 : index
      %c0_37 = arith.constant 0 : index
      %c0_38 = arith.constant 0 : index
      %90 = vector.load %arg14[%c0_36, %c0_37, %c0_38] : memref<1x128x2048xbf16, #tpu.memory_space<vmem>>, vector<1x128x2048xbf16>
      %91 = vector.shape_cast %90 : vector<1x128x2048xbf16> to vector<128x2048xbf16>
      %92 = arith.truncf %89 : vector<2x128xf32> to vector<2x128xbf16>
      %cst_39 = arith.constant dense<0.000000e+00> : vector<2x2048xf32>
      %93 = tpu.matmul %92, %91, %cst_39 {dimension_numbers = #tpu.dot_dimension_numbers<[1], [0], [0], [1], [0, 0, 1, 1], [], []>} : vector<2x128xbf16>, vector<128x2048xbf16>, vector<2x2048xf32> -> vector<2x2048xf32>
      %c0_40 = arith.constant 0 : index
      %c0_41 = arith.constant 0 : index
      %c0_42 = arith.constant 0 : index
      %94 = vector.load %arg15[%c0_40, %c0_41, %c0_42] : memref<1x1x2048xf32, #tpu.memory_space<vmem>>, vector<1x1x2048xf32>
      %95 = vector.shape_cast %94 : vector<1x1x2048xf32> to vector<1x2048xf32>
      %96 = vector.broadcast %95 : vector<1x2048xf32> to vector<2x2048xf32>
      %97 = arith.addf %93, %96 : vector<2x2048xf32>
      %cst_43 = arith.constant 0.000000e+00 : f32
      %98 = vector.broadcast %cst_43 : f32 to vector<2x2048xf32>
      %99 = arith.cmpf oge, %97, %98 : vector<2x2048xf32>
      %cst_44 = arith.constant 0.00999999977 : f32
      %100 = vector.broadcast %cst_44 : f32 to vector<2x2048xf32>
      %101 = arith.mulf %100, %97 : vector<2x2048xf32>
      %102 = arith.select %99, %97, %101 : vector<2x2048xi1>, vector<2x2048xf32>
      %103 = arith.truncf %102 : vector<2x2048xf32> to vector<2x2048xbf16>
      %c0_45 = arith.constant 0 : index
      %c0_46 = arith.constant 0 : index
      %c0_47 = arith.constant 0 : index
      %104 = vector.load %arg16[%c0_45, %c0_46, %c0_47] : memref<1x2048x128xbf16, #tpu.memory_space<vmem>>, vector<1x2048x128xbf16>
      %105 = vector.shape_cast %104 : vector<1x2048x128xbf16> to vector<2048x128xbf16>
      %cst_48 = arith.constant dense<0.000000e+00> : vector<2x128xf32>
      %106 = tpu.matmul %103, %105, %cst_48 {dimension_numbers = #tpu.dot_dimension_numbers<[1], [0], [0], [1], [0, 0, 1, 1], [], []>} : vector<2x2048xbf16>, vector<2048x128xbf16>, vector<2x128xf32> -> vector<2x128xf32>
      %c0_49 = arith.constant 0 : index
      %c0_50 = arith.constant 0 : index
      %c0_51 = arith.constant 0 : index
      %107 = vector.load %arg17[%c0_49, %c0_50, %c0_51] : memref<1x1x128xf32, #tpu.memory_space<vmem>>, vector<1x1x128xf32>
      %108 = vector.shape_cast %107 : vector<1x1x128xf32> to vector<1x128xf32>
      %109 = vector.broadcast %108 : vector<1x128xf32> to vector<2x128xf32>
      %110 = arith.addf %106, %109 : vector<2x128xf32>
      %111 = arith.addf %110, %89 : vector<2x128xf32>
      %cst_52 = arith.constant 0.000000e+00 : f32
      %112 = vector.broadcast %cst_52 : f32 to vector<2x128xf32>
      %113 = arith.cmpf oge, %111, %112 : vector<2x128xf32>
      %cst_53 = arith.constant 0.00999999977 : f32
      %114 = vector.broadcast %cst_53 : f32 to vector<2x128xf32>
      %115 = arith.mulf %114, %111 : vector<2x128xf32>
      %116 = arith.select %113, %111, %115 : vector<2x128xi1>, vector<2x128xf32>
      %c0_54 = arith.constant 0 : index
      %c0_55 = arith.constant 0 : index
      %c0_56 = arith.constant 0 : index
      %117 = vector.load %arg18[%c0_54, %c0_55, %c0_56] : memref<1x1x128xf32, #tpu.memory_space<vmem>>, vector<1x1x128xf32>
      %118 = vector.shape_cast %117 : vector<1x1x128xf32> to vector<1x128xf32>
      %c0_57 = arith.constant 0 : index
      %c0_58 = arith.constant 0 : index
      %c0_59 = arith.constant 0 : index
      %119 = vector.load %arg19[%c0_57, %c0_58, %c0_59] : memref<1x1x128xf32, #tpu.memory_space<vmem>>, vector<1x1x128xf32>
      %120 = vector.shape_cast %119 : vector<1x1x128xf32> to vector<1x128xf32>
      %cst_60 = arith.constant dense<0.000000e+00> : vector<2xf32>
      %121 = vector.multi_reduction <add>, %116, %cst_60 [1] : vector<2x128xf32> to vector<2xf32>
      %122 = vector.shape_cast %121 : vector<2xf32> to vector<2x1xf32>
      %cst_61 = arith.constant 3.125000e-02 : f32
      %123 = vector.broadcast %cst_61 : f32 to vector<2x1xf32>
      %124 = arith.mulf %122, %123 : vector<2x1xf32>
      %125 = arith.mulf %116, %116 : vector<2x128xf32>
      %cst_62 = arith.constant dense<0.000000e+00> : vector<2xf32>
      %126 = vector.multi_reduction <add>, %125, %cst_62 [1] : vector<2x128xf32> to vector<2xf32>
      %127 = vector.shape_cast %126 : vector<2xf32> to vector<2x1xf32>
      %cst_63 = arith.constant 3.125000e-02 : f32
      %128 = vector.broadcast %cst_63 : f32 to vector<2x1xf32>
      %129 = arith.mulf %127, %128 : vector<2x1xf32>
      %130 = arith.mulf %124, %124 : vector<2x1xf32>
      %131 = arith.subf %129, %130 : vector<2x1xf32>
      %cst_64 = arith.constant 0.000000e+00 : f32
      %132 = vector.broadcast %cst_64 : f32 to vector<2x1xf32>
      %133 = arith.maximumf %131, %132 : vector<2x1xf32>
      %134 = vector.broadcast %124 : vector<2x1xf32> to vector<2x128xf32>
      %135 = arith.subf %116, %134 : vector<2x128xf32>
      %cst_65 = arith.constant 9.99999974E-6 : f32
      %136 = vector.broadcast %cst_65 : f32 to vector<2x1xf32>
      %137 = arith.addf %133, %136 : vector<2x1xf32>
      %138 = math.rsqrt %137 : vector<2x1xf32>
      %139 = vector.broadcast %138 : vector<2x1xf32> to vector<2x128xf32>
      %140 = arith.mulf %135, %139 : vector<2x128xf32>
      %141 = vector.broadcast %118 : vector<1x128xf32> to vector<2x128xf32>
      %142 = arith.mulf %140, %141 : vector<2x128xf32>
      %143 = vector.broadcast %120 : vector<1x128xf32> to vector<2x128xf32>
      %144 = arith.addf %142, %143 : vector<2x128xf32>
      %c0_66 = arith.constant 0 : index
      %c0_67 = arith.constant 0 : index
      %c0_68 = arith.constant 0 : index
      %145 = vector.load %arg20[%c0_66, %c0_67, %c0_68] : memref<1x2x128xf32, #tpu.memory_space<vmem>>, vector<1x2x128xf32>
      %146 = vector.shape_cast %145 : vector<1x2x128xf32> to vector<2x128xf32>
      %147 = vector.shape_cast %144 : vector<2x128xf32> to vector<1x2x128xf32>
      tpu.vector_store %arg20[%c0_66, %c0_67, %c0_68], %147 {strides = array<i32>} : memref<1x2x128xf32, #tpu.memory_space<vmem>>, vector<1x2x128xf32>,
    } else {
    }
    return
  }
  func.func @transform_0(%arg0: i32, %arg1: i32) -> (i32, i32, i32) {
    %c0_i32 = arith.constant 0 : i32
    %c0_i32_0 = arith.constant 0 : i32
    %c0_i32_1 = arith.constant 0 : i32
    return %arg0, %c0_i32, %c0_i32_0 : i32, i32, i32
  }
  func.func @transform_1(%arg0: i32, %arg1: i32) -> (i32, i32) {
    %c0_i32 = arith.constant 0 : i32
    %c0_i32_0 = arith.constant 0 : i32
    %c0_i32_1 = arith.constant 0 : i32
    return %c0_i32, %c0_i32_0 : i32, i32
  }
  func.func @transform_2(%arg0: i32, %arg1: i32) -> (i32, i32) {
    %c0_i32 = arith.constant 0 : i32
    %c0_i32_0 = arith.constant 0 : i32
    %c0_i32_1 = arith.constant 0 : i32
    return %c0_i32, %c0_i32_0 : i32, i32
  }
  func.func @transform_3(%arg0: i32, %arg1: i32) -> (i32, i32) {
    %c0_i32 = arith.constant 0 : i32
    %c0_i32_0 = arith.constant 0 : i32
    %c0_i32_1 = arith.constant 0 : i32
    return %c0_i32, %c0_i32_0 : i32, i32
  }
  func.func @transform_4(%arg0: i32, %arg1: i32) -> (i32, i32) {
    %c0_i32 = arith.constant 0 : i32
    %c0_i32_0 = arith.constant 0 : i32
    %c0_i32_1 = arith.constant 0 : i32
    return %c0_i32, %c0_i32_0 : i32, i32
  }
  func.func @transform_5(%arg0: i32, %arg1: i32) -> (i32, i32) {
    %c0_i32 = arith.constant 0 : i32
    %c0_i32_0 = arith.constant 0 : i32
    %c0_i32_1 = arith.constant 0 : i32
    return %c0_i32, %c0_i32_0 : i32, i32
  }
  func.func @transform_6(%arg0: i32, %arg1: i32) -> (i32, i32, i32) {
    %c0_i32 = arith.constant 0 : i32
    %c0_i32_0 = arith.constant 0 : i32
    %c0_i32_1 = arith.constant 0 : i32
    return %arg1, %c0_i32, %c0_i32_0 : i32, i32, i32
  }
  func.func @transform_7(%arg0: i32, %arg1: i32) -> (i32, i32, i32) {
    %c0_i32 = arith.constant 0 : i32
    %c0_i32_0 = arith.constant 0 : i32
    %c0_i32_1 = arith.constant 0 : i32
    return %arg1, %c0_i32, %c0_i32_0 : i32, i32, i32
  }
  func.func @transform_8(%arg0: i32, %arg1: i32) -> (i32, i32, i32) {
    %c0_i32 = arith.constant 0 : i32
    %c0_i32_0 = arith.constant 0 : i32
    %c0_i32_1 = arith.constant 0 : i32
    return %arg1, %c0_i32, %c0_i32_0 : i32, i32, i32
  }
  func.func @transform_9(%arg0: i32, %arg1: i32) -> (i32, i32, i32) {
    %c0_i32 = arith.constant 0 : i32
    %c0_i32_0 = arith.constant 0 : i32
    %c0_i32_1 = arith.constant 0 : i32
    return %arg1, %c0_i32, %c0_i32_0 : i32, i32, i32
  }
  func.func @transform_10(%arg0: i32, %arg1: i32) -> (i32, i32, i32) {
    %c0_i32 = arith.constant 0 : i32
    %c0_i32_0 = arith.constant 0 : i32
    %c0_i32_1 = arith.constant 0 : i32
    return %arg1, %c0_i32, %c0_i32_0 : i32, i32, i32
  }
  func.func @transform_11(%arg0: i32, %arg1: i32) -> (i32, i32, i32) {
    %c0_i32 = arith.constant 0 : i32
    %c0_i32_0 = arith.constant 0 : i32
    %c0_i32_1 = arith.constant 0 : i32
    return %arg1, %c0_i32, %c0_i32_0 : i32, i32, i32
  }
  func.func @transform_12(%arg0: i32, %arg1: i32) -> (i32, i32, i32) {
    %c0_i32 = arith.constant 0 : i32
    %c0_i32_0 = arith.constant 0 : i32
    %c0_i32_1 = arith.constant 0 : i32
    return %arg1, %c0_i32, %c0_i32_0 : i32, i32, i32
  }
  func.func @transform_13(%arg0: i32, %arg1: i32) -> (i32, i32, i32) {
    %c0_i32 = arith.constant 0 : i32
    %c0_i32_0 = arith.constant 0 : i32
    %c0_i32_1 = arith.constant 0 : i32
    return %arg1, %c0_i32, %c0_i32_0 : i32, i32, i32
  }
  func.func @transform_14(%arg0: i32, %arg1: i32) -> (i32, i32, i32) {
    %c0_i32 = arith.constant 0 : i32
    %c0_i32_0 = arith.constant 0 : i32
    %c0_i32_1 = arith.constant 0 : i32
    return %arg1, %c0_i32, %c0_i32_0 : i32, i32, i32
  }
  func.func @transform_15(%arg0: i32, %arg1: i32) -> (i32, i32, i32) {
    %c0_i32 = arith.constant 0 : i32
    %c0_i32_0 = arith.constant 0 : i32
    %c0_i32_1 = arith.constant 0 : i32
    return %arg1, %c0_i32, %c0_i32_0 : i32, i32, i32
  }
  func.func @transform_16(%arg0: i32, %arg1: i32) -> (i32, i32, i32) {
    %c0_i32 = arith.constant 0 : i32
    %c0_i32_0 = arith.constant 0 : i32
    %c0_i32_1 = arith.constant 0 : i32
    return %arg1, %c0_i32, %c0_i32_0 : i32, i32, i32
  }
  func.func @transform_17(%arg0: i32, %arg1: i32) -> (i32, i32, i32) {
    %c0_i32 = arith.constant 0 : i32
    %c0_i32_0 = arith.constant 0 : i32
    %c0_i32_1 = arith.constant 0 : i32
    return %arg1, %c0_i32, %c0_i32_0 : i32, i32, i32
  }
  func.func @transform_18(%arg0: i32, %arg1: i32) -> (i32, i32, i32) {
    %c0_i32 = arith.constant 0 : i32
    %c0_i32_0 = arith.constant 0 : i32
    %c0_i32_1 = arith.constant 0 : i32
    return %arg0, %c0_i32, %c0_i32_0 : i32, i32, i32
  }
}

</mosaic_0001>

<bundles_post_ra>
// kernel: _lambda_.1
= control target key start
LH: loop header
LB: loop body
LE: loop exit
PB: predicated region body
PF: predicated region fallthrough
CT: control target
= control target key end

     0   :  { %s12389_s0 = inlined_call_operand.vmem [shape: f32[2,16,128], index: 0, kind: input, shape index: {}]   ;;  %s12390_s1 = inlined_call_operand.vmem [shape: f32[16,128], index: 1, kind: input, shape index: {}]   ;;  %s12391_s2 = inlined_call_operand.hbm [shape: bf16[128,128], index: 2, kind: input, shape index: {}]   ;;  %s12392_s3 = inlined_call_operand.hbm [shape: f32[1,128], index: 3, kind: input, shape index: {}]   ;;  %s12393_s4 = inlined_call_operand.hbm [shape: bf16[128,128], index: 4, kind: input, shape index: {}]   ;;  %s12394_s5 = inlined_call_operand.hbm [shape: f32[1,128], index: 5, kind: input, shape index: {}]   ;;  %s12395_s6 = inlined_call_operand.hbm [shape: bf16[2,128,384], index: 6, kind: input, shape index: {}]   ;;  %s12396_s7 = inlined_call_operand.vmem [shape: f32[2,1,384], index: 7, kind: input, shape index: {}]   ;;  %s12397_s8 = inlined_call_operand.vmem [shape: bf16[2,128,128], index: 8, kind: input, shape index: {}]   ;;  %s12398_s9 = inlined_call_operand.vmem [shape: f32[2,1,128], index: 9, kind: input, shape index: {}]   ;;  %s12399_s10 = inlined_call_operand.vmem [shape: f32[2,1,128], index: 10, kind: input, shape index: {}]   ;;  %s12400_s11 = inlined_call_operand.vmem [shape: f32[2,1,128], index: 11, kind: input, shape index: {}]   ;;  %s12401_s12 = inlined_call_operand.hbm [shape: bf16[2,128,2048], index: 12, kind: input, shape index: {}]   ;;  %s12402_s13 = inlined_call_operand.vmem [shape: f32[2,1,2048], index: 13, kind: input, shape index: {}]   ;;  %s12403_s14 = inlined_call_operand.hbm [shape: bf16[2,2048,128], index: 14, kind: input, shape index: {}]   ;;  %s12404_s15 = inlined_call_operand.hbm [shape: f32[2,1,128], index: 15, kind: input, shape index: {}]   ;;  %s12405_s16 = inlined_call_operand.hbm [shape: f32[2,1,128], index: 16, kind: input, shape index: {}]   ;;  %s12406_s17 = inlined_call_operand.hbm [shape: f32[2,1,128], index: 17, kind: input, shape index: {}]   ;;  %s12407_s18 = inlined_call_operand.hbm [shape: f32[1,2,128], index: 18, kind: output, shape index: {}]  }
   0x1   :  { %12419 = sst [smem:[#allocation28_spill]] %s12389_s0 }
   0x2   :  { %12420 = sst [smem:[#allocation29_spill]] %s12390_s1 }
   0x3   :  { %12421 = sst [smem:[#allocation30_spill]] %s12391_s2 }
   0x4   :  { %12422 = sst [smem:[#allocation31_spill]] %s12392_s3 }
   0x5   :  { %12423 = sst [smem:[#allocation32_spill]] %s12393_s4 }
   0x6   :  { %12424 = sst [smem:[#allocation33_spill]] %s12394_s5 }
   0x7   :  { %12425 = sst [smem:[#allocation34_spill]] %s12395_s6 }
   0x8   :  { %12426 = sst [smem:[#allocation35_spill]] %s12396_s7 }
   0x9   :  { %12427 = sst [smem:[#allocation36_spill]] %s12397_s8 }
   0xa   :  { %12428 = sst [smem:[#allocation37_spill]] %s12398_s9 }
   0xb   :  { %12429 = sst [smem:[#allocation38_spill]] %s12399_s10 }
   0xc   :  { %12430 = sst [smem:[#allocation39_spill]] %s12400_s11 }
   0xd   :  { %12431 = sst [smem:[#allocation40_spill]] %s12401_s12 }
   0xe   :  { %12432 = sst [smem:[#allocation41_spill]] %s12402_s13 }
   0xf   :  { %12433 = sst [smem:[#allocation42_spill]] %s12403_s14 }
  0x10   :  { %12434 = sst [smem:[#allocation43_spill]] %s12404_s15 }
  0x11   :  { %12435 = sst [smem:[#allocation44_spill]] %s12405_s16 }
  0x12   :  { %12436 = sst [smem:[#allocation45_spill]] %s12406_s17 }
  0x13   :  { %12437 = sst [smem:[#allocation46_spill]] %s12407_s18 }
  0x14   :  { %23 = vsyncpa [#allocation4], 0 }
  0x15   :  { %24 = vsyncpa [#allocation7], 0 }
  0x16   :  { %25 = vsyncpa [#allocation10], 0 }
  0x17   :  { %26 = vsyncpa [#allocation5], 0  ;;  %s10884_s27 = smov 0   ;;  %s10886_s28 = smov 0  }
  0x18   :  { %s10888_s29 = smov 0   ;;  %s10890_s30 = smov 0  }
  0x19   :  { %s10892_s0 = smov 0   ;;  %s10894_s19 = smov 0  }
  0x1a LB: > { %12438 = sst [smem:[#allocation23_spill]] %s10761_s28  ;;  %s10913_s1 = sadd.s32 4294967295, %s10777_s19   ;;  %s10777_s19 = sphi %s10894_s19, %s32_s19   ;;  %s10773_s0 = sphi %s10892_s0, %s12483_s0   ;;  %s10769_s30 = sphi %s10890_s30, %s12482_s30   ;;  %s10765_s29 = sphi %s10888_s29, %s12481_s29   ;;  %s10761_s28 = sphi %s10886_s28, %s12480_s28   ;;  %s10757_s27 = sphi %s10884_s27, %s12477_s27  }
  0x1b   : > { %12439 = sst [smem:[#allocation24_spill]] %s10769_s30  ;;  %p189_p0 = scmp.ne.s32.totalorder %s10765_s29, %s10761_s28 }
  0x1c   : > { %p190_p1 = scmp.eq.s32.totalorder %s10777_s19, 0  ;;  %p195_p2 = scmp.ne.s32.totalorder %s10761_s28, %s10757_s27 }
  0x1d   : > { %p196_p3 = scmp.eq.s32.totalorder %s10913_s1, 0  ;;  %p7300_p5 = scmp.ge.s32.totalorder %s10777_s19, 1 }
  0x1e   : > { %p10921_p4 = por %p190_p1, %p189_p0  ;;  %p518_p7 = scmp.lt.s32.totalorder %s10777_s19, 3 }
  0x1f   : > { %p10928_p6 = por %p196_p3, %p195_p2  ;;  %s12443_s24 = sld [smem:[#allocation30_spill]] }
  0x20   : > { %p10936_p8 = pnand %p7300_p5, %p518_p7  ;;  %s10779_s27 = smov [#allocation3]  }
  0x21   : > { %s12441_s22 = scalar_select %p10928_p6, 1, 0 }
  0x22   : > { %p10236_p9 = pneg %p10936_p8  ;;  %s544_s20 = sshll.u32 %s10779_s27, 4  ;;  %s545_s20 = int_to_ptr.vmem [resolvable:$true] %s544_s20 }
  0x23   : > { %12442 = sst [smem:[#allocation25_spill]] %s12441_s22  ;;  %p10272_p11 = scmp.lt.s32.totalorder %s10777_s19, 2 }
  0x24   : > { %p10944_p10 = pnand %p10236_p9, %p196_p3  ;;  %s12412_s2 = smov 64  }
  0x25   : > { %s542_s25 = sshll.u32 %s12443_s24, 4  ;;  %s12410_s23 = smov 4   ;;  %s543_s25 = int_to_ptr.hbm [resolvable:$true] %s542_s25 }
  0x26   : > { %10239 = dma.hbm_to_vmem [thread:$0]  (!%p10944_p10), %s543_s25, 1024, %s545_s20, [#allocation4], %s12412_s2, %s12412_s2, %s12410_s23  }
  0x27   : > { %s41_s24 = sadd.s32 1, %s10773_s0  ;;  %s596_s27 = sand.u32 1, %s10777_s19  }
  0x28   : > { %p42_p12 = scmp.ge.s32.totalorder %s41_s24, 2  ;;  %s10957_s13 = sand.u32 1, %s10765_s29  }
  0x29   : > { %s10201_s11 = smul.u32 192, %s10773_s0  ;;  %s12447_s6 = sld [smem:[#allocation34_spill]] }
  0x2a   : > { %s12485_s24 = smov (%p42_p12, %s41_s24), 0  ;;  %s10200_s10 = smul.u32 192, %s10957_s13 }
  0x2b   : > { %12446 = sst [smem:[#allocation26_spill]] %s12485_s24  ;;  %s179_s20 = ssub.s32 %s10773_s0, %s12485_s24 }
  0x2c   : > { %p180_p13 = scmp.eq.s32.totalorder %s179_s20, 0  ;;  %s600_s23 = scalar_lea.vmem [#allocation11], %s10200_s10 }
  0x2d   : > { %s608_s2 = sshll.u32 %s600_s23, 4  ;;  %s12448_s30 = sadd.s32 1, %s10765_s29  ;;  %s609_s2 = int_to_ptr.vmem [resolvable:$true] %s608_s2 }
  0x2e   : > { %s10971_s22 = scalar_select %p180_p13, %s10765_s29, %s12448_s30  }
  0x2f   : > { %s605_s8 = scalar_lea.hbm %s12447_s6, %s10201_s11  ;;  %p10977_p0 = pnand %p10272_p11, %p10921_p4 }
  0x30   : > { %s606_s25 = sshll.u32 %s605_s8, 4  ;;  %12449 = sst [smem:[#allocation27_spill]] %s10971_s22  ;;  %s607_s25 = int_to_ptr.hbm [resolvable:$true] %s606_s25 }
  0x31   : > { %s7308_s7 = sshll.u32 %s10957_s13, 10  ;;  %s10982_s9 = scalar_lea.sflag [#allocation4], %s596_s27 }
  0x32   : > { %s10782_s8 = smov 192   ;;  %s10783_s10 = smov 12  }
  0x33   : > { %10252 = dma.hbm_to_vmem [thread:$0]  (!%p10977_p0), %s607_s25, 3072, %s609_s2, %s10982_s9, %s10782_s8, %s10782_s8, %s10783_s10  }
  0x34   : > { %s9605_s11 = sshll.u32 %s10773_s0, 10  ;;  %s12451_s12 = sld [smem:[#allocation40_spill]] }
  0x35   : > { %s655_s20 = scalar_lea.vmem [#allocation12], %s7308_s7  ;;  %s10784_s27 = smov 1024  }
  0x36   : > { %s663_s6 = sshll.u32 %s655_s20, 4  ;;  %s12452_s22 = smov 64   ;;  %s664_s6 = int_to_ptr.vmem [resolvable:$true] %s663_s6 }
  0x37   : > { %s12453_s14 = sld [smem:[#allocation42_spill]]  ;;  %s684_s30 = scalar_lea.vmem [#allocation13], %s7308_s7 }
  0x38   : > { %s692_s21 = sshll.u32 %s684_s30, 4  ;;  %s12455_s15 = sld [smem:[#allocation43_spill]]  ;;  %s693_s21 = int_to_ptr.vmem [resolvable:$true] %s692_s21 }
  0x39   : > { %s12456_s3 = sld [smem:[#allocation31_spill]]  ;;  %s722_s20 = scalar_lea.vmem [#allocation15], %s10957_s13 }
  0x3a   : > { %s660_s23 = scalar_lea.hbm %s12451_s12, %s9605_s11  ;;  %s12457_s16 = sld [smem:[#allocation44_spill]] }
  0x3b   : > { %s661_s24 = sshll.u32 %s660_s23, 4  ;;  %s12454_s23 = smov 4   ;;  %s662_s24 = int_to_ptr.hbm [resolvable:$true] %s661_s24 }
  0x3c   : > { %10255 = dma.hbm_to_vmem [thread:$0]  (!%p10977_p0), %s662_s24, 16384, %s664_s6, %s10982_s9, %s10784_s27, %s10784_s27, %s12452_s22  }
  0x3d   : > { %s689_s8 = scalar_lea.hbm %s12453_s14, %s9605_s11  ;;  %s705_s27 = scalar_lea.vmem [#allocation14], %s10957_s13 }
  0x3e   : > { %s690_s10 = sshll.u32 %s689_s8, 4  ;;  %s708_s6 = scalar_lea.hbm %s12455_s15, %s10773_s0  ;;  %s691_s10 = int_to_ptr.hbm [resolvable:$true] %s690_s10 }
  0x3f   : > { %10258 = dma.hbm_to_vmem [thread:$0]  (!%p10977_p0), %s691_s10, 16384, %s693_s21, %s10982_s9, %s12452_s22, %s12452_s22, %s12454_s23  }
  0x40   : > { %s710_s24 = sshll.u32 %s708_s6, 4  ;;  %s712_s11 = sshll.u32 %s705_s27, 4  ;;  %s711_s24 = int_to_ptr.hbm [resolvable:$true] %s710_s24  ;;  %s713_s11 = int_to_ptr.vmem [resolvable:$true] %s712_s11 }
  0x41   : > { %10261 = dma.hbm_to_vmem [thread:$0]  (!%p10977_p0), %s711_s24, 16, %s713_s11, %s10982_s9  }
  0x42   : > { %s557_s25 = sshll.u32 %s12456_s3, 4  ;;  %s10785_s8 = smov [#allocation6]   ;;  %s558_s25 = int_to_ptr.hbm [resolvable:$true] %s557_s25 }
  0x43   : > { %s559_s10 = sshll.u32 %s10785_s8, 4  ;;  %s725_s21 = scalar_lea.hbm %s12457_s16, %s10773_s0  ;;  %s560_s10 = int_to_ptr.vmem [resolvable:$true] %s559_s10 }
  0x44   : > { %10242 = dma.hbm_to_vmem [thread:$0]  (!%p10944_p10), %s558_s25, 16, %s560_s10, [#allocation7]  }
  0x45   : > { %s729_s6 = sshll.u32 %s722_s20, 4  ;;  %s727_s27 = sshll.u32 %s725_s21, 4  ;;  %s730_s6 = int_to_ptr.vmem [resolvable:$true] %s729_s6  ;;  %s728_s27 = int_to_ptr.hbm [resolvable:$true] %s727_s27 }
  0x46   : > { %s12458_s4 = sld [smem:[#allocation32_spill]]  ;;  %s10786_s2 = smov [#allocation8]  }
  0x47   : > { %10264 = dma.hbm_to_vmem [thread:$0]  (!%p10977_p0), %s728_s27, 16, %s730_s6, %s10982_s9  }
  0x48   : > { %s570_s25 = sshll.u32 %s10786_s2, 4  ;;  %s12459_s5 = sld [smem:[#allocation33_spill]]  ;;  %s571_s25 = int_to_ptr.vmem [resolvable:$true] %s570_s25 }
  0x49   : > { %s10787_s30 = smov [#allocation9]   ;;  %s12460_s17 = sld [smem:[#allocation45_spill]] }
  0x4a   : > { %s585_s21 = sshll.u32 %s10787_s30, 4  ;;  %s739_s11 = scalar_lea.vmem [#allocation16], %s10957_s13  ;;  %s586_s21 = int_to_ptr.vmem [resolvable:$true] %s585_s21 }
  0x4b   : > { %s746_s2 = sshll.u32 %s739_s11, 4  ;;  %s747_s2 = int_to_ptr.vmem [resolvable:$true] %s746_s2 }
  0x4c   : > { %s568_s7 = sshll.u32 %s12458_s4, 4  ;;  %s569_s7 = int_to_ptr.hbm [resolvable:$true] %s568_s7 }
  0x4d   : > { %10245 = dma.hbm_to_vmem [thread:$0]  (!%p10944_p10), %s569_s7, 1024, %s571_s25, [#allocation7], %s12452_s22, %s12452_s22, %s12454_s23  }
  0x4e   : > { %s583_s12 = sshll.u32 %s12459_s5, 4  ;;  %755 = sbr.rel (%p10936_p8) target bundleno = 2767 (0xacf), region = 92  ;;  %s584_s12 = int_to_ptr.hbm [resolvable:$true] %s583_s12 }
  0x4f   : > { %s742_s27 = scalar_lea.hbm %s12460_s17, %s10773_s0 }
  0x50   : > { %s744_s24 = sshll.u32 %s742_s27, 4  ;;  %s745_s24 = int_to_ptr.hbm [resolvable:$true] %s744_s24 }
  0x51   : > { %10248 = dma.hbm_to_vmem [thread:$0]  (!%p10944_p10), %s584_s12, 16, %s586_s21, [#allocation10]  }
  0x52   : > { %10267 = dma.hbm_to_vmem [thread:$0]  (!%p10977_p0), %s745_s24, 16, %s747_s2, %s10982_s9  }
  0x53   : > { %10736 = dma.done.wait (%p196_p3), [#allocation4], 1024  }
  0x54   : > { %10738 = vsyncadd (%p196_p3), [#allocation4], 4294966272 }
  0x55   : > { %10740 = dma.done.wait (%p196_p3), [#allocation7], 1040  }
  0x56   : > { %10742 = vsyncadd (%p196_p3), [#allocation7], 4294966256 }
  0x57   : > { %10744 = dma.done.wait (%p196_p3), [#allocation10], 16  }
  0x58   : > { %10746 = vsyncadd (%p196_p3), [#allocation10], 4294967280  ;;  %s12461_s13 = sld [smem:[#allocation23_spill]]  ;;  %s777_s28 = sand.u32 1, %s10913_s1  }
  0x59   : > { %s778_s9 = scalar_lea.sflag [#allocation4], %s777_s28 }
  0x5e   : > { %s11062_s22 = sand.u32 1, %s12461_s13  }
  0x5f   : > { %s10202_s26 = smul.u32 192, %s11062_s22 }
  0x61   : > { %s11065_s23 = scalar_lea.vmem [#allocation11], %s10202_s26 }
  0x62   : > { %10748 = dma.done.wait (%p10928_p6), %s778_s9, 35888  }
  0x63   : > { %10750 = vsyncadd (%p10928_p6), %s778_s9, 4294931408  ;;  %s12463_s7 = sld [smem:[#allocation24_spill]]  ;;  %s7319_s25 = sshll.u32 %s11062_s22, 10 }
  0x64   : > { %s12464_s20 = sld [smem:[#allocation36_spill]]  ;;  %s11108_s24 = scalar_lea.vmem [#allocation12], %s7319_s25 }
  0x65   : > { %s12465_s11 = sld [smem:[#allocation37_spill]]  ;;  %s819_s13 = scalar_lea.vmem [#allocation15], %s11062_s22 }
  0x66   : > { %s12466_s28 = sld [smem:[#allocation35_spill]]  ;;  %s828_s18 = scalar_lea.vmem [#allocation16], %s11062_s22 }
  0x67   : > { %s12467_s4 = sld [smem:[#allocation38_spill]] }
  0x68   : > { %s12468_s16 = sld [smem:[#allocation39_spill]] }
  0x69   : > { %p934_p1 = scmp.lt.s32.totalorder %s12463_s7, 1  ;;  %s12469_s17 = sld [smem:[#allocation41_spill]] }
  0x6a   : > { %p7324_p2 = scmp.ne.s32.totalorder %s12463_s7, 0 }
  0x6b   : > { %s11074_s8 = scalar_select %p934_p1, %s12463_s7, 1 }
  0x6c   : > { %s12470_s14 = sld [smem:[#allocation28_spill]] (!%p7324_p2) }
  0x6d   : > { %s10203_s10 = smul.u32 3, %s11074_s8  ;;  %s9607_s12 = sshll.u32 %s11074_s8, 6 }
  0x6e   : > { %s11081_s6 = scalar_lea.vmem %s12464_s20, %s9607_s12  ;;  %s11087_s2 = scalar_lea.vmem %s12465_s11, %s11074_s8 }
  0x6f   : > { %s11092_s26 = scalar_lea.vmem %s12466_s28, %s10203_s10  ;;  %s948_s5 = scalar_lea.vmem %s12467_s4, %s11074_s8 }
  0x70   : > { %s951_s30 = scalar_lea.vmem %s12468_s16, %s11074_s8  ;;  %s7323_s12 = sshll.u32 %s11074_s8, 4 }
  0x71   : > { %s11106_s27 = scalar_lea.vmem %s12469_s17, %s7323_s12  ;;  %s11110_s11 = scalar_lea.vmem [#allocation13], %s7319_s25 }
  0x72   : > { %s810_s10 = scalar_lea.vmem [#allocation14], %s11062_s22  ;;  %960 = sbr.rel (%p7324_p2) target bundleno = 443 (0x1bb), region = 136 }
  0x73   : > { %s12471_s21 = sld [smem:[#allocation29_spill]] (!%p7324_p2) }
  0x77   : > { %v9615_v0 = vld [vmem:[#allocation3 + $0x38] sm:$0xff]  ;;  %v9614_v1 = vld [vmem:[#allocation3 + $0x30] sm:$0xff]  ;;  %v9613_v3 = vld [vmem:[#allocation3 + $0x28] sm:$0xff] }
  0x78   : > { %1035 = vmatpush.bf16.msra.mxu0 %v9615_v0  ;;  %10176 = vmatpush.bf16.msra.mxu2 %v9615_v0  ;;  %v9623_v2 = vld [vmem:[#allocation8 + $0x38] sm:$0xff]  ;;  %v9622_v4 = vld [vmem:[#allocation8 + $0x30] sm:$0xff]  ;;  %v9621_v6 = vld [vmem:[#allocation8 + $0x28] sm:$0xff] }
  0x79   : > { %1136 = vmatpush.bf16.msra.mxu1 %v9623_v2  ;;  %10184 = vmatpush.bf16.msra.mxu3 %v9623_v2  ;;  %v9612_v5 = vld [vmem:[#allocation3 + $0x20] sm:$0xff]  ;;  %v9611_v7 = vld [vmem:[#allocation3 + $0x18] sm:$0xff]  ;;  %v9610_v9 = vld [vmem:[#allocation3 + $0x10] sm:$0xff] }
  0x7a   : > { %v9620_v8 = vld [vmem:[#allocation8 + $0x20] sm:$0xff]  ;;  %v963_v14 = vld [vmem:[%s12470_s14 + $0x10] sm:$0xff]  ;;  %v964_v15 = vld [vmem:[%s12470_s14 + $0x18] sm:$0xff] }
  0x7b   : > { %v9609_v10 = vld [vmem:[#allocation3 + $0x8] sm:$0xff]  ;;  %v9608_v11 = vld [vmem:[#allocation3] sm:$0xff]  ;;  %v982_v17 = vpack.c.bf16 %v964_v15, %v963_v14  ;;  %v9618_v19 = vld [vmem:[#allocation8 + $0x10] sm:$0xff] }
  0x7c   : > { %1036 = vmatpush.bf16.msra.mxu0 %v9614_v1  ;;  %10177 = vmatpush.bf16.msra.mxu2 %v9614_v1  ;;  %v961_v12 = vld [vmem:[%s12470_s14] sm:$0xff]  ;;  %v962_v13 = vld [vmem:[%s12470_s14 + $0x8] sm:$0xff] }
  0x7d   : > { %1137 = vmatpush.bf16.msra.mxu1 %v9622_v4  ;;  %10185 = vmatpush.bf16.msra.mxu3 %v9622_v4  ;;  %v981_v16 = vpack.c.bf16 %v962_v13, %v961_v12  ;;  %v9619_v18 = vld [vmem:[#allocation8 + $0x18] sm:$0xff]  ;;  %v9617_v20 = vld [vmem:[#allocation8 + $0x8] sm:$0xff]  ;;  %v9616_v21 = vld [vmem:[#allocation8] sm:$0xff] }
  0x7e   : > { %v10337_v23 = vld [vmem:[#allocation6] ss:$0 sm:$0xff]  ;;  %v10338_v41 = vld [vmem:[#allocation9] ss:$0 sm:$0xff]  ;;  %v1156_v47 = vld [vmem:[%s12471_s21 + $0x8] sm:$0xff] }
  0x7f   : > { %v1155_v43 = vld [vmem:[%s12471_s21] sm:$0xff] }
  0x80   : > { %1037 = vmatpush.bf16.msra.mxu0 %v9613_v3  ;;  %10178 = vmatpush.bf16.msra.mxu2 %v9613_v3 }
  0x81   : > { %1138 = vmatpush.bf16.msra.mxu1 %v9621_v6  ;;  %10186 = vmatpush.bf16.msra.mxu3 %v9621_v6 }
  0x84   : > { %1038 = vmatpush.bf16.msra.mxu0 %v9612_v5  ;;  %10179 = vmatpush.bf16.msra.mxu2 %v9612_v5 }
  0x85   : > { %1139 = vmatpush.bf16.msra.mxu1 %v9620_v8  ;;  %10187 = vmatpush.bf16.msra.mxu3 %v9620_v8 }
  0x88   : > { %1039 = vmatpush.bf16.msra.mxu0 %v9611_v7  ;;  %10180 = vmatpush.bf16.msra.mxu2 %v9611_v7 }
  0x89   : > { %1140 = vmatpush.bf16.msra.mxu1 %v9619_v18  ;;  %10188 = vmatpush.bf16.msra.mxu3 %v9619_v18 }
  0x8c   : > { %1040 = vmatpush.bf16.msra.mxu0 %v9610_v9  ;;  %10181 = vmatpush.bf16.msra.mxu2 %v9610_v9 }
  0x8d   : > { %1141 = vmatpush.bf16.msra.mxu1 %v9618_v19  ;;  %10189 = vmatpush.bf16.msra.mxu3 %v9618_v19 }
  0x90   : > { %1041 = vmatpush.bf16.msra.mxu0 %v9609_v10  ;;  %10182 = vmatpush.bf16.msra.mxu2 %v9609_v10 }
  0x91   : > { %1142 = vmatpush.bf16.msra.mxu1 %v9617_v20  ;;  %10190 = vmatpush.bf16.msra.mxu3 %v9617_v20 }
  0x94   : > { %1042 = vmatpush.bf16.msra.mxu0 %v9608_v11  ;;  %10183 = vmatpush.bf16.msra.mxu2 %v9608_v11 }
  0x95   : > { %1143 = vmatpush.bf16.msra.mxu1 %v9616_v21  ;;  %10191 = vmatpush.bf16.msra.mxu3 %v9616_v21 }
  0x97   : > { %1043 = vmatmul.bf16.vlgmr.msra.gmra.mxu0 %v981_v16  ;;  %1048 = vmatmul.bf16.vlgmr.msra.gmra.mxu2 %v982_v17 }
 0x114   : > { %v1044_v22 = vpop.f32.mrf.mxu0 }
 0x115   : > { %v1045_v24 = vadd.f32 %v10337_v23, %v1044_v22 }
 0x117   : > { %v1058_v26 = vmul.f32 0.01, %v1045_v24  ;;  %vm1054_vm0 = vcmp.ge.f32.partialorder %v1045_v24, 0.0 }
 0x119   : > { %v1062_v31 = vsel %vm1054_vm0, %v1045_v24, %v1058_v26 }
 0x11a   : > { %v1049_v25 = vpop.f32.mrf.mxu2 }
 0x11b   : > { %v1050_v29 = vadd.f32 %v10337_v23, %v1049_v25 }
 0x11c   : > { %v1046_v27 = vpop.f32.mrf.mxu0 }
 0x11d   : > { %v1047_v28 = vadd.f32 %v10337_v23, %v1046_v27  ;;  %v1060_v35 = vmul.f32 0.01, %v1050_v29  ;;  %vm1056_vm2 = vcmp.ge.f32.partialorder %v1050_v29, 0.0 }
 0x11f   : > { %v1059_v30 = vmul.f32 0.01, %v1047_v28  ;;  %vm1055_vm1 = vcmp.ge.f32.partialorder %v1047_v28, 0.0  ;;  %v1064_v38 = vsel %vm1056_vm2, %v1050_v29, %v1060_v35 }
 0x121   : > { %v1063_v32 = vsel %vm1055_vm1, %v1047_v28, %v1059_v30 }
 0x122   : > { %v1051_v33 = vpop.f32.mrf.mxu2  ;;  %v1082_v34 = vpack.c.bf16 %v1063_v32, %v1062_v31 }
 0x123   : > { %v1052_v36 = vadd.f32 %v10337_v23, %v1051_v33 }
 0x124   : > { %1144 = vmatmul.bf16.vlgmr.msra.gmra.mxu1 %v1082_v34 }
 0x125   : > { %v1061_v37 = vmul.f32 0.01, %v1052_v36  ;;  %vm1057_vm3 = vcmp.ge.f32.partialorder %v1052_v36, 0.0 }
 0x127   : > { %v1065_v39 = vsel %vm1057_vm3, %v1052_v36, %v1061_v37 }
 0x128   : > { %v1083_v40 = vpack.c.bf16 %v1065_v39, %v1064_v38 }
 0x12a   : > { %1149 = vmatmul.bf16.vlgmr.msra.gmra.mxu3 %v1083_v40 }
 0x1a1   : > { %v1145_v42 = vpop.f32.mrf.mxu1 }
 0x1a2   : > { %v1146_v44 = vadd.f32 %v10338_v41, %v1145_v42 }
 0x1a4   : > { %v1157_v45 = vadd.f32 %v1155_v43, %v1146_v44 }
 0x1a6   : > { %1161 = vst [vmem:[#allocation2 + $0x10] sm:$0xff] %v1157_v45 }
 0x1a9   : > { %v1147_v46 = vpop.f32.mrf.mxu1 }
 0x1aa   : > { %v1148_v48 = vadd.f32 %v10338_v41, %v1147_v46 }
 0x1ac   : > { %v1158_v49 = vadd.f32 %v1156_v47, %v1148_v48 }
 0x1ad   : > { %v1150_v50 = vpop.f32.mrf.mxu3 }
 0x1ae   : > { %1162 = vst [vmem:[#allocation2] sm:$0xff] %v1158_v49  ;;  %v1151_v51 = vadd.f32 %v10338_v41, %v1150_v50 }
 0x1b0   : > { %v1159_v52 = vadd.f32 %v1155_v43, %v1151_v51 }
 0x1b2   : > { %1163 = vst [vmem:[#allocation2 + $0x18] sm:$0xff] %v1159_v52 }
 0x1b5   : > { %v1152_v53 = vpop.f32.mrf.mxu3 }
 0x1b6   : > { %v1153_v54 = vadd.f32 %v10338_v41, %v1152_v53 }
 0x1b8   : > { %v1160_v55 = vadd.f32 %v1156_v47, %v1153_v54 }
 0x1ba   : > { %1164 = vst [vmem:[#allocation2 + $0x8] sm:$0xff] %v1160_v55 }
 0x1bb PF: > { %v9645_v56 = vld [vmem:[%s11065_s23 + $0xac] sm:$0xf]  ;;  %v7477_v57 = vld [vmem:[%s11065_s23 + $0xb4] sm:$0xf0]  ;;  %v9642_v58 = vld [vmem:[%s11065_s23 + $0x94] sm:$0xf] }
 0x1bc   : > { %v7480_v59 = vor.u32 %v9645_v56, %v7477_v57  ;;  %v7465_v60 = vld [vmem:[%s11065_s23 + $0x9c] sm:$0xf0]  ;;  %v7475_v61 = vld [vmem:[%s11065_s23 + $0xa8] sm:$0xf]  ;;  %v9646_v62 = vld [vmem:[%s11065_s23 + $0xb0] sm:$0xf0] }
 0x1bd   : > { %v7476_v63 = vor.u32 %v9646_v62, %v7475_v61  ;;  %v7463_v0 = vld [vmem:[%s11065_s23 + $0x90] sm:$0xf]  ;;  %v7468_v1 = vor.u32 %v9642_v58, %v7465_v60  ;;  %v9643_v2 = vld [vmem:[%s11065_s23 + $0x98] sm:$0xf0]  ;;  %v7453_v4 = vld [vmem:[%s11065_s23 + $0x84] sm:$0xf0] }
 0x1be   : > { %1358 = vmatpush.bf16.msra.mxu1 %v7480_v59  ;;  %v9639_v3 = vld [vmem:[%s11065_s23 + $0x7c] sm:$0xf]  ;;  %v7464_v5 = vor.u32 %v9643_v2, %v7463_v0  ;;  %v7451_v6 = vld [vmem:[%s11065_s23 + $0x78] sm:$0xf]  ;;  %v9640_v7 = vld [vmem:[%s11065_s23 + $0x80] sm:$0xf0] }
 0x1bf   : > { %1339 = vmatpush.bf16.msra.mxu0 %v7476_v63  ;;  %v7456_v8 = vor.u32 %v9639_v3, %v7453_v4  ;;  %v9636_v9 = vld [vmem:[%s11065_s23 + $0x64] sm:$0xf]  ;;  %v7441_v10 = vld [vmem:[%s11065_s23 + $0x6c] sm:$0xf0]  ;;  %v7452_v11 = vor.u32 %v9640_v7, %v7451_v6  ;;  %v7439_v12 = vld [vmem:[%s11065_s23 + $0x60] sm:$0xf] }
 0x1c0   : > { %v9637_v13 = vld [vmem:[%s11065_s23 + $0x68] sm:$0xf0]  ;;  %v7444_v14 = vor.u32 %v9636_v9, %v7441_v10  ;;  %v7429_v16 = vld [vmem:[%s11065_s23 + $0x54] sm:$0xf0]  ;;  %v7427_v18 = vld [vmem:[%s11065_s23 + $0x48] sm:$0xf] }
 0x1c1   : > { %v9633_v15 = vld [vmem:[%s11065_s23 + $0x4c] sm:$0xf]  ;;  %v7440_v17 = vor.u32 %v9637_v13, %v7439_v12  ;;  %v9634_v19 = vld [vmem:[%s11065_s23 + $0x50] sm:$0xf0]  ;;  %v7417_v22 = vld [vmem:[%s11065_s23 + $0x3c] sm:$0xf0] }
 0x1c2   : > { %1359 = vmatpush.bf16.msra.mxu1 %v7468_v1  ;;  %v7432_v20 = vor.u32 %v9633_v15, %v7429_v16  ;;  %v9630_v21 = vld [vmem:[%s11065_s23 + $0x34] sm:$0xf]  ;;  %v7428_v23 = vor.u32 %v9634_v19, %v7427_v18  ;;  %v7415_v24 = vld [vmem:[%s11065_s23 + $0x30] sm:$0xf]  ;;  %v9631_v25 = vld [vmem:[%s11065_s23 + $0x38] sm:$0xf0] }
 0x1c3   : > { %1340 = vmatpush.bf16.msra.mxu0 %v7464_v5  ;;  %v7420_v26 = vor.u32 %v9630_v21, %v7417_v22  ;;  %v9627_v27 = vld [vmem:[%s11065_s23 + $0x1c] sm:$0xf]  ;;  %v7405_v28 = vld [vmem:[%s11065_s23 + $0x24] sm:$0xf0]  ;;  %v7416_v29 = vor.u32 %v9631_v25, %v7415_v24  ;;  %v7403_v30 = vld [vmem:[%s11065_s23 + $0x18] sm:$0xf]  ;;  %v1460_v21 = vlaneseq }
 0x1c4   : > { %v9628_v31 = vld [vmem:[%s11065_s23 + $0x20] sm:$0xf0]  ;;  %v7408_v32 = vor.u32 %v9627_v27, %v7405_v28  ;;  %v7393_v34 = vld [vmem:[%s11065_s23 + $0xc] sm:$0xf0]  ;;  %v7391_v36 = vld [vmem:[%s11065_s23] sm:$0xf] }
 0x1c5   : > { %v9624_v33 = vld [vmem:[%s11065_s23 + $0x4] sm:$0xf]  ;;  %v7404_v35 = vor.u32 %v9628_v31, %v7403_v30  ;;  %v9625_v37 = vld [vmem:[%s11065_s23 + $0x8] sm:$0xf0]  ;;  %v11168_v40 = vld [vmem:[#allocation2] sm:$0xff]  ;;  %v1461_v22 = vand.u32 127, %v1460_v21 }
 0x1c6   : > { %1360 = vmatpush.bf16.msra.mxu1 %v7456_v8  ;;  %v7396_v38 = vor.u32 %v9624_v33, %v7393_v34  ;;  %v11166_v39 = vld [vmem:[#allocation2 + $0x10] sm:$0xff]  ;;  %v7392_v41 = vor.u32 %v9625_v37, %v7391_v36  ;;  %v11176_v43 = vld [vmem:[#allocation2 + $0x18] sm:$0xff]  ;;  %v11178_v44 = vld [vmem:[#allocation2 + $0x8] sm:$0xff]  ;;  %vm1469_vm5 = vcmask 130048  }
 0x1c7   : > { %1341 = vmatpush.bf16.msra.mxu0 %v7452_v11  ;;  %v11172_v42 = vpack.c.bf16 %v11168_v40, %v11166_v39  ;;  %v11182_v45 = vpack.c.bf16 %v11178_v44, %v11176_v43  ;;  %v11187_v46 = vld [vmem:[%s11092_s26] sm:$0x7]  ;;  %v7471_v25 = vld [vmem:[%s11065_s23 + $0x98] sm:$0xf]  ;;  %v9644_v27 = vld [vmem:[%s11065_s23 + $0xa0] sm:$0xf0] }
 0x1c8   : > { %v1206_v48 = vperm.slane %v11187_v46, 1  ;;  %v1205_v51 = vperm.slane %v11187_v46, 0  ;;  %v9647_v24 = vld [vmem:[%s11065_s23 + $0xb8] sm:$0xf0]  ;;  %vm1462_vm4 = vcmp.lt.s32.totalorder %v1461_v22, 9  ;;  %v7472_v28 = vor.u32 %v9644_v27, %v7471_v25 }
 0x1c9   : > { %v9641_v30 = vld [vmem:[%s11065_s23 + $0x88] sm:$0xf0]  ;;  %v9638_v36 = vld [vmem:[%s11065_s23 + $0x70] sm:$0xf0] }
 0x1ca   : > { %1361 = vmatpush.bf16.msra.mxu1 %v7444_v14 }
 0x1cb   : > { %1342 = vmatpush.bf16.msra.mxu0 %v7440_v17 }
 0x1ce   : > { %1362 = vmatpush.bf16.msra.mxu1 %v7432_v20 }
 0x1cf   : > { %1343 = vmatpush.bf16.msra.mxu0 %v7428_v23  ;;  %v7483_v23 = vld [vmem:[%s11065_s23 + $0xb0] sm:$0xf] }
 0x1d2   : > { %1363 = vmatpush.bf16.msra.mxu1 %v7420_v26  ;;  %v7484_v26 = vor.u32 %v9647_v24, %v7483_v23 }
 0x1d3   : > { %1344 = vmatpush.bf16.msra.mxu0 %v7416_v29  ;;  %v7459_v29 = vld [vmem:[%s11065_s23 + $0x80] sm:$0xf] }
 0x1d4   : > { %1377 = vmatpush.bf16.msra.mxu2 %v7484_v26  ;;  %v7460_v34 = vor.u32 %v9641_v30, %v7459_v29 }
 0x1d6   : > { %1364 = vmatpush.bf16.msra.mxu1 %v7408_v32 }
 0x1d7   : > { %1345 = vmatpush.bf16.msra.mxu0 %v7404_v35  ;;  %v7447_v35 = vld [vmem:[%s11065_s23 + $0x68] sm:$0xf] }
 0x1d8   : > { %1378 = vmatpush.bf16.msra.mxu2 %v7472_v28  ;;  %v7448_v37 = vor.u32 %v9638_v36, %v7447_v35 }
 0x1da   : > { %1365 = vmatpush.bf16.msra.mxu1 %v7396_v38  ;;  %v7435_v38 = vld [vmem:[%s11065_s23 + $0x50] sm:$0xf] }
 0x1db   : > { %1346 = vmatpush.bf16.msra.mxu0 %v7392_v41  ;;  %v9635_v41 = vld [vmem:[%s11065_s23 + $0x58] sm:$0xf0] }
 0x1dc   : > { %1379 = vmatpush.bf16.msra.mxu2 %v7460_v34 }
 0x1dd   : > { %1366 = vmatmul.bf16.vlgmr.msra.gmra.mxu1 %v11172_v42 }
 0x1de   : > { %1347 = vmatmul.bf16.vlgmr.msra.gmra.mxu0 %v11172_v42 }
 0x1e0   : > { %1380 = vmatpush.bf16.msra.mxu2 %v7448_v37 }
 0x1ed   : > { %1371 = vmatmul.bf16.gmra.mxu1 %v11182_v45 }
 0x1ee   : > { %1352 = vmatmul.bf16.gmra.mxu0 %v11182_v45 }
 0x25a   : > { %v1367_v47 = vpop.f32.mrf.mxu1 }
 0x25b   : > { %v1348_v49 = vpop.f32.mrf.mxu0  ;;  %v1368_v50 = vadd.f32 %v1367_v47, %v1206_v48 }
 0x25c   : > { %v1349_v56 = vadd.f32 %v1348_v49, %v1205_v51 }
 0x25d   : > { %v1400_v53 = vpack.c.bf16 %v1368_v50, %v1368_v50  ;;  %v7436_v50 = vor.u32 %v9635_v41, %v7435_v38 }
 0x25e   : > { %v1396_v61 = vpack.c.bf16 %v1349_v56, %v1349_v56 }
 0x25f   : > { %v1416_v59 = vunpack.c.l.b16 %v1400_v53  ;;  %1381 = vmatpush.bf16.msra.mxu2 %v7436_v50 }
 0x260   : > { %v1410_v2 = vunpack.c.l.b16 %v1396_v61  ;;  %v9626_v61 = vld [vmem:[%s11065_s23 + $0x10] sm:$0xf0] }
 0x262   : > { %v1369_v52 = vpop.f32.mrf.mxu1 }
 0x263   : > { %v1370_v54 = vadd.f32 %v1369_v52, %v1206_v48  ;;  %v1350_v55 = vpop.f32.mrf.mxu0  ;;  %v9632_v52 = vld [vmem:[%s11065_s23 + $0x40] sm:$0xf0] }
 0x264   : > { %v1351_v57 = vadd.f32 %v1350_v55, %v1205_v51  ;;  %v9629_v55 = vld [vmem:[%s11065_s23 + $0x28] sm:$0xf0] }
 0x265   : > { %v1401_v58 = vpack.c.bf16 %v1370_v54, %v1370_v54  ;;  %v7411_v54 = vld [vmem:[%s11065_s23 + $0x20] sm:$0xf] }
 0x266   : > { %v1397_v62 = vpack.c.bf16 %v1351_v57, %v1351_v57 }
 0x267   : > { %v1417_v60 = vunpack.c.l.b16 %v1401_v58 }
 0x268   : > { %v1411_v3 = vunpack.c.l.b16 %v1397_v62 }
 0x269   : > { %v1418_v63 = vpack.c.b16 %v1417_v60, %v1416_v59  ;;  %v7412_v59 = vor.u32 %v9629_v55, %v7411_v54  ;;  %v7399_v60 = vld [vmem:[%s11065_s23 + $0x8] sm:$0xf] }
 0x26a   : > { %v1372_v0 = vpop.f32.mrf.mxu1  ;;  %v1412_v5 = vpack.c.b16 %v1411_v3, %v1410_v2  ;;  %v7400_v62 = vor.u32 %v9626_v61, %v7399_v60 }
 0x26b   : > { %1427 = vmatpush.bf16.xpose.msra.mxu3 %v1418_v63  ;;  %v1353_v1 = vpop.f32.mrf.mxu0  ;;  %v1373_v4 = vadd.f32 %v1372_v0, %v1206_v48 }
 0x26c   : > { %v1354_v10 = vadd.f32 %v1353_v1, %v1205_v51 }
 0x26d   : > { %v1402_v7 = vpack.c.bf16 %v1373_v4, %v1373_v4 }
 0x26e   : > { %v1398_v15 = vpack.c.bf16 %v1354_v10, %v1354_v10 }
 0x26f   : > { %v1442_v13 = vunpack.c.l.b16 %v1402_v7 }
 0x270   : > { %v1436_v18 = vunpack.c.l.b16 %v1398_v15 }
 0x272   : > { %v1374_v6 = vpop.f32.mrf.mxu1  ;;  %1428 = vmatmul.bf16.vlgmr.msra.gmra.mxu3 %v1412_v5 }
 0x273   : > { %v1375_v8 = vadd.f32 %v1374_v6, %v1206_v48  ;;  %v1355_v9 = vpop.f32.mrf.mxu0 }
 0x274   : > { %v1356_v11 = vadd.f32 %v1355_v9, %v1205_v51  ;;  %v7423_v51 = vld [vmem:[%s11065_s23 + $0x38] sm:$0xf] }
 0x275   : > { %v1403_v12 = vpack.c.bf16 %v1375_v8, %v1375_v8  ;;  %v7424_v53 = vor.u32 %v9632_v52, %v7423_v51 }
 0x276   : > { %v1399_v16 = vpack.c.bf16 %v1356_v11, %v1356_v11 }
 0x277   : > { %v1443_v14 = vunpack.c.l.b16 %v1403_v12  ;;  %1382 = vmatpush.bf16.msra.mxu2 %v7424_v53 }
 0x278   : > { %v1437_v19 = vunpack.c.l.b16 %v1399_v16 }
 0x279   : > { %v1444_v17 = vpack.c.b16 %v1443_v14, %v1442_v13 }
 0x27a   : > { %v1438_v20 = vpack.c.b16 %v1437_v19, %v1436_v18 }
 0x27b   : > { %1453 = vmatpush.bf16.xpose.msrb.mxu3 %v1444_v17  ;;  %1383 = vmatpush.bf16.msra.mxu2 %v7412_v59 }
 0x27f   : > { %1384 = vmatpush.bf16.msra.mxu2 %v7400_v62 }
 0x282   : > { %1454 = vmatmul.bf16.vlgmr.msrb.gmra.mxu3 %v1438_v20  ;;  %1385 = vmatmul.bf16.vlgmr.msra.gmra.mxu2 %v11172_v42  ;;  %v1207_v20 = vperm.slane %v11187_v46, 2 }
 0x292   : > { %1390 = vmatmul.bf16.gmra.mxu2 %v11182_v45 }
 0x2f5   : > { %v1429_v31 = vpop.f32.mrf.mxu3 }
 0x2f6   : > { %v1465_v32 = vsel %vm1462_vm4, %v1429_v31, -1e+30 }
 0x2f7   : > { %v1470_v33 = vsel %vm1469_vm5, %v1465_v32, -inf }
 0x2f8   : > { %1471 = vmax.xlane.f32.xlu0 %v1470_v33 }
 0x2fd   : > { %v1431_v47 = vpop.f32.mrf.mxu3 }
 0x2fe   : > { %v1466_v48 = vsel %vm1462_vm4, %v1431_v47, -1e+30 }
 0x2ff   : > { %v1473_v49 = vsel %vm1469_vm5, %v1466_v48, -inf }
 0x300   : > { %1474 = vmax.xlane.f32.xlu0 %v1473_v49 }
 0x305   : > { %v1455_v56 = vpop.f32.mrf.mxu3  ;;  %v1386_v21 = vpop.f32.mrf.mxu2 }
 0x306   : > { %v1467_v57 = vsel %vm1462_vm4, %v1455_v56, -1e+30  ;;  %v1387_v22 = vadd.f32 %v1386_v21, %v1207_v20 }
 0x307   : > { %v1476_v58 = vsel %vm1469_vm5, %v1467_v57, -inf }
 0x308   : > { %1477 = vmax.xlane.f32.xlu1 %v1476_v58  ;;  %v1404_v23 = vpack.c.bf16 %v1387_v22, %v1387_v22 }
 0x30a   : > { %v1525_v26 = vunpack.c.l.b16 %v1404_v23 }
 0x30d   : > { %v1457_v63 = vpop.f32.mrf.mxu3  ;;  %v1388_v24 = vpop.f32.mrf.mxu2 }
 0x30e   : > { %v1468_v0 = vsel %vm1462_vm4, %v1457_v63, -1e+30  ;;  %v1389_v25 = vadd.f32 %v1388_v24, %v1207_v20 }
 0x30f   : > { %v1479_v1 = vsel %vm1469_vm5, %v1468_v0, -inf }
 0x310   : > { %1480 = vmax.xlane.f32.xlu1 %v1479_v1  ;;  %v1405_v27 = vpack.c.bf16 %v1389_v25, %v1389_v25 }
 0x312   : > { %v1526_v28 = vunpack.c.l.b16 %v1405_v27 }
 0x314   : > { %v1527_v29 = vpack.c.b16 %v1526_v28, %v1525_v26 }
 0x315   : > { %v1391_v30 = vpop.f32.mrf.mxu2 }
 0x316   : > { %1539 = vmatpush.bf16.msra.mxu3 %v1527_v29  ;;  %v1392_v31 = vadd.f32 %v1391_v30, %v1207_v20 }
 0x31d   : > { %v1393_v33 = vpop.f32.mrf.mxu2 }
 0x31e   : > { %v1394_v34 = vadd.f32 %v1393_v33, %v1207_v20  ;;  %v11248_v33 = vld [vmem:[%s948_s5] ss:$0 sm:$0xff]  ;;  %s12474_s5 = sld [smem:[#allocation24_spill]] }
 0x320   : > { %v1407_v36 = vpack.c.bf16 %v1394_v34, %v1394_v34 }
 0x322   : > { %v1554_v37 = vunpack.c.l.b16 %v1407_v36 }
 0x324   : > { %p7487_p3 = scmp.ge.s32.totalorder %s12474_s5, 1 }
 0x36b   : > { %v1472_v2 = vpop.xlane.xlu0 %1471 }
 0x36c   : > { %v1482_v3 = vsub.f32 %v1465_v32, %v1472_v2  ;;  %v1406_v32 = vpack.c.bf16 %v1392_v31, %v1392_v31 }
 0x36e   : > { %v1486_v4 = vmul.f32 1.442695, %v1482_v3  ;;  %v1553_v35 = vunpack.c.l.b16 %v1406_v32 }
 0x370   : > { %10341 = vpow2.f32 %v1486_v4  ;;  %v1555_v38 = vpack.c.b16 %v1554_v37, %v1553_v35 }
 0x372   : > { %1567 = vmatpush.bf16.msrb.mxu3 %v1555_v38  ;;  %v10340_v38 = vld [vmem:[%s951_s30] ss:$0 sm:$0xff] }
 0x373   : > { %v1475_v5 = vpop.xlane.xlu0 %1474 }
 0x374   : > { %v1483_v6 = vsub.f32 %v1466_v48, %v1475_v5 }
 0x376   : > { %v10342_v7 = vpop.eup %10341  ;;  %v1488_v8 = vmul.f32 1.442695, %v1483_v6 }
 0x377   : > { %v1494_v9 = vsel %vm1469_vm5, %v10342_v7, 0.0 }
 0x378   : > { %10343 = vpow2.f32 %v1488_v8  ;;  %1495 = vadd.xlane.f32.xlu2 %v1494_v9 }
 0x37b   : > { %v1478_v10 = vpop.xlane.xlu1 %1477 }
 0x37c   : > { %v1484_v11 = vsub.f32 %v1467_v57, %v1478_v10 }
 0x37e   : > { %v10344_v12 = vpop.eup %10343  ;;  %v1490_v13 = vmul.f32 1.442695, %v1484_v11 }
 0x37f   : > { %v1497_v42 = vsel %vm1469_vm5, %v10344_v12, 0.0 }
 0x380   : > { %10345 = vpow2.f32 %v1490_v13  ;;  %1498 = vadd.xlane.f32.xlu2 %v1497_v42 }
 0x383   : > { %v1481_v45 = vpop.xlane.xlu1 %1480 }
 0x384   : > { %v1485_v14 = vsub.f32 %v1468_v0, %v1481_v45 }
 0x386   : > { %v10346_v15 = vpop.eup %10345  ;;  %v1492_v16 = vmul.f32 1.442695, %v1485_v14 }
 0x387   : > { %v1500_v17 = vsel %vm1469_vm5, %v10346_v15, 0.0 }
 0x388   : > { %10347 = vpow2.f32 %v1492_v16  ;;  %1501 = vadd.xlane.f32.xlu0 %v1500_v17 }
 0x38e   : > { %v10348_v18 = vpop.eup %10347 }
 0x38f   : > { %v1503_v19 = vsel %vm1469_vm5, %v10348_v18, 0.0 }
 0x390   : > { %1504 = vadd.xlane.f32.xlu1 %v1503_v19 }
 0x3eb   : > { %v1496_v46 = vpop.xlane.xlu2 %1495 }
 0x3ec   : > { %10349 = vrcp.f32 %v1496_v46 }
 0x3f2   : > { %v10350_v47 = vpop.eup %10349 }
 0x3f3   : > { %v1499_v41 = vpop.xlane.xlu2 %1498  ;;  %v1510_v48 = vmul.f32 %v10350_v47, %v10342_v7 }
 0x3f4   : > { %10351 = vrcp.f32 %v1499_v41 }
 0x3f5   : > { %v1514_v50 = vpack.c.bf16 %v1510_v48, %v1510_v48 }
 0x3f7   : > { %v1520_v54 = vunpack.c.l.b16 %v1514_v50 }
 0x3fa   : > { %v10352_v49 = vpop.eup %10351 }
 0x3fb   : > { %v1511_v51 = vmul.f32 %v10352_v49, %v10344_v12  ;;  %v1502_v52 = vpop.xlane.xlu0 %1501 }
 0x3fc   : > { %10353 = vrcp.f32 %v1502_v52 }
 0x3fd   : > { %v1515_v53 = vpack.c.bf16 %v1511_v51, %v1511_v51 }
 0x3ff   : > { %v1521_v55 = vunpack.c.l.b16 %v1515_v53 }
 0x401   : > { %v1522_v56 = vpack.c.b16 %v1521_v55, %v1520_v54 }
 0x402   : > { %v10354_v58 = vpop.eup %10353 }
 0x403   : > { %7485 = vmatmul.msk.bf16.vlgmr.msra.gmra.mxu3 %vm1469_vm5, %v1522_v56  ;;  %v1505_v57 = vpop.xlane.xlu1 %1504  ;;  %v1512_v59 = vmul.f32 %v10354_v58, %v10346_v15 }
 0x404   : > { %10355 = vrcp.f32 %v1505_v57 }
 0x405   : > { %v1516_v61 = vpack.c.bf16 %v1512_v59, %v1512_v59 }
 0x407   : > { %v1548_v0 = vunpack.c.l.b16 %v1516_v61 }
 0x40a   : > { %v10356_v60 = vpop.eup %10355 }
 0x40b   : > { %v1513_v62 = vmul.f32 %v10356_v60, %v10348_v18 }
 0x40d   : > { %v1517_v63 = vpack.c.bf16 %v1513_v62, %v1513_v62 }
 0x40f   : > { %v1549_v1 = vunpack.c.l.b16 %v1517_v63 }
 0x411   : > { %v1550_v2 = vpack.c.b16 %v1549_v1, %v1548_v0 }
 0x413   : > { %7486 = vmatmul.msk.bf16.vlgmr.msrb.gmra.mxu3 %vm1469_vm5, %v1550_v2 }
 0x486   : > { %v1541_v3 = vpop.f32.mrf.mxu3 }
 0x487   : > { %v1574_v4 = vadd.f32 %v1541_v3, %v11166_v39 }
 0x489   : > { %1580 = vadd.xlane.f32.xlu2 %v1574_v4  ;;  %v1592_v5 = vmul.f32 %v1574_v4, %v1574_v4 }
 0x48b   : > { %1596 = vadd.xlane.f32.xlu0 %v1592_v5 }
 0x48e   : > { %v1543_v6 = vpop.f32.mrf.mxu3 }
 0x48f   : > { %v11226_v7 = vadd.f32 %v1543_v6, %v11168_v40 }
 0x491   : > { %v1593_v39 = vmul.f32 %v11226_v7, %v11226_v7 }
 0x493   : > { %1582 = vadd.xlane.f32.xlu0 %v11226_v7 }
 0x496   : > { %v1569_v8 = vpop.f32.mrf.mxu3 }
 0x497   : > { %v11230_v9 = vadd.f32 %v1569_v8, %v11176_v43 }
 0x499   : > { %1584 = vadd.xlane.f32.xlu1 %v11230_v9  ;;  %v1594_v43 = vmul.f32 %v11230_v9, %v11230_v9 }
 0x49e   : > { %v1571_v10 = vpop.f32.mrf.mxu3 }
 0x49f   : > { %v11234_v11 = vadd.f32 %v1571_v10, %v11178_v44 }
 0x4a1   : > { %1598 = vadd.xlane.f32.xlu1 %v1593_v39  ;;  %1586 = vadd.xlane.f32.xlu2 %v11234_v11  ;;  %v1595_v40 = vmul.f32 %v11234_v11, %v11234_v11 }
 0x4a3   : > { %1602 = vadd.xlane.f32.xlu0 %v1595_v40 }
 0x4a9   : > { %1600 = vadd.xlane.f32.xlu2 %v1594_v43 }
 0x4fc   : > { %v1581_v12 = vpop.xlane.xlu2 %1580 }
 0x4fd   : > { %v1588_v13 = vmul.f32 0.03125, %v1581_v12 }
 0x4fe   : > { %v1597_v42 = vpop.xlane.xlu0 %1596 }
 0x4ff   : > { %v1608_v45 = vmul.f32 %v1588_v13, %v1588_v13  ;;  %v1604_v44 = vmul.f32 0.03125, %v1597_v42  ;;  %v1620_v32 = vsub.f32 %v1574_v4, %v1588_v13 }
 0x501   : > { %v1612_v14 = vsub.f32 %v1604_v44, %v1608_v45 }
 0x503   : > { %v1616_v15 = vmax.f32 %v1612_v14, 0.0 }
 0x505   : > { %v1624_v16 = vadd.f32 1e-05, %v1616_v15 }
 0x506   : > { %v1583_v20 = vpop.xlane.xlu0 %1582 }
 0x507   : > { %10357 = vrsqrt.f32 %v1624_v16  ;;  %v1589_v22 = vmul.f32 0.03125, %v1583_v20  ;;  %vm1634_vm7 = vweird.f32 %v1624_v16 }
 0x509   : > { %v1609_v27 = vmul.f32 %v1589_v22, %v1589_v22  ;;  %v1621_v10 = vsub.f32 %v11226_v7, %v1589_v22 }
 0x50c   : > { %v1585_v17 = vpop.xlane.xlu1 %1584 }
 0x50d   : > { %v10358_v18 = vpop.eup %10357  ;;  %v1590_v48 = vmul.f32 0.03125, %v1585_v17 }
 0x50e   : > { %v1629_v19 = vmul.f32 %v10358_v18, %v1624_v16  ;;  %vm1635_vm6 = vweird.f32 %v10358_v18 }
 0x50f   : > { %vm1636_vm8 = vmor %vm1634_vm7, %vm1635_vm6  ;;  %v1610_v55 = vmul.f32 %v1590_v48, %v1590_v48  ;;  %v1622_v20 = vsub.f32 %v11230_v9, %v1590_v48 }
 0x510   : > { %v1630_v21 = vmul.f32 %v10358_v18, %v1629_v19 }
 0x512   : > { %v1631_v23 = vmul.f32 0.5, %v1630_v21 }
 0x514   : > { %v1632_v24 = vsub.f32 1.5, %v1631_v23  ;;  %v1599_v25 = vpop.xlane.xlu1 %1598  ;;  %v1587_v26 = vpop.xlane.xlu2 %1586 }
 0x515   : > { %v1605_v28 = vmul.f32 0.03125, %v1599_v25  ;;  %v1591_v29 = vmul.f32 0.03125, %v1587_v26 }
 0x516   : > { %v1633_v30 = vmul.f32 %v10358_v18, %v1632_v24  ;;  %v1603_v31 = vpop.xlane.xlu0 %1602 }
 0x517   : > { %v1613_v34 = vsub.f32 %v1605_v28, %v1609_v27  ;;  %v1611_v35 = vmul.f32 %v1591_v29, %v1591_v29  ;;  %v1607_v36 = vmul.f32 0.03125, %v1603_v31  ;;  %v1623_v13 = vsub.f32 %v11234_v11, %v1591_v29 }
 0x518   : > { %v1637_v37 = vsel %vm1636_vm8, %v10358_v18, %v1633_v30 }
 0x519   : > { %v1668_v46 = vmul.f32 %v1637_v37, %v1620_v32  ;;  %v1617_v41 = vmax.f32 %v1613_v34, 0.0  ;;  %v1615_v47 = vsub.f32 %v1607_v36, %v1611_v35 }
 0x51b   : > { %v1675_v49 = vmul.f32 %v11248_v33, %v1668_v46  ;;  %v1625_v50 = vadd.f32 1e-05, %v1617_v41  ;;  %v1619_v51 = vmax.f32 %v1615_v47, 0.0 }
 0x51c   : > { %v1601_v52 = vpop.xlane.xlu2 %1600 }
 0x51d   : > { %v11256_v53 = vadd.f32 %v10340_v38, %v1675_v49  ;;  %10359 = vrsqrt.f32 %v1625_v50  ;;  %v1627_v54 = vadd.f32 1e-05, %v1619_v51  ;;  %v1606_v56 = vmul.f32 0.03125, %v1601_v52 }
 0x51e   : > { %vm1644_vm10 = vweird.f32 %v1625_v50 }
 0x51f   : > { %10361 = vrsqrt.f32 %v1627_v54  ;;  %v1614_v57 = vsub.f32 %v1606_v56, %v1610_v55  ;;  %vm1664_vm13 = vweird.f32 %v1627_v54 }
 0x521   : > { %v1618_v58 = vmax.f32 %v1614_v57, 0.0 }
 0x523   : > { %v10360_v59 = vpop.eup %10359  ;;  %v1626_v61 = vadd.f32 1e-05, %v1618_v58 }
 0x524   : > { %v1639_v60 = vmul.f32 %v10360_v59, %v1625_v50  ;;  %vm1645_vm9 = vweird.f32 %v10360_v59 }
 0x525   : > { %v10362_v62 = vpop.eup %10361  ;;  %10363 = vrsqrt.f32 %v1626_v61  ;;  %vm1646_vm12 = vmor %vm1644_vm10, %vm1645_vm9  ;;  %vm1654_vm0 = vweird.f32 %v1626_v61 }
 0x526   : > { %v1640_v63 = vmul.f32 %v10360_v59, %v1639_v60  ;;  %v1659_v0 = vmul.f32 %v10362_v62, %v1627_v54  ;;  %vm1665_vm11 = vweird.f32 %v10362_v62 }
 0x527   : > { %vm1666_vm14 = vmor %vm1664_vm13, %vm1665_vm11 }
 0x528   : > { %v1641_v1 = vmul.f32 0.5, %v1640_v63  ;;  %v1660_v2 = vmul.f32 %v10362_v62, %v1659_v0 }
 0x52a   : > { %v1642_v3 = vsub.f32 1.5, %v1641_v1  ;;  %v1661_v4 = vmul.f32 0.5, %v1660_v2 }
 0x52b   : > { %v10364_v5 = vpop.eup %10363 }
 0x52c   : > { %v1643_v6 = vmul.f32 %v10360_v59, %v1642_v3  ;;  %v1662_v8 = vsub.f32 1.5, %v1661_v4  ;;  %v1649_v39 = vmul.f32 %v10364_v5, %v1626_v61  ;;  %vm1655_vm15 = vweird.f32 %v10364_v5 }
 0x52d   : > { %vm1656_vm1 = vmor %vm1654_vm0, %vm1655_vm15 }
 0x52e   : > { %v1647_v40 = vsel %vm1646_vm12, %v10360_v59, %v1643_v6  ;;  %v1663_v43 = vmul.f32 %v10362_v62, %v1662_v8  ;;  %v1650_v42 = vmul.f32 %v10364_v5, %v1649_v39 }
 0x52f   : > { %v1669_v12 = vmul.f32 %v1647_v40, %v1621_v10 }
 0x530   : > { %v1667_v45 = vsel %vm1666_vm14, %v10362_v62, %v1663_v43  ;;  %v1651_v15 = vmul.f32 0.5, %v1650_v42 }
 0x531   : > { %v1676_v44 = vmul.f32 %v11248_v33, %v1669_v12  ;;  %v1671_v14 = vmul.f32 %v1667_v45, %v1623_v13 }
 0x532   : > { %v1652_v7 = vsub.f32 1.5, %v1651_v15 }
 0x533   : > { %v11261_v16 = vadd.f32 %v10340_v38, %v1676_v44  ;;  %v1678_v17 = vmul.f32 %v11248_v33, %v1671_v14 }
 0x534   : > { %v1653_v19 = vmul.f32 %v10364_v5, %v1652_v7 }
 0x535   : > { %v11264_v18 = vadd.f32 %v10340_v38, %v1678_v17 }
 0x536   : > { %v1657_v11 = vsel %vm1656_vm1, %v10364_v5, %v1653_v19 }
 0x537   : > { %v1670_v21 = vmul.f32 %v1657_v11, %v1622_v20  ;;  %1689 = sbr.rel (%p7487_p3) target bundleno = 2077 (0x81d), region = 140 }
 0x539   : > { %v1677_v22 = vmul.f32 %v11248_v33, %v1670_v21 }
 0x53b   : > { %v11268_v23 = vadd.f32 %v10340_v38, %v1677_v22 }
 0x53c   : > { %v9655_v9 = vld [vmem:[%s11081_s6 + $0x38] sm:$0xff]  ;;  %v9654_v24 = vld [vmem:[%s11081_s6 + $0x30] sm:$0xff]  ;;  %v9653_v25 = vld [vmem:[%s11081_s6 + $0x28] sm:$0xff]  ;;  %v1706_v13 = vpack.c.bf16 %v11261_v16, %v11256_v53 }
 0x53d   : > { %1760 = vmatpush.bf16.msra.mxu0 %v9655_v9  ;;  %v9652_v26 = vld [vmem:[%s11081_s6 + $0x20] sm:$0xff]  ;;  %v9651_v27 = vld [vmem:[%s11081_s6 + $0x18] sm:$0xff]  ;;  %v9650_v28 = vld [vmem:[%s11081_s6 + $0x10] sm:$0xff] }
 0x53e   : > { %v7970_v29 = vld [vmem:[%s11108_s24 + $0x380] sm:$0xf]  ;;  %v9768_v31 = vld [vmem:[%s11108_s24 + $0x384] sm:$0xf]  ;;  %v7978_v34 = vld [vmem:[%s11108_s24 + $0x388] sm:$0xf] }
 0x53f   : > { %v9776_v30 = vld [vmem:[%s11108_s24 + $0x3bc] sm:$0xf0]  ;;  %v7972_v33 = vld [vmem:[%s11108_s24 + $0x3c0] sm:$0xf0]  ;;  %v9777_v35 = vld [vmem:[%s11108_s24 + $0x3c4] sm:$0xf0] }
 0x540   : > { %v7971_v32 = vor.u32 %v9776_v30, %v7970_v29  ;;  %v7975_v36 = vor.u32 %v9768_v31, %v7972_v33  ;;  %v7979_v37 = vor.u32 %v9777_v35, %v7978_v34  ;;  %v7906_v38 = vld [vmem:[%s11108_s24 + $0x300] sm:$0xf]  ;;  %v9752_v41 = vld [vmem:[%s11108_s24 + $0x304] sm:$0xf]  ;;  %v7914_v50 = vld [vmem:[%s11108_s24 + $0x308] sm:$0xf]  ;;  %v1707_v31 = vpack.c.bf16 %v11264_v18, %v11268_v23 }
 0x541   : > { %1761 = vmatpush.bf16.msra.mxu0 %v9654_v24  ;;  %v9760_v46 = vld [vmem:[%s11108_s24 + $0x33c] sm:$0xf0]  ;;  %v7908_v47 = vld [vmem:[%s11108_s24 + $0x340] sm:$0xf0]  ;;  %v9761_v51 = vld [vmem:[%s11108_s24 + $0x344] sm:$0xf0] }
 0x542   : > { %2585 = vmatpush.bf16.msra.mxu1 %v7971_v32  ;;  %2604 = vmatpush.bf16.msra.mxu2 %v7975_v36  ;;  %v7907_v48 = vor.u32 %v9760_v46, %v7906_v38  ;;  %v7911_v49 = vor.u32 %v9752_v41, %v7908_v47  ;;  %v9649_v52 = vld [vmem:[%s11081_s6 + $0x8] sm:$0xff]  ;;  %v7915_v54 = vor.u32 %v9761_v51, %v7914_v50  ;;  %v7842_v55 = vld [vmem:[%s11108_s24 + $0x280] sm:$0xf]  ;;  %v9769_v60 = vld [vmem:[%s11108_s24 + $0x38c] sm:$0xf] }
 0x543   : > { %2623 = vmatpush.bf16.msra.mxu3 %v7979_v37  ;;  %v9744_v56 = vld [vmem:[%s11108_s24 + $0x2bc] sm:$0xf0]  ;;  %v9736_v57 = vld [vmem:[%s11108_s24 + $0x284] sm:$0xf]  ;;  %v7850_v59 = vld [vmem:[%s11108_s24 + $0x288] sm:$0xf] }
 0x544   : > { %v7844_v58 = vld [vmem:[%s11108_s24 + $0x2c0] sm:$0xf0]  ;;  %v7980_v61 = vld [vmem:[%s11108_s24 + $0x3c8] sm:$0xf0]  ;;  %v7843_v62 = vor.u32 %v9744_v56, %v7842_v55  ;;  %v9745_v63 = vld [vmem:[%s11108_s24 + $0x2c4] sm:$0xf0] }
 0x545   : > { %1762 = vmatpush.bf16.msra.mxu0 %v9653_v25  ;;  %v7847_v0 = vor.u32 %v9736_v57, %v7844_v58  ;;  %v7851_v1 = vor.u32 %v9745_v63, %v7850_v59  ;;  %v7778_v2 = vld [vmem:[%s11108_s24 + $0x200] sm:$0xf]  ;;  %v9720_v5 = vld [vmem:[%s11108_s24 + $0x204] sm:$0xf]  ;;  %v7983_v8 = vor.u32 %v9769_v60, %v7980_v61  ;;  %v7786_v10 = vld [vmem:[%s11108_s24 + $0x208] sm:$0xf] }
 0x546   : > { %2586 = vmatpush.bf16.msra.mxu1 %v7907_v48  ;;  %2605 = vmatpush.bf16.msra.mxu2 %v7911_v49  ;;  %v9728_v3 = vld [vmem:[%s11108_s24 + $0x23c] sm:$0xf0]  ;;  %v7780_v6 = vld [vmem:[%s11108_s24 + $0x240] sm:$0xf0]  ;;  %v9729_v39 = vld [vmem:[%s11108_s24 + $0x244] sm:$0xf0] }
 0x547   : > { %2624 = vmatpush.bf16.msra.mxu3 %v7915_v54  ;;  %v9648_v4 = vld [vmem:[%s11081_s6] sm:$0xff]  ;;  %v9753_v40 = vld [vmem:[%s11108_s24 + $0x30c] sm:$0xf]  ;;  %v7779_v12 = vor.u32 %v9728_v3, %v7778_v2  ;;  %v7783_v42 = vor.u32 %v9720_v5, %v7780_v6  ;;  %v7787_v14 = vor.u32 %v9729_v39, %v7786_v10  ;;  %v9704_v15 = vld [vmem:[%s11108_s24 + $0x184] sm:$0xf] }
 0x548   : > { %v7916_v43 = vld [vmem:[%s11108_s24 + $0x348] sm:$0xf0]  ;;  %v7714_v45 = vld [vmem:[%s11108_s24 + $0x180] sm:$0xf]  ;;  %v7716_v17 = vld [vmem:[%s11108_s24 + $0x1c0] sm:$0xf0] }
 0x549   : > { %1763 = vmatpush.bf16.msra.mxu0 %v9652_v26  ;;  %v9712_v44 = vld [vmem:[%s11108_s24 + $0x1bc] sm:$0xf0]  ;;  %v7919_v7 = vor.u32 %v9753_v40, %v7916_v43  ;;  %v7722_v19 = vld [vmem:[%s11108_s24 + $0x188] sm:$0xf]  ;;  %v9737_v11 = vld [vmem:[%s11108_s24 + $0x28c] sm:$0xf]  ;;  %v7719_v22 = vor.u32 %v9704_v15, %v7716_v17 }
 0x54a   : > { %2587 = vmatpush.bf16.msra.mxu1 %v7843_v62  ;;  %2606 = vmatpush.bf16.msra.mxu2 %v7847_v0  ;;  %v9713_v20 = vld [vmem:[%s11108_s24 + $0x1c4] sm:$0xf0]  ;;  %v7852_v21 = vld [vmem:[%s11108_s24 + $0x2c8] sm:$0xf0]  ;;  %v7715_v16 = vor.u32 %v9712_v44, %v7714_v45  ;;  %v7650_v32 = vld [vmem:[%s11108_s24 + $0x100] sm:$0xf] }
 0x54b   : > { %2625 = vmatpush.bf16.msra.mxu3 %v7851_v1  ;;  %v7723_v9 = vor.u32 %v9713_v20, %v7722_v19  ;;  %v7855_v24 = vor.u32 %v9737_v11, %v7852_v21  ;;  %v9721_v25 = vld [vmem:[%s11108_s24 + $0x20c] sm:$0xf]  ;;  %v9696_v33 = vld [vmem:[%s11108_s24 + $0x13c] sm:$0xf0]  ;;  %v9688_v34 = vld [vmem:[%s11108_s24 + $0x104] sm:$0xf] }
 0x54c   : > { %v7788_v26 = vld [vmem:[%s11108_s24 + $0x248] sm:$0xf0]  ;;  %v7651_v35 = vor.u32 %v9696_v33, %v7650_v32  ;;  %v7652_v36 = vld [vmem:[%s11108_s24 + $0x140] sm:$0xf0]  ;;  %v7658_v37 = vld [vmem:[%s11108_s24 + $0x108] sm:$0xf] }
 0x54d   : > { %1764 = vmatpush.bf16.msra.mxu0 %v9651_v27  ;;  %v7791_v27 = vor.u32 %v9721_v25, %v7788_v26  ;;  %v7724_v29 = vld [vmem:[%s11108_s24 + $0x1c8] sm:$0xf0]  ;;  %v9697_v38 = vld [vmem:[%s11108_s24 + $0x144] sm:$0xf0]  ;;  %v7655_v46 = vor.u32 %v9688_v34, %v7652_v36  ;;  %v7586_v18 = vld [vmem:[%s11108_s24 + $0x80] sm:$0xf] }
 0x54e   : > { %2588 = vmatpush.bf16.msra.mxu1 %v7779_v12  ;;  %2607 = vmatpush.bf16.msra.mxu2 %v7783_v42  ;;  %v7659_v41 = vor.u32 %v9697_v38, %v7658_v37  ;;  %v9689_v47 = vld [vmem:[%s11108_s24 + $0x10c] sm:$0xf]  ;;  %v9680_v50 = vld [vmem:[%s11108_s24 + $0xbc] sm:$0xf0]  ;;  %v9672_v51 = vld [vmem:[%s11108_s24 + $0x84] sm:$0xf] }
 0x54f   : > { %2626 = vmatpush.bf16.msra.mxu3 %v7787_v14  ;;  %v7660_v48 = vld [vmem:[%s11108_s24 + $0x148] sm:$0xf0]  ;;  %v7587_v54 = vor.u32 %v9680_v50, %v7586_v18  ;;  %v7594_v56 = vld [vmem:[%s11108_s24 + $0x88] sm:$0xf]  ;;  %v7522_v62 = vld [vmem:[%s11108_s24] sm:$0xf] }
 0x550   : > { %v7663_v49 = vor.u32 %v9689_v47, %v7660_v48  ;;  %v9681_v57 = vld [vmem:[%s11108_s24 + $0xc4] sm:$0xf0]  ;;  %v9673_v58 = vld [vmem:[%s11108_s24 + $0x8c] sm:$0xf]  ;;  %v9664_v63 = vld [vmem:[%s11108_s24 + $0x3c] sm:$0xf0] }
 0x551   : > { %1765 = vmatpush.bf16.msra.mxu0 %v9650_v28  ;;  %v9705_v28 = vld [vmem:[%s11108_s24 + $0x18c] sm:$0xf]  ;;  %v7595_v59 = vor.u32 %v9681_v57, %v7594_v56  ;;  %v9656_v0 = vld [vmem:[%s11108_s24 + $0x4] sm:$0xf]  ;;  %v7523_v1 = vor.u32 %v9664_v63, %v7522_v62  ;;  %v7530_v3 = vld [vmem:[%s11108_s24 + $0x8] sm:$0xf] }
 0x552   : > { %2589 = vmatpush.bf16.msra.mxu1 %v7715_v16  ;;  %2608 = vmatpush.bf16.msra.mxu2 %v7719_v22  ;;  %v7727_v30 = vor.u32 %v9705_v28, %v7724_v29  ;;  %v7596_v60 = vld [vmem:[%s11108_s24 + $0xc8] sm:$0xf0]  ;;  %v7524_v2 = vld [vmem:[%s11108_s24 + $0x40] sm:$0xf0]  ;;  %v7986_v40 = vld [vmem:[%s11108_s24 + $0x390] sm:$0xf] }
 0x553   : > { %2627 = vmatpush.bf16.msra.mxu3 %v7723_v9  ;;  %v7599_v61 = vor.u32 %v9673_v58, %v7596_v60  ;;  %v7527_v5 = vor.u32 %v9656_v0, %v7524_v2  ;;  %v7532_v10 = vld [vmem:[%s11108_s24 + $0x48] sm:$0xf0]  ;;  %v9778_v43 = vld [vmem:[%s11108_s24 + $0x3cc] sm:$0xf0]  ;;  %v9770_v12 = vld [vmem:[%s11108_s24 + $0x394] sm:$0xf] }
 0x554   : > { %v7988_v42 = vld [vmem:[%s11108_s24 + $0x3d0] sm:$0xf0]  ;;  %v7994_v45 = vld [vmem:[%s11108_s24 + $0x398] sm:$0xf]  ;;  %v9771_v17 = vld [vmem:[%s11108_s24 + $0x39c] sm:$0xf] }
 0x555   : > { %1766 = vmatpush.bf16.msra.mxu0 %v9649_v52  ;;  %v7588_v52 = vld [vmem:[%s11108_s24 + $0xc0] sm:$0xf0]  ;;  %v9779_v44 = vld [vmem:[%s11108_s24 + $0x3d4] sm:$0xf0]  ;;  %v7991_v14 = vor.u32 %v9770_v12, %v7988_v42  ;;  %v7922_v20 = vld [vmem:[%s11108_s24 + $0x310] sm:$0xf] }
 0x556   : > { %2590 = vmatpush.bf16.msra.mxu1 %v7651_v35  ;;  %2609 = vmatpush.bf16.msra.mxu2 %v7655_v46  ;;  %v7591_v55 = vor.u32 %v9672_v51, %v7588_v52  ;;  %v7995_v15 = vor.u32 %v9779_v44, %v7994_v45  ;;  %v9762_v11 = vld [vmem:[%s11108_s24 + $0x34c] sm:$0xf0]  ;;  %v9754_v21 = vld [vmem:[%s11108_s24 + $0x314] sm:$0xf]  ;;  %v7930_v9 = vld [vmem:[%s11108_s24 + $0x318] sm:$0xf] }
 0x557   : > { %2628 = vmatpush.bf16.msra.mxu3 %v7659_v41  ;;  %v7923_v16 = vor.u32 %v9762_v11, %v7922_v20  ;;  %v7924_v22 = vld [vmem:[%s11108_s24 + $0x350] sm:$0xf0]  ;;  %v7932_v28 = vld [vmem:[%s11108_s24 + $0x358] sm:$0xf0]  ;;  %v7858_v29 = vld [vmem:[%s11108_s24 + $0x290] sm:$0xf] }
 0x558   : > { %v7927_v25 = vor.u32 %v9754_v21, %v7924_v22  ;;  %v9738_v32 = vld [vmem:[%s11108_s24 + $0x294] sm:$0xf]  ;;  %v7866_v36 = vld [vmem:[%s11108_s24 + $0x298] sm:$0xf]  ;;  %v9739_v38 = vld [vmem:[%s11108_s24 + $0x29c] sm:$0xf] }
 0x559   : > { %1767 = vmatpush.bf16.msra.mxu0 %v9648_v4  ;;  %v9665_v4 = vld [vmem:[%s11108_s24 + $0x44] sm:$0xf0]  ;;  %v7860_v33 = vld [vmem:[%s11108_s24 + $0x2d0] sm:$0xf0]  ;;  %v9747_v37 = vld [vmem:[%s11108_s24 + $0x2d4] sm:$0xf0] }
 0x55a   : > { %2591 = vmatpush.bf16.msra.mxu1 %v7587_v54  ;;  %2610 = vmatpush.bf16.msra.mxu2 %v7591_v55  ;;  %v7531_v6 = vor.u32 %v9665_v4, %v7530_v3  ;;  %v7863_v35 = vor.u32 %v9738_v32, %v7860_v33  ;;  %v7867_v46 = vor.u32 %v9747_v37, %v7866_v36  ;;  %v7868_v41 = vld [vmem:[%s11108_s24 + $0x2d8] sm:$0xf0]  ;;  %v7794_v48 = vld [vmem:[%s11108_s24 + $0x210] sm:$0xf]  ;;  %v7796_v51 = vld [vmem:[%s11108_s24 + $0x250] sm:$0xf0] }
 0x55b   : > { %2629 = vmatpush.bf16.msra.mxu3 %v7595_v59  ;;  %v7871_v47 = vor.u32 %v9739_v38, %v7868_v41  ;;  %v9730_v18 = vld [vmem:[%s11108_s24 + $0x24c] sm:$0xf0]  ;;  %v7802_v52 = vld [vmem:[%s11108_s24 + $0x218] sm:$0xf]  ;;  %v9723_v57 = vld [vmem:[%s11108_s24 + $0x21c] sm:$0xf] }
 0x55c   : > { %1768 = vmatmul.bf16.vlgmr.msra.gmra.mxu0 %v1706_v13  ;;  %v7987_v13 = vor.u32 %v9778_v43, %v7986_v40  ;;  %v7795_v50 = vor.u32 %v9730_v18, %v7794_v48  ;;  %v9731_v54 = vld [vmem:[%s11108_s24 + $0x254] sm:$0xf0]  ;;  %v7804_v58 = vld [vmem:[%s11108_s24 + $0x258] sm:$0xf0]  ;;  %v7730_v60 = vld [vmem:[%s11108_s24 + $0x190] sm:$0xf] }
 0x55d   : > { %2642 = vmatpush.bf16.msrb.mxu0 %v7983_v8  ;;  %v9657_v8 = vld [vmem:[%s11108_s24 + $0xc] sm:$0xf]  ;;  %v7803_v56 = vor.u32 %v9731_v54, %v7802_v52  ;;  %v7807_v59 = vor.u32 %v9723_v57, %v7804_v58  ;;  %v9706_v62 = vld [vmem:[%s11108_s24 + $0x194] sm:$0xf]  ;;  %v9715_v2 = vld [vmem:[%s11108_s24 + $0x1d4] sm:$0xf0] }
 0x55e   : > { %2592 = vmatpush.bf16.msra.mxu1 %v7523_v1  ;;  %v7535_v39 = vor.u32 %v9657_v8, %v7532_v10  ;;  %2611 = vmatpush.bf16.msra.mxu2 %v7527_v5  ;;  %v7732_v0 = vld [vmem:[%s11108_s24 + $0x1d0] sm:$0xf0]  ;;  %v7738_v1 = vld [vmem:[%s11108_s24 + $0x198] sm:$0xf]  ;;  %v9707_v5 = vld [vmem:[%s11108_s24 + $0x19c] sm:$0xf] }
 0x55f   : > { %2630 = vmatpush.bf16.msra.mxu3 %v7531_v6  ;;  %v7735_v3 = vor.u32 %v9706_v62, %v7732_v0  ;;  %v7739_v4 = vor.u32 %v9715_v2, %v7738_v1  ;;  %v7740_v6 = vld [vmem:[%s11108_s24 + $0x1d8] sm:$0xf0]  ;;  %v7666_v8 = vld [vmem:[%s11108_s24 + $0x110] sm:$0xf]  ;;  %v9690_v40 = vld [vmem:[%s11108_s24 + $0x114] sm:$0xf] }
 0x560   : > { %v7743_v10 = vor.u32 %v9707_v5, %v7740_v6  ;;  %v7668_v43 = vld [vmem:[%s11108_s24 + $0x150] sm:$0xf0]  ;;  %v7674_v45 = vld [vmem:[%s11108_s24 + $0x118] sm:$0xf]  ;;  %v11401_v22 = vld [vmem:[%s11087_s2] ss:$0 sm:$0xff] }
 0x561   : > { %2643 = vmatpush.bf16.msrb.mxu0 %v7919_v7  ;;  %v7996_v7 = vld [vmem:[%s11108_s24 + $0x3d8] sm:$0xf0]  ;;  %v7671_v42 = vor.u32 %v9690_v40, %v7668_v43  ;;  %v9699_v44 = vld [vmem:[%s11108_s24 + $0x154] sm:$0xf0]  ;;  %v9674_v11 = vld [vmem:[%s11108_s24 + $0x94] sm:$0xf] }
 0x562   : > { %2661 = vmatpush.bf16.msrb.mxu1 %v7987_v13  ;;  %v7999_v19 = vor.u32 %v9771_v17, %v7996_v7  ;;  %2680 = vmatpush.bf16.msrb.mxu2 %v7991_v14  ;;  %v9691_v14 = vld [vmem:[%s11108_s24 + $0x11c] sm:$0xf]  ;;  %v7602_v7 = vld [vmem:[%s11108_s24 + $0x90] sm:$0xf]  ;;  %v7604_v21 = vld [vmem:[%s11108_s24 + $0xd0] sm:$0xf0] }
 0x563   : > { %2699 = vmatpush.bf16.msrb.mxu3 %v7995_v15  ;;  %v7675_v15 = vor.u32 %v9699_v44, %v7674_v45  ;;  %v7676_v17 = vld [vmem:[%s11108_s24 + $0x158] sm:$0xf0]  ;;  %v7540_v33 = vld [vmem:[%s11108_s24 + $0x50] sm:$0xf0]  ;;  %v9780_v52 = vld [vmem:[%s11108_s24 + $0x3dc] sm:$0xf0] }
 0x564   : > { %v7679_v20 = vor.u32 %v9691_v14, %v7676_v17  ;;  %v9659_v41 = vld [vmem:[%s11108_s24 + $0x1c] sm:$0xf]  ;;  %v9772_v54 = vld [vmem:[%s11108_s24 + $0x3a4] sm:$0xf]  ;;  %v8010_v57 = vld [vmem:[%s11108_s24 + $0x3a8] sm:$0xf] }
 0x565   : > { %2644 = vmatpush.bf16.msrb.mxu0 %v7855_v24  ;;  %v9763_v24 = vld [vmem:[%s11108_s24 + $0x354] sm:$0xf0]  ;;  %v9781_v58 = vld [vmem:[%s11108_s24 + $0x3e4] sm:$0xf0]  ;;  %v8012_v62 = vld [vmem:[%s11108_s24 + $0x3e8] sm:$0xf0] }
 0x566   : > { %v7931_v26 = vor.u32 %v9763_v24, %v7930_v9  ;;  %2662 = vmatpush.bf16.msrb.mxu1 %v7923_v16  ;;  %2681 = vmatpush.bf16.msrb.mxu2 %v7927_v25  ;;  %v7610_v16 = vld [vmem:[%s11108_s24 + $0x98] sm:$0xf]  ;;  %v9675_v25 = vld [vmem:[%s11108_s24 + $0x9c] sm:$0xf]  ;;  %v9764_v1 = vld [vmem:[%s11108_s24 + $0x35c] sm:$0xf0] }
 0x567   : > { %v9683_v24 = vld [vmem:[%s11108_s24 + $0xd4] sm:$0xf0]  ;;  %v9756_v2 = vld [vmem:[%s11108_s24 + $0x324] sm:$0xf]  ;;  %v7948_v43 = vld [vmem:[%s11108_s24 + $0x368] sm:$0xf0] }
 0x568   : > { %2700 = vmatpush.bf16.msrb.mxu3 %v7931_v26  ;;  %v7612_v26 = vld [vmem:[%s11108_s24 + $0xd8] sm:$0xf0]  ;;  %v9740_v45 = vld [vmem:[%s11108_s24 + $0x2a4] sm:$0xf]  ;;  %v7882_v14 = vld [vmem:[%s11108_s24 + $0x2a8] sm:$0xf] }
 0x569   : > { %2645 = vmatpush.bf16.msrb.mxu0 %v7791_v27  ;;  %v9755_v27 = vld [vmem:[%s11108_s24 + $0x31c] sm:$0xf]  ;;  %v7615_v32 = vor.u32 %v9675_v25, %v7612_v26  ;;  %v7876_v44 = vld [vmem:[%s11108_s24 + $0x2e0] sm:$0xf0]  ;;  %v9749_v17 = vld [vmem:[%s11108_s24 + $0x2e4] sm:$0xf0] }
 0x56a   : > { %2682 = vmatpush.bf16.msrb.mxu2 %v7863_v35  ;;  %v9667_v35 = vld [vmem:[%s11108_s24 + $0x54] sm:$0xf0]  ;;  %v7812_v25 = vld [vmem:[%s11108_s24 + $0x260] sm:$0xf0]  ;;  %v7818_v26 = vld [vmem:[%s11108_s24 + $0x228] sm:$0xf] }
 0x56c   : > { %1773 = vmatmul.bf16.gmra.mxu0 %v1707_v31  ;;  %v9746_v31 = vld [vmem:[%s11108_s24 + $0x2cc] sm:$0xf0]  ;;  %2701 = vmatpush.bf16.msrb.mxu3 %v7867_v46 }
 0x56d   : > { %2646 = vmatpush.bf16.msrb.mxu0 %v7727_v30  ;;  %v7935_v30 = vor.u32 %v9755_v27, %v7932_v28  ;;  %v7859_v34 = vor.u32 %v9746_v31, %v7858_v29  ;;  %v7607_v27 = vor.u32 %v9674_v11, %v7604_v21  ;;  %v7611_v28 = vor.u32 %v9683_v24, %v7610_v16  ;;  %v7538_v29 = vld [vmem:[%s11108_s24 + $0x10] sm:$0xf]  ;;  %v9658_v31 = vld [vmem:[%s11108_s24 + $0x14] sm:$0xf]  ;;  %v7810_v21 = vld [vmem:[%s11108_s24 + $0x220] sm:$0xf] }
 0x56e   : > { %v7543_v38 = vor.u32 %v9658_v31, %v7540_v33  ;;  %v7883_v11 = vor.u32 %v9749_v17, %v7882_v14  ;;  %v9732_v16 = vld [vmem:[%s11108_s24 + $0x25c] sm:$0xf0]  ;;  %v7820_v33 = vld [vmem:[%s11108_s24 + $0x268] sm:$0xf0]  ;;  %v9660_v17 = vld [vmem:[%s11108_s24 + $0x24] sm:$0xf] }
 0x56f   : > { %2663 = vmatpush.bf16.msrb.mxu1 %v7859_v34  ;;  %v7546_v34 = vld [vmem:[%s11108_s24 + $0x18] sm:$0xf]  ;;  %v7554_v14 = vld [vmem:[%s11108_s24 + $0x20] sm:$0xf] }
 0x570   : > { %2702 = vmatpush.bf16.msrb.mxu3 %v7803_v56  ;;  %v7547_v46 = vor.u32 %v9667_v35, %v7546_v34  ;;  %v8004_v56 = vld [vmem:[%s11108_s24 + $0x3e0] sm:$0xf0] }
 0x571   : > { %2647 = vmatpush.bf16.msrb.mxu0 %v7663_v49  ;;  %v9722_v49 = vld [vmem:[%s11108_s24 + $0x214] sm:$0xf] }
 0x572   : > { %v7799_v55 = vor.u32 %v9722_v49, %v7796_v51  ;;  %v8002_v51 = vld [vmem:[%s11108_s24 + $0x3a0] sm:$0xf] }
 0x573   : > { %2664 = vmatpush.bf16.msrb.mxu1 %v7795_v50 }
 0x574   : > { %2683 = vmatpush.bf16.msrb.mxu2 %v7799_v55  ;;  %2703 = vmatpush.bf16.msrb.mxu3 %v7739_v4  ;;  %v8003_v55 = vor.u32 %v9780_v52, %v8002_v51  ;;  %v9717_v51 = vld [vmem:[%s11108_s24 + $0x1e4] sm:$0xf0] }
 0x575   : > { %2648 = vmatpush.bf16.msrb.mxu0 %v7599_v61  ;;  %v9714_v61 = vld [vmem:[%s11108_s24 + $0x1cc] sm:$0xf0] }
 0x576   : > { %v7731_v63 = vor.u32 %v9714_v61, %v7730_v60  ;;  %v8011_v60 = vor.u32 %v9781_v58, %v8010_v57  ;;  %v9773_v61 = vld [vmem:[%s11108_s24 + $0x3ac] sm:$0xf]  ;;  %v7682_v57 = vld [vmem:[%s11108_s24 + $0x120] sm:$0xf] }
 0x577   : > { %v8015_v0 = vor.u32 %v9773_v61, %v8012_v62  ;;  %v7684_v61 = vld [vmem:[%s11108_s24 + $0x160] sm:$0xf0] }
 0x578   : > { %2665 = vmatpush.bf16.msrb.mxu1 %v7731_v63  ;;  %2684 = vmatpush.bf16.msrb.mxu2 %v7735_v3  ;;  %v7938_v63 = vld [vmem:[%s11108_s24 + $0x320] sm:$0xf]  ;;  %v7940_v3 = vld [vmem:[%s11108_s24 + $0x360] sm:$0xf0] }
 0x579   : > { %2649 = vmatpush.bf16.msrb.mxu0 %v7535_v39  ;;  %v9698_v39 = vld [vmem:[%s11108_s24 + $0x14c] sm:$0xf0]  ;;  %2704 = vmatpush.bf16.msrb.mxu3 %v7675_v15  ;;  %v7939_v5 = vor.u32 %v9764_v1, %v7938_v63  ;;  %v7943_v6 = vor.u32 %v9756_v2, %v7940_v3  ;;  %v9701_v1 = vld [vmem:[%s11108_s24 + $0x164] sm:$0xf0]  ;;  %v9693_v2 = vld [vmem:[%s11108_s24 + $0x12c] sm:$0xf] }
 0x57a   : > { %v7667_v13 = vor.u32 %v9698_v39, %v7666_v8  ;;  %v7946_v8 = vld [vmem:[%s11108_s24 + $0x328] sm:$0xf]  ;;  %v9757_v39 = vld [vmem:[%s11108_s24 + $0x32c] sm:$0xf] }
 0x57c   : > { %2666 = vmatpush.bf16.msrb.mxu1 %v7667_v13  ;;  %2685 = vmatpush.bf16.msrb.mxu2 %v7671_v42  ;;  %v9748_v13 = vld [vmem:[%s11108_s24 + $0x2dc] sm:$0xf0]  ;;  %v7951_v42 = vor.u32 %v9757_v39, %v7948_v43  ;;  %v7626_v39 = vld [vmem:[%s11108_s24 + $0xa8] sm:$0xf] }
 0x57d   : > { %2718 = vmatpush.bf16.msra.mxu0 %v7999_v19  ;;  %v9682_v19 = vld [vmem:[%s11108_s24 + $0xcc] sm:$0xf0]  ;;  %2705 = vmatpush.bf16.msrb.mxu3 %v7611_v28  ;;  %v7811_v28 = vor.u32 %v9732_v16, %v7810_v21 }
 0x57e   : > { %v7603_v9 = vor.u32 %v9682_v19, %v7602_v7  ;;  %v9741_v7 = vld [vmem:[%s11108_s24 + $0x2ac] sm:$0xf] }
 0x57f   : > { %v7884_v19 = vld [vmem:[%s11108_s24 + $0x2e8] sm:$0xf0] }
 0x580   : > { %2667 = vmatpush.bf16.msrb.mxu1 %v7603_v9  ;;  %2686 = vmatpush.bf16.msrb.mxu2 %v7607_v27  ;;  %v9724_v9 = vld [vmem:[%s11108_s24 + $0x224] sm:$0xf]  ;;  %v7887_v24 = vor.u32 %v9741_v7, %v7884_v19  ;;  %v9733_v27 = vld [vmem:[%s11108_s24 + $0x264] sm:$0xf0] }
 0x581   : > { %2719 = vmatpush.bf16.msra.mxu0 %v7935_v30  ;;  %v9666_v30 = vld [vmem:[%s11108_s24 + $0x4c] sm:$0xf0]  ;;  %2706 = vmatpush.bf16.msrb.mxu3 %v7547_v46  ;;  %v7819_v31 = vor.u32 %v9733_v27, %v7818_v26  ;;  %v9716_v46 = vld [vmem:[%s11108_s24 + $0x1dc] sm:$0xf0]  ;;  %v7556_v7 = vld [vmem:[%s11108_s24 + $0x60] sm:$0xf0] }
 0x582   : > { %v7539_v36 = vor.u32 %v9666_v30, %v7538_v29  ;;  %v7815_v30 = vor.u32 %v9724_v9, %v7812_v25  ;;  %v7562_v19 = vld [vmem:[%s11108_s24 + $0x28] sm:$0xf]  ;;  %v7559_v16 = vor.u32 %v9660_v17, %v7556_v7  ;;  %v7564_v25 = vld [vmem:[%s11108_s24 + $0x68] sm:$0xf0]  ;;  %v8018_v27 = vld [vmem:[%s11108_s24 + $0x3b0] sm:$0xf] }
 0x583   : > { %v9727_v17 = vld [vmem:[%s11108_s24 + $0x23c] sm:$0xf] }
 0x584   : > { %2668 = vmatpush.bf16.msrb.mxu1 %v7539_v36  ;;  %2687 = vmatpush.bf16.msrb.mxu2 %v7543_v38  ;;  %v7746_v38 = vld [vmem:[%s11108_s24 + $0x1a0] sm:$0xf]  ;;  %v7836_v7 = vld [vmem:[%s11108_s24 + $0x278] sm:$0xf0] }
 0x585   : > { %2720 = vmatpush.bf16.msra.mxu0 %v7871_v47  ;;  %v7548_v47 = vld [vmem:[%s11108_s24 + $0x58] sm:$0xf0] }
 0x586   : > { %v7551_v50 = vor.u32 %v9659_v41, %v7548_v47  ;;  %v9708_v41 = vld [vmem:[%s11108_s24 + $0x1a4] sm:$0xf] }
 0x587   : > { %v7748_v47 = vld [vmem:[%s11108_s24 + $0x1e0] sm:$0xf0] }
 0x588   : > { %v7751_v52 = vor.u32 %v9708_v41, %v7748_v47  ;;  %v8028_v41 = vld [vmem:[%s11108_s24 + $0x3f8] sm:$0xf0] }
 0x589   : > { %2721 = vmatpush.bf16.msra.mxu0 %v7807_v59  ;;  %v8007_v59 = vor.u32 %v9772_v54, %v8004_v56  ;;  %v7756_v56 = vld [vmem:[%s11108_s24 + $0x1e8] sm:$0xf0] }
 0x58d   : > { %2722 = vmatpush.bf16.msra.mxu0 %v7743_v10  ;;  %v9765_v10 = vld [vmem:[%s11108_s24 + $0x364] sm:$0xf0] }
 0x58e   : > { %v7947_v40 = vor.u32 %v9765_v10, %v7946_v8  ;;  %v9676_v8 = vld [vmem:[%s11108_s24 + $0xa4] sm:$0xf] }
 0x58f   : > { %v7620_v10 = vld [vmem:[%s11108_s24 + $0xe0] sm:$0xf0] }
 0x591   : > { %2723 = vmatpush.bf16.msra.mxu0 %v7679_v20  ;;  %v7879_v20 = vor.u32 %v9740_v45, %v7876_v44  ;;  %v7623_v45 = vor.u32 %v9676_v8, %v7620_v10 }
 0x595   : > { %2724 = vmatpush.bf16.msra.mxu0 %v7615_v32  ;;  %v9725_v32 = vld [vmem:[%s11108_s24 + $0x22c] sm:$0xf] }
 0x599   : > { %2725 = vmatpush.bf16.msra.mxu0 %v7551_v50  ;;  %v7754_v50 = vld [vmem:[%s11108_s24 + $0x1a8] sm:$0xf] }
 0x59a   : > { %v7755_v54 = vor.u32 %v9717_v51, %v7754_v50  ;;  %v9766_v50 = vld [vmem:[%s11108_s24 + $0x36c] sm:$0xf0]  ;;  %v9758_v51 = vld [vmem:[%s11108_s24 + $0x334] sm:$0xf] }
 0x5d9   : > { %v1769_v12 = vpop.f32.mrf.mxu0 }
 0x5da   : > { %v11415_v48 = vadd.f32 %v11401_v22, %v1769_v12  ;;  %v7874_v12 = vld [vmem:[%s11108_s24 + $0x2a0] sm:$0xf] }
 0x5db   : > { %v7875_v15 = vor.u32 %v9748_v13, %v7874_v12  ;;  %v9685_v12 = vld [vmem:[%s11108_s24 + $0xe4] sm:$0xf0]  ;;  %v9677_v13 = vld [vmem:[%s11108_s24 + $0xac] sm:$0xf] }
 0x5dc   : > { %v7627_v44 = vor.u32 %v9685_v12, %v7626_v39  ;;  %v7826_v39 = vld [vmem:[%s11108_s24 + $0x230] sm:$0xf] }
 0x5e1   : > { %v1771_v37 = vpop.f32.mrf.mxu0 }
 0x5e2   : > { %v11418_v18 = vadd.f32 %v11401_v22, %v1771_v37  ;;  %v7823_v37 = vor.u32 %v9725_v32, %v7820_v33  ;;  %v8026_v32 = vld [vmem:[%s11108_s24 + $0x3b8] sm:$0xf] }
 0x5e3   : > { %v9783_v33 = vld [vmem:[%s11108_s24 + $0x3f4] sm:$0xf0] }
 0x5e4   : > { %v11422_v49 = vpack.c.bf16 %v11418_v18, %v11415_v48 }
 0x5e6   : > { %2593 = vmatmul.bf16.vlgmr.msra.gmra.mxu1 %v11422_v49  ;;  %2612 = vmatmul.bf16.vlgmr.msra.gmra.mxu2 %v11422_v49 }
 0x5e7   : > { %2631 = vmatmul.bf16.vlgmr.msra.gmra.mxu3 %v11422_v49  ;;  %2650 = vmatmul.bf16.vlgmr.msrb.gmra.mxu0 %v11422_v49 }
 0x5e8   : > { %2737 = vmatpush.bf16.msra.mxu1 %v8003_v55  ;;  %2756 = vmatpush.bf16.msra.mxu2 %v8007_v59  ;;  %v9709_v55 = vld [vmem:[%s11108_s24 + $0x1ac] sm:$0xf]  ;;  %v9700_v59 = vld [vmem:[%s11108_s24 + $0x15c] sm:$0xf0] }
 0x5e9   : > { %v1774_v4 = vpop.f32.mrf.mxu0  ;;  %2775 = vmatpush.bf16.msra.mxu3 %v8011_v60  ;;  %2794 = vmatpush.bf16.msrb.mxu0 %v8015_v0  ;;  %v7759_v58 = vor.u32 %v9709_v55, %v7756_v56  ;;  %v9692_v60 = vld [vmem:[%s11108_s24 + $0x124] sm:$0xf]  ;;  %v7683_v62 = vor.u32 %v9700_v59, %v7682_v57  ;;  %v7690_v0 = vld [vmem:[%s11108_s24 + $0x128] sm:$0xf]  ;;  %v7962_v56 = vld [vmem:[%s11108_s24 + $0x338] sm:$0xf] }
 0x5ea   : > { %v11461_v34 = vadd.f32 %v11401_v22, %v1774_v4  ;;  %v7687_v63 = vor.u32 %v9692_v60, %v7684_v61  ;;  %v7691_v3 = vor.u32 %v9701_v1, %v7690_v0  ;;  %v7692_v4 = vld [vmem:[%s11108_s24 + $0x168] sm:$0xf0]  ;;  %v9767_v57 = vld [vmem:[%s11108_s24 + $0x374] sm:$0xf0]  ;;  %v7964_v60 = vld [vmem:[%s11108_s24 + $0x378] sm:$0xf0] }
 0x5eb   : > { %v7963_v59 = vor.u32 %v9767_v57, %v7962_v56  ;;  %v7890_v61 = vld [vmem:[%s11108_s24 + $0x2b0] sm:$0xf]  ;;  %v9742_v0 = vld [vmem:[%s11108_s24 + $0x2b4] sm:$0xf]  ;;  %v7642_v57 = vld [vmem:[%s11108_s24 + $0xb8] sm:$0xf] }
 0x5ec   : > { %2738 = vmatpush.bf16.msra.mxu1 %v7939_v5  ;;  %2757 = vmatpush.bf16.msra.mxu2 %v7943_v6  ;;  %v7618_v5 = vld [vmem:[%s11108_s24 + $0xa0] sm:$0xf]  ;;  %v7892_v1 = vld [vmem:[%s11108_s24 + $0x2f0] sm:$0xf0] }
 0x5ed   : > { %2776 = vmatpush.bf16.msra.mxu3 %v7947_v40  ;;  %2795 = vmatpush.bf16.msrb.mxu0 %v7951_v42  ;;  %v9684_v6 = vld [vmem:[%s11108_s24 + $0xdc] sm:$0xf0]  ;;  %v7695_v40 = vor.u32 %v9693_v2, %v7692_v4  ;;  %v7628_v42 = vld [vmem:[%s11108_s24 + $0xe8] sm:$0xf0]  ;;  %v7898_v2 = vld [vmem:[%s11108_s24 + $0x2b8] sm:$0xf]  ;;  %v7895_v8 = vor.u32 %v9742_v0, %v7892_v1 }
 0x5ee   : > { %v7619_v43 = vor.u32 %v9684_v6, %v7618_v5  ;;  %v9751_v4 = vld [vmem:[%s11108_s24 + $0x2f4] sm:$0xf0]  ;;  %v9743_v5 = vld [vmem:[%s11108_s24 + $0x2bc] sm:$0xf]  ;;  %v7636_v56 = vld [vmem:[%s11108_s24 + $0xf0] sm:$0xf0] }
 0x5ef   : > { %v7900_v6 = vld [vmem:[%s11108_s24 + $0x2f8] sm:$0xf0]  ;;  %v7899_v10 = vor.u32 %v9751_v4, %v7898_v2  ;;  %v7570_v1 = vld [vmem:[%s11108_s24 + $0x30] sm:$0xf]  ;;  %v7572_v4 = vld [vmem:[%s11108_s24 + $0x70] sm:$0xf0] }
 0x5f0   : > { %2739 = vmatpush.bf16.msra.mxu1 %v7875_v15  ;;  %2758 = vmatpush.bf16.msra.mxu2 %v7879_v20  ;;  %v9668_v15 = vld [vmem:[%s11108_s24 + $0x5c] sm:$0xf0]  ;;  %v9669_v20 = vld [vmem:[%s11108_s24 + $0x64] sm:$0xf0]  ;;  %v7903_v12 = vor.u32 %v9743_v5, %v7900_v6  ;;  %v9670_v2 = vld [vmem:[%s11108_s24 + $0x6c] sm:$0xf0] }
 0x5f1   : > { %v1776_v29 = vpop.f32.mrf.mxu0  ;;  %2777 = vmatpush.bf16.msra.mxu3 %v7883_v11  ;;  %2796 = vmatpush.bf16.msrb.mxu0 %v7887_v24  ;;  %v7631_v11 = vor.u32 %v9677_v13, %v7628_v42  ;;  %v7555_v21 = vor.u32 %v9668_v15, %v7554_v14  ;;  %v7563_v9 = vor.u32 %v9669_v20, %v7562_v19  ;;  %v9661_v24 = vld [vmem:[%s11108_s24 + $0x2c] sm:$0xf]  ;;  %v7828_v13 = vld [vmem:[%s11108_s24 + $0x270] sm:$0xf0]  ;;  %v7834_v42 = vld [vmem:[%s11108_s24 + $0x238] sm:$0xf] }
 0x5f2   : > { %v11464_v35 = vadd.f32 %v11401_v22, %v1776_v29  ;;  %v7747_v22 = vor.u32 %v9716_v46, %v7746_v38  ;;  %v7567_v26 = vor.u32 %v9661_v24, %v7564_v25  ;;  %v9774_v29 = vld [vmem:[%s11108_s24 + $0x3b4] sm:$0xf]  ;;  %v8027_v38 = vor.u32 %v9783_v33, %v8026_v32  ;;  %v9775_v46 = vld [vmem:[%s11108_s24 + $0x3bc] sm:$0xf]  ;;  %v7762_v20 = vld [vmem:[%s11108_s24 + $0x1b0] sm:$0xf] }
 0x5f3   : > { %v8031_v47 = vor.u32 %v9775_v46, %v8028_v41  ;;  %v7839_v19 = vor.u32 %v9727_v17, %v7836_v7  ;;  %v7770_v24 = vld [vmem:[%s11108_s24 + $0x1b8] sm:$0xf]  ;;  %v9702_v32 = vld [vmem:[%s11108_s24 + $0x16c] sm:$0xf0]  ;;  %v9694_v33 = vld [vmem:[%s11108_s24 + $0x134] sm:$0xf] }
 0x5f4   : > { %v11468_v36 = vpack.c.bf16 %v11464_v35, %v11461_v34  ;;  %2740 = vmatpush.bf16.msra.mxu1 %v7811_v28  ;;  %2759 = vmatpush.bf16.msra.mxu2 %v7815_v30  ;;  %v9782_v28 = vld [vmem:[%s11108_s24 + $0x3ec] sm:$0xf0]  ;;  %v9719_v25 = vld [vmem:[%s11108_s24 + $0x1f4] sm:$0xf0]  ;;  %v9789_v7 = vld [vmem:[%s11110_s11 + $0x28] sm:$0xff] }
 0x5f5   : > { %2778 = vmatpush.bf16.msra.mxu3 %v7819_v31  ;;  %2797 = vmatpush.bf16.msrb.mxu0 %v7823_v37  ;;  %v8019_v30 = vor.u32 %v9782_v28, %v8018_v27  ;;  %v8020_v31 = vld [vmem:[%s11108_s24 + $0x3f0] sm:$0xf0]  ;;  %v7771_v27 = vor.u32 %v9719_v25, %v7770_v24  ;;  %v9711_v28 = vld [vmem:[%s11108_s24 + $0x1bc] sm:$0xf]  ;;  %v7706_v41 = vld [vmem:[%s11108_s24 + $0x138] sm:$0xf] }
 0x5f6   : > { %2598 = vmatmul.bf16.gmra.mxu1 %v11468_v36  ;;  %2617 = vmatmul.bf16.gmra.mxu2 %v11468_v36  ;;  %v8023_v37 = vor.u32 %v9774_v29, %v8020_v31  ;;  %v7772_v29 = vld [vmem:[%s11108_s24 + $0x1f8] sm:$0xf0]  ;;  %v7578_v5 = vld [vmem:[%s11108_s24 + $0x38] sm:$0xf]  ;;  %v9805_v24 = vld [vmem:[%s11110_s11 + $0xa8] sm:$0xff] }
 0x5f7   : > { %2636 = vmatmul.bf16.gmra.mxu3 %v11468_v36  ;;  %2655 = vmatmul.bf16.gmra.mxu0 %v11468_v36  ;;  %v7775_v31 = vor.u32 %v9711_v28, %v7772_v29  ;;  %v9671_v6 = vld [vmem:[%s11108_s24 + $0x74] sm:$0xf0]  ;;  %v9804_v28 = vld [vmem:[%s11110_s11 + $0xa0] sm:$0xff]  ;;  %v9786_v29 = vld [vmem:[%s11110_s11 + $0x10] sm:$0xff] }
 0x5f8   : > { %2741 = vmatpush.bf16.msra.mxu1 %v7747_v22  ;;  %2760 = vmatpush.bf16.msra.mxu2 %v7751_v52  ;;  %v7954_v22 = vld [vmem:[%s11108_s24 + $0x330] sm:$0xf]  ;;  %v7956_v52 = vld [vmem:[%s11108_s24 + $0x370] sm:$0xf0]  ;;  %v9807_v17 = vld [vmem:[%s11110_s11 + $0xb8] sm:$0xff] }
 0x5f9   : > { %2779 = vmatpush.bf16.msra.mxu3 %v7755_v54  ;;  %2798 = vmatpush.bf16.msrb.mxu0 %v7759_v58  ;;  %v7955_v54 = vor.u32 %v9766_v50, %v7954_v22  ;;  %v7959_v55 = vor.u32 %v9758_v51, %v7956_v52  ;;  %v9759_v58 = vld [vmem:[%s11108_s24 + $0x33c] sm:$0xf]  ;;  %v9703_v22 = vld [vmem:[%s11108_s24 + $0x174] sm:$0xf0]  ;;  %v7634_v52 = vld [vmem:[%s11108_s24 + $0xb0] sm:$0xf] }
 0x5fa   : > { %v7707_v50 = vor.u32 %v9703_v22, %v7706_v41  ;;  %v7708_v51 = vld [vmem:[%s11108_s24 + $0x178] sm:$0xf0]  ;;  %v9808_v41 = vld [vmem:[%s11110_s11 + $0xc0] sm:$0xff]  ;;  %v9793_v22 = vld [vmem:[%s11110_s11 + $0x48] sm:$0xff] }
 0x5fb   : > { %v9787_v25 = vld [vmem:[%s11110_s11 + $0x18] sm:$0xff] }
 0x5fc   : > { %2742 = vmatpush.bf16.msra.mxu1 %v7683_v62  ;;  %2761 = vmatpush.bf16.msra.mxu2 %v7687_v63  ;;  %v9750_v62 = vld [vmem:[%s11108_s24 + $0x2ec] sm:$0xf0]  ;;  %v7967_v63 = vor.u32 %v9759_v58, %v7964_v60  ;;  %v9687_v60 = vld [vmem:[%s11108_s24 + $0xf4] sm:$0xf0] }
 0x5fd   : > { %2780 = vmatpush.bf16.msra.mxu3 %v7691_v3  ;;  %2799 = vmatpush.bf16.msrb.mxu0 %v7695_v40  ;;  %v7891_v3 = vor.u32 %v9750_v62, %v7890_v61  ;;  %v9734_v40 = vld [vmem:[%s11108_s24 + $0x26c] sm:$0xf0]  ;;  %v9679_v61 = vld [vmem:[%s11108_s24 + $0xbc] sm:$0xf]  ;;  %v7643_v0 = vor.u32 %v9687_v60, %v7642_v57  ;;  %v9845_v60 = vld [vmem:[%s11110_s11 + $0x1e8] sm:$0xff] }
 0x5fe   : > { %v7644_v62 = vld [vmem:[%s11108_s24 + $0xf8] sm:$0xf0] }
 0x5ff   : > { %v9831_v57 = vld [vmem:[%s11110_s11 + $0x178] sm:$0xff] }
 0x600   : > { %2743 = vmatpush.bf16.msra.mxu1 %v7619_v43  ;;  %2762 = vmatpush.bf16.msra.mxu2 %v7623_v45  ;;  %v9726_v43 = vld [vmem:[%s11108_s24 + $0x234] sm:$0xf]  ;;  %v9735_v45 = vld [vmem:[%s11108_s24 + $0x274] sm:$0xf0] }
 0x601   : > { %2781 = vmatpush.bf16.msra.mxu3 %v7627_v44  ;;  %2800 = vmatpush.bf16.msrb.mxu0 %v7631_v11  ;;  %v7827_v44 = vor.u32 %v9734_v40, %v7826_v39  ;;  %v7831_v14 = vor.u32 %v9726_v43, %v7828_v13  ;;  %v7835_v15 = vor.u32 %v9735_v45, %v7834_v42  ;;  %v9718_v11 = vld [vmem:[%s11108_s24 + $0x1ec] sm:$0xf0]  ;;  %v9663_v43 = vld [vmem:[%s11108_s24 + $0x3c] sm:$0xf] }
 0x602   : > { %v7579_v40 = vor.u32 %v9671_v6, %v7578_v5  ;;  %v9791_v42 = vld [vmem:[%s11110_s11 + $0x38] sm:$0xff] }
 0x603   : > { %v9815_v45 = vld [vmem:[%s11110_s11 + $0xf8] sm:$0xff] }
 0x604   : > { %2744 = vmatpush.bf16.msra.mxu1 %v7555_v21  ;;  %2763 = vmatpush.bf16.msra.mxu2 %v7559_v16  ;;  %v9710_v21 = vld [vmem:[%s11108_s24 + $0x1b4] sm:$0xf]  ;;  %v7763_v16 = vor.u32 %v9718_v11, %v7762_v20  ;;  %v9843_v5 = vld [vmem:[%s11110_s11 + $0x1d8] sm:$0xff] }
 0x605   : > { %2782 = vmatpush.bf16.msra.mxu3 %v7563_v9  ;;  %2801 = vmatpush.bf16.msrb.mxu0 %v7567_v26  ;;  %v7764_v9 = vld [vmem:[%s11108_s24 + $0x1f0] sm:$0xf0] }
 0x606   : > { %2669 = vmatmul.bf16.vlgmr.msrb.gmra.mxu1 %v11422_v49  ;;  %2688 = vmatmul.bf16.vlgmr.msrb.gmra.mxu2 %v11422_v49  ;;  %v7767_v26 = vor.u32 %v9710_v21, %v7764_v9  ;;  %v9798_v20 = vld [vmem:[%s11110_s11 + $0x70] sm:$0xff]  ;;  %v9788_v21 = vld [vmem:[%s11110_s11 + $0x20] sm:$0xff]  ;;  %v9797_v9 = vld [vmem:[%s11110_s11 + $0x68] sm:$0xff] }
 0x607   : > { %2707 = vmatmul.bf16.vlgmr.msrb.gmra.mxu3 %v11422_v49  ;;  %2726 = vmatmul.bf16.vlgmr.msra.gmra.mxu0 %v11422_v49  ;;  %v9806_v11 = vld [vmem:[%s11110_s11 + $0xb0] sm:$0xff] }
 0x608   : > { %2813 = vmatpush.bf16.msrb.mxu1 %v8019_v30  ;;  %2832 = vmatpush.bf16.msrb.mxu2 %v8023_v37  ;;  %v7698_v30 = vld [vmem:[%s11108_s24 + $0x130] sm:$0xf]  ;;  %v7700_v37 = vld [vmem:[%s11108_s24 + $0x170] sm:$0xf0] }
 0x609   : > { %2851 = vmatpush.bf16.msrb.mxu3 %v8027_v38  ;;  %2870 = vmatpush.bf16.msra.mxu0 %v8031_v47  ;;  %v7699_v38 = vor.u32 %v9702_v32, %v7698_v30  ;;  %v7703_v46 = vor.u32 %v9694_v33, %v7700_v37  ;;  %v9695_v47 = vld [vmem:[%s11108_s24 + $0x13c] sm:$0xf]  ;;  %v9810_v30 = vld [vmem:[%s11110_s11 + $0xd0] sm:$0xff]  ;;  %v9785_v33 = vld [vmem:[%s11110_s11 + $0x8] sm:$0xff] }
 0x60a   : > { %v7711_v58 = vor.u32 %v9695_v47, %v7708_v51  ;;  %v9803_v32 = vld [vmem:[%s11110_s11 + $0x98] sm:$0xff]  ;;  %v9809_v37 = vld [vmem:[%s11110_s11 + $0xc8] sm:$0xff] }
 0x60b   : > { %v9801_v47 = vld [vmem:[%s11110_s11 + $0x88] sm:$0xff]  ;;  %v9847_v51 = vld [vmem:[%s11110_s11 + $0x1f8] sm:$0xff] }
 0x60c   : > { %2814 = vmatpush.bf16.msrb.mxu1 %v7955_v54  ;;  %2833 = vmatpush.bf16.msrb.mxu2 %v7959_v55  ;;  %v9686_v54 = vld [vmem:[%s11108_s24 + $0xec] sm:$0xf0]  ;;  %v9678_v55 = vld [vmem:[%s11108_s24 + $0xb4] sm:$0xf] }
 0x60d   : > { %2852 = vmatpush.bf16.msrb.mxu3 %v7963_v59  ;;  %2871 = vmatpush.bf16.msra.mxu0 %v7967_v63  ;;  %v7635_v59 = vor.u32 %v9686_v54, %v7634_v52  ;;  %v7639_v63 = vor.u32 %v9678_v55, %v7636_v56  ;;  %v9792_v52 = vld [vmem:[%s11110_s11 + $0x40] sm:$0xff]  ;;  %v9822_v55 = vld [vmem:[%s11110_s11 + $0x130] sm:$0xff] }
 0x60e   : > { %v9800_v54 = vld [vmem:[%s11110_s11 + $0x80] sm:$0xff]  ;;  %v9846_v56 = vld [vmem:[%s11110_s11 + $0x1f0] sm:$0xff] }
 0x610   : > { %2815 = vmatpush.bf16.msrb.mxu1 %v7891_v3  ;;  %2834 = vmatpush.bf16.msrb.mxu2 %v7895_v8  ;;  %v9662_v3 = vld [vmem:[%s11108_s24 + $0x34] sm:$0xf]  ;;  %v7647_v8 = vor.u32 %v9679_v61, %v7644_v62  ;;  %v9820_v62 = vld [vmem:[%s11110_s11 + $0x120] sm:$0xff] }
 0x611   : > { %2853 = vmatpush.bf16.msrb.mxu3 %v7899_v10  ;;  %2872 = vmatpush.bf16.msra.mxu0 %v7903_v12  ;;  %v7571_v10 = vor.u32 %v9670_v2, %v7570_v1  ;;  %v7575_v39 = vor.u32 %v9662_v3, %v7572_v4  ;;  %v7580_v12 = vld [vmem:[%s11108_s24 + $0x78] sm:$0xf0]  ;;  %v9838_v61 = vld [vmem:[%s11110_s11 + $0x1b0] sm:$0xff]  ;;  %v9829_v1 = vld [vmem:[%s11110_s11 + $0x168] sm:$0xff] }
 0x612   : > { %v7583_v13 = vor.u32 %v9663_v43, %v7580_v12  ;;  %v9837_v2 = vld [vmem:[%s11110_s11 + $0x1a8] sm:$0xff]  ;;  %v9819_v4 = vld [vmem:[%s11110_s11 + $0x118] sm:$0xff]  ;;  %v9818_v43 = vld [vmem:[%s11110_s11 + $0x110] sm:$0xff] }
 0x613   : > { %v9842_v12 = vld [vmem:[%s11110_s11 + $0x1d0] sm:$0xff] }
 0x614   : > { %2816 = vmatpush.bf16.msrb.mxu1 %v7827_v44  ;;  %2835 = vmatpush.bf16.msrb.mxu2 %v7831_v14  ;;  %v9790_v44 = vld [vmem:[%s11110_s11 + $0x30] sm:$0xff] }
 0x615   : > { %2854 = vmatpush.bf16.msrb.mxu3 %v7835_v15  ;;  %2873 = vmatpush.bf16.msra.mxu0 %v7839_v19  ;;  %v9814_v14 = vld [vmem:[%s11110_s11 + $0xf0] sm:$0xff]  ;;  %v9799_v15 = vld [vmem:[%s11110_s11 + $0x78] sm:$0xff]  ;;  %v9813_v19 = vld [vmem:[%s11110_s11 + $0xe8] sm:$0xff] }
 0x616   : > { %2674 = vmatmul.bf16.gmra.mxu1 %v11468_v36  ;;  %2693 = vmatmul.bf16.gmra.mxu2 %v11468_v36 }
 0x617   : > { %2712 = vmatmul.bf16.gmra.mxu3 %v11468_v36  ;;  %2731 = vmatmul.bf16.gmra.mxu0 %v11468_v36 }
 0x618   : > { %2817 = vmatpush.bf16.msrb.mxu1 %v7763_v16  ;;  %2836 = vmatpush.bf16.msrb.mxu2 %v7767_v26  ;;  %v9812_v16 = vld [vmem:[%s11110_s11 + $0xe0] sm:$0xff]  ;;  %v9811_v26 = vld [vmem:[%s11110_s11 + $0xd8] sm:$0xff] }
 0x619   : > { %2855 = vmatpush.bf16.msrb.mxu3 %v7771_v27  ;;  %2874 = vmatpush.bf16.msra.mxu0 %v7775_v31  ;;  %v9796_v27 = vld [vmem:[%s11110_s11 + $0x60] sm:$0xff]  ;;  %v9795_v31 = vld [vmem:[%s11110_s11 + $0x58] sm:$0xff] }
 0x61c   : > { %2818 = vmatpush.bf16.msrb.mxu1 %v7699_v38  ;;  %2837 = vmatpush.bf16.msrb.mxu2 %v7703_v46  ;;  %v9802_v38 = vld [vmem:[%s11110_s11 + $0x90] sm:$0xff]  ;;  %v9784_v46 = vld [vmem:[%s11110_s11] sm:$0xff] }
 0x61d   : > { %2856 = vmatpush.bf16.msrb.mxu3 %v7707_v50  ;;  %2875 = vmatpush.bf16.msra.mxu0 %v7711_v58  ;;  %v9823_v50 = vld [vmem:[%s11110_s11 + $0x138] sm:$0xff] }
 0x61e   : > { %v9839_v58 = vld [vmem:[%s11110_s11 + $0x1b8] sm:$0xff] }
 0x620   : > { %2819 = vmatpush.bf16.msrb.mxu1 %v7635_v59  ;;  %2838 = vmatpush.bf16.msrb.mxu2 %v7639_v63  ;;  %v9821_v59 = vld [vmem:[%s11110_s11 + $0x128] sm:$0xff]  ;;  %v9844_v63 = vld [vmem:[%s11110_s11 + $0x1e0] sm:$0xff] }
 0x621   : > { %2857 = vmatpush.bf16.msrb.mxu3 %v7643_v0  ;;  %2876 = vmatpush.bf16.msra.mxu0 %v7647_v8  ;;  %v11639_v0 = vld [vmem:[%s11106_s27] sm:$0xff] }
 0x622   : > { %v11646_v6 = vperm.slane %v11639_v0, 0 }
 0x624   : > { %2820 = vmatpush.bf16.msrb.mxu1 %v7571_v10  ;;  %2839 = vmatpush.bf16.msrb.mxu2 %v7575_v39  ;;  %v11649_v10 = vperm.slane %v11639_v0, 3  ;;  %v9828_v39 = vld [vmem:[%s11110_s11 + $0x160] sm:$0xff] }
 0x625   : > { %2858 = vmatpush.bf16.msrb.mxu3 %v7579_v40  ;;  %2877 = vmatpush.bf16.msra.mxu0 %v7583_v13  ;;  %v9836_v40 = vld [vmem:[%s11110_s11 + $0x1a0] sm:$0xff] }
 0x626   : > { %2745 = vmatmul.bf16.vlgmr.msra.gmra.mxu1 %v11422_v49  ;;  %2764 = vmatmul.bf16.vlgmr.msra.gmra.mxu2 %v11422_v49 }
 0x627   : > { %2783 = vmatmul.bf16.vlgmr.msra.gmra.mxu3 %v11422_v49  ;;  %2802 = vmatmul.bf16.vlgmr.msrb.gmra.mxu0 %v11422_v49 }
 0x628   : > { %4141 = vmatpush.bf16.msra.mxu1 %v9791_v42  ;;  %4160 = vmatpush.bf16.msra.mxu2 %v9799_v15  ;;  %v11660_v15 = vperm.slane %v11639_v0, 1 }
 0x629   : > { %4198 = vmatpush.bf16.msrb.mxu0 %v9815_v45  ;;  %4179 = vmatpush.bf16.msra.mxu3 %v9807_v17 }
 0x62c   : > { %4142 = vmatpush.bf16.msra.mxu1 %v9790_v44  ;;  %4161 = vmatpush.bf16.msra.mxu2 %v9798_v20  ;;  %v9827_v44 = vld [vmem:[%s11110_s11 + $0x158] sm:$0xff]  ;;  %v9817_v20 = vld [vmem:[%s11110_s11 + $0x108] sm:$0xff] }
 0x62d   : > { %4199 = vmatpush.bf16.msrb.mxu0 %v9814_v14  ;;  %4180 = vmatpush.bf16.msra.mxu3 %v9806_v11  ;;  %v9835_v14 = vld [vmem:[%s11110_s11 + $0x198] sm:$0xff]  ;;  %v9841_v11 = vld [vmem:[%s11110_s11 + $0x1c8] sm:$0xff] }
 0x630   : > { %4143 = vmatpush.bf16.msra.mxu1 %v9789_v7  ;;  %4162 = vmatpush.bf16.msra.mxu2 %v9797_v9  ;;  %v11663_v7 = vperm.slane %v11639_v0, 2 }
 0x631   : > { %4200 = vmatpush.bf16.msrb.mxu0 %v9813_v19  ;;  %4181 = vmatpush.bf16.msra.mxu3 %v9805_v24 }
 0x634   : > { %4144 = vmatpush.bf16.msra.mxu1 %v9788_v21  ;;  %4163 = vmatpush.bf16.msra.mxu2 %v9796_v27  ;;  %v9834_v27 = vld [vmem:[%s11110_s11 + $0x190] sm:$0xff] }
 0x635   : > { %4201 = vmatpush.bf16.msrb.mxu0 %v9812_v16  ;;  %4182 = vmatpush.bf16.msra.mxu3 %v9804_v28 }
 0x636   : > { %2750 = vmatmul.bf16.gmra.mxu1 %v11468_v36  ;;  %2769 = vmatmul.bf16.gmra.mxu2 %v11468_v36 }
 0x637   : > { %2788 = vmatmul.bf16.gmra.mxu3 %v11468_v36  ;;  %2807 = vmatmul.bf16.gmra.mxu0 %v11468_v36 }
 0x638   : > { %4145 = vmatpush.bf16.msra.mxu1 %v9787_v25  ;;  %4164 = vmatpush.bf16.msra.mxu2 %v9795_v31 }
 0x639   : > { %4202 = vmatpush.bf16.msrb.mxu0 %v9811_v26  ;;  %4183 = vmatpush.bf16.msra.mxu3 %v9803_v32  ;;  %v9826_v26 = vld [vmem:[%s11110_s11 + $0x150] sm:$0xff]  ;;  %v9816_v32 = vld [vmem:[%s11110_s11 + $0x100] sm:$0xff] }
 0x63c   : > { %4146 = vmatpush.bf16.msra.mxu1 %v9786_v29 }
 0x63d   : > { %4203 = vmatpush.bf16.msrb.mxu0 %v9810_v30  ;;  %4184 = vmatpush.bf16.msra.mxu3 %v9802_v38 }
 0x640   : > { %4147 = vmatpush.bf16.msra.mxu1 %v9785_v33  ;;  %v9840_v33 = vld [vmem:[%s11110_s11 + $0x1c0] sm:$0xff] }
 0x641   : > { %4204 = vmatpush.bf16.msrb.mxu0 %v9809_v37  ;;  %4185 = vmatpush.bf16.msra.mxu3 %v9801_v47  ;;  %v9825_v47 = vld [vmem:[%s11110_s11 + $0x148] sm:$0xff] }
 0x644   : > { %4148 = vmatpush.bf16.msra.mxu1 %v9784_v46 }
 0x645   : > { %4205 = vmatpush.bf16.msrb.mxu0 %v9808_v41  ;;  %4186 = vmatpush.bf16.msra.mxu3 %v9800_v54 }
 0x646   : > { %2821 = vmatmul.bf16.vlgmr.msrb.gmra.mxu1 %v11422_v49  ;;  %2840 = vmatmul.bf16.vlgmr.msrb.gmra.mxu2 %v11422_v49 }
 0x647   : > { %2859 = vmatmul.bf16.vlgmr.msrb.gmra.mxu3 %v11422_v49  ;;  %2878 = vmatmul.bf16.vlgmr.msra.gmra.mxu0 %v11422_v49  ;;  %v9794_v49 = vld [vmem:[%s11110_s11 + $0x50] sm:$0xff] }
 0x648   : > { %4165 = vmatpush.bf16.msra.mxu2 %v9794_v49  ;;  %4217 = vmatpush.bf16.msrb.mxu1 %v9823_v50  ;;  %v9833_v50 = vld [vmem:[%s11110_s11 + $0x188] sm:$0xff] }
 0x649   : > { %4274 = vmatpush.bf16.msra.mxu0 %v9847_v51  ;;  %4255 = vmatpush.bf16.msrb.mxu3 %v9839_v58 }
 0x64c   : > { %4166 = vmatpush.bf16.msra.mxu2 %v9793_v22  ;;  %4218 = vmatpush.bf16.msrb.mxu1 %v9822_v55 }
 0x64d   : > { %4275 = vmatpush.bf16.msra.mxu0 %v9846_v56  ;;  %4256 = vmatpush.bf16.msrb.mxu3 %v9838_v61 }
 0x650   : > { %4167 = vmatpush.bf16.msra.mxu2 %v9792_v52  ;;  %4219 = vmatpush.bf16.msrb.mxu1 %v9821_v59  ;;  %v9855_v59 = vld [vmem:[%s11110_s11 + $0x238] sm:$0xff] }
 0x651   : > { %4276 = vmatpush.bf16.msra.mxu0 %v9845_v60  ;;  %4257 = vmatpush.bf16.msrb.mxu3 %v9837_v2  ;;  %v9879_v60 = vld [vmem:[%s11110_s11 + $0x2f8] sm:$0xff] }
 0x654   : > { %4236 = vmatpush.bf16.msrb.mxu2 %v9831_v57  ;;  %4220 = vmatpush.bf16.msrb.mxu1 %v9820_v62 }
 0x655   : > { %4277 = vmatpush.bf16.msra.mxu0 %v9844_v63  ;;  %4258 = vmatpush.bf16.msrb.mxu3 %v9836_v40  ;;  %v9824_v63 = vld [vmem:[%s11110_s11 + $0x140] sm:$0xff]  ;;  %v9878_v40 = vld [vmem:[%s11110_s11 + $0x2f0] sm:$0xff] }
 0x656   : > { %2826 = vmatmul.bf16.gmra.mxu1 %v11468_v36  ;;  %2845 = vmatmul.bf16.gmra.mxu2 %v11468_v36 }
 0x657   : > { %2864 = vmatmul.bf16.gmra.mxu3 %v11468_v36  ;;  %2883 = vmatmul.bf16.gmra.mxu0 %v11468_v36  ;;  %v9830_v36 = vld [vmem:[%s11110_s11 + $0x170] sm:$0xff] }
 0x658   : > { %4237 = vmatpush.bf16.msrb.mxu2 %v9830_v36  ;;  %4221 = vmatpush.bf16.msrb.mxu1 %v9819_v4 }
 0x659   : > { %4278 = vmatpush.bf16.msra.mxu0 %v9843_v5  ;;  %4259 = vmatpush.bf16.msrb.mxu3 %v9835_v14 }
 0x65c   : > { %4238 = vmatpush.bf16.msrb.mxu2 %v9829_v1  ;;  %4222 = vmatpush.bf16.msrb.mxu1 %v9818_v43  ;;  %v9832_v1 = vld [vmem:[%s11110_s11 + $0x180] sm:$0xff] }
 0x65d   : > { %4279 = vmatpush.bf16.msra.mxu0 %v9842_v12  ;;  %4260 = vmatpush.bf16.msrb.mxu3 %v9834_v27 }
 0x660   : > { %4239 = vmatpush.bf16.msrb.mxu2 %v9828_v39  ;;  %4223 = vmatpush.bf16.msrb.mxu1 %v9817_v20  ;;  %v9854_v39 = vld [vmem:[%s11110_s11 + $0x230] sm:$0xff]  ;;  %v9877_v20 = vld [vmem:[%s11110_s11 + $0x2e8] sm:$0xff] }
 0x661   : > { %4280 = vmatpush.bf16.msra.mxu0 %v9841_v11  ;;  %4261 = vmatpush.bf16.msrb.mxu3 %v9833_v50 }
 0x663   : > { %v2594_v3 = vpop.f32.mrf.mxu1 }
 0x664   : > { %v2651_v8 = vpop.f32.mrf.mxu0  ;;  %v2595_v13 = vadd.f32 %v2594_v3, %v11646_v6  ;;  %4240 = vmatpush.bf16.msrb.mxu2 %v9827_v44  ;;  %4224 = vmatpush.bf16.msrb.mxu1 %v9816_v32  ;;  %v9871_v44 = vld [vmem:[%s11110_s11 + $0x2b8] sm:$0xff] }
 0x665   : > { %v2652_v42 = vadd.f32 %v2651_v8, %v11649_v10  ;;  %4281 = vmatpush.bf16.msra.mxu0 %v9840_v33  ;;  %4262 = vmatpush.bf16.msrb.mxu3 %v9832_v1 }
 0x666   : > { %v2953_v21 = vmul.f32 0.01, %v2595_v13  ;;  %vm2889_vm2 = vcmp.ge.f32.partialorder %v2595_v13, 0.0 }
 0x667   : > { %v2956_v24 = vmul.f32 0.01, %v2652_v42  ;;  %vm2892_vm3 = vcmp.ge.f32.partialorder %v2652_v42, 0.0 }
 0x668   : > { %4241 = vmatpush.bf16.msrb.mxu2 %v9826_v26  ;;  %v3017_v37 = vsel %vm2889_vm2, %v2595_v13, %v2953_v21  ;;  %v9870_v26 = vld [vmem:[%s11110_s11 + $0x2b0] sm:$0xff] }
 0x669   : > { %v2613_v45 = vpop.f32.mrf.mxu2  ;;  %v3020_v38 = vsel %vm2892_vm3, %v2652_v42, %v2956_v24 }
 0x66a   : > { %v2632_v17 = vpop.f32.mrf.mxu3  ;;  %v2614_v28 = vadd.f32 %v2613_v45, %v11660_v15  ;;  %v9863_v45 = vld [vmem:[%s11110_s11 + $0x278] sm:$0xff] }
 0x66b   : > { %v2596_v19 = vpop.f32.mrf.mxu1  ;;  %v2633_v30 = vadd.f32 %v2632_v17, %v11663_v7 }
 0x66c   : > { %v2597_v16 = vadd.f32 %v2596_v19, %v11646_v6  ;;  %v2653_v9 = vpop.f32.mrf.mxu0  ;;  %v2954_v51 = vmul.f32 0.01, %v2614_v28  ;;  %vm2890_vm6 = vcmp.ge.f32.partialorder %v2614_v28, 0.0  ;;  %4242 = vmatpush.bf16.msrb.mxu2 %v9825_v47  ;;  %v9853_v19 = vld [vmem:[%s11110_s11 + $0x228] sm:$0xff] }
 0x66d   : > { %v2654_v25 = vadd.f32 %v2653_v9, %v11649_v10  ;;  %v2955_v56 = vmul.f32 0.01, %v2633_v30  ;;  %vm2891_vm7 = vcmp.ge.f32.partialorder %v2633_v30, 0.0 }
 0x66e   : > { %vm2905_vm4 = vcmp.ge.f32.partialorder %v2597_v16, 0.0  ;;  %v2969_v29 = vmul.f32 0.01, %v2597_v16  ;;  %v3018_v2 = vsel %vm2890_vm6, %v2614_v28, %v2954_v51 }
 0x66f   : > { %vm2908_vm5 = vcmp.ge.f32.partialorder %v2654_v25, 0.0  ;;  %v2972_v31 = vmul.f32 0.01, %v2654_v25  ;;  %v3019_v4 = vsel %vm2891_vm7, %v2633_v30, %v2955_v56  ;;  %v9876_v30 = vld [vmem:[%s11110_s11 + $0x2e0] sm:$0xff]  ;;  %v9851_v56 = vld [vmem:[%s11110_s11 + $0x218] sm:$0xff] }
 0x670   : > { %v3033_v49 = vsel %vm2905_vm4, %v2597_v16, %v2969_v29  ;;  %4243 = vmatpush.bf16.msrb.mxu2 %v9824_v63 }
 0x671   : > { %v3081_v46 = vpack.c.bf16 %v3033_v49, %v3017_v37  ;;  %v3036_v41 = vsel %vm2908_vm5, %v2654_v25, %v2972_v31  ;;  %v2615_v22 = vpop.f32.mrf.mxu2  ;;  %v9862_v25 = vld [vmem:[%s11110_s11 + $0x270] sm:$0xff] }
 0x672   : > { %v3084_v52 = vpack.c.bf16 %v3036_v41, %v3020_v38  ;;  %v2616_v54 = vadd.f32 %v2615_v22, %v11660_v15  ;;  %v2634_v55 = vpop.f32.mrf.mxu3  ;;  %v9869_v41 = vld [vmem:[%s11110_s11 + $0x2a8] sm:$0xff] }
 0x673   : > { %v2635_v57 = vadd.f32 %v2634_v55, %v11663_v7  ;;  %v2599_v58 = vpop.f32.mrf.mxu1  ;;  %4149 = vmatmul.bf16.vlgmr.msra.gmra.mxu1 %v3081_v46  ;;  %v9861_v46 = vld [vmem:[%s11110_s11 + $0x268] sm:$0xff] }
 0x674   : > { %vm2906_vm8 = vcmp.ge.f32.partialorder %v2616_v54, 0.0  ;;  %v2970_v36 = vmul.f32 0.01, %v2616_v54  ;;  %v2656_v61 = vpop.f32.mrf.mxu0  ;;  %4206 = vmatmul.bf16.vlgmr.msrb.gmra.mxu0 %v3084_v52  ;;  %4293 = vmatpush.bf16.msra.mxu1 %v9855_v59  ;;  %v2600_v12 = vadd.f32 %v2599_v58, %v11646_v6  ;;  %v11709_v59 = vperm.slane %v11639_v0, 4 }
 0x675   : > { %vm2907_vm9 = vcmp.ge.f32.partialorder %v2635_v57, 0.0  ;;  %v2971_v62 = vmul.f32 0.01, %v2635_v57  ;;  %4350 = vmatpush.bf16.msrb.mxu0 %v9879_v60  ;;  %v2657_v13 = vadd.f32 %v2656_v61, %v11649_v10  ;;  %v9868_v61 = vld [vmem:[%s11110_s11 + $0x2a0] sm:$0xff] }
 0x676   : > { %v3034_v3 = vsel %vm2906_vm8, %v2616_v54, %v2970_v36  ;;  %v2985_v11 = vmul.f32 0.01, %v2600_v12  ;;  %vm2921_vm10 = vcmp.ge.f32.partialorder %v2600_v12, 0.0  ;;  %v9860_v36 = vld [vmem:[%s11110_s11 + $0x260] sm:$0xff] }
 0x677   : > { %v3082_v5 = vpack.c.bf16 %v3034_v3, %v3018_v2  ;;  %v3035_v8 = vsel %vm2907_vm9, %v2635_v57, %v2971_v62  ;;  %v2988_v9 = vmul.f32 0.01, %v2657_v13  ;;  %vm2924_vm12 = vcmp.ge.f32.partialorder %v2657_v13, 0.0  ;;  %v9875_v57 = vld [vmem:[%s11110_s11 + $0x2d8] sm:$0xff] }
 0x678   : > { %v3083_v43 = vpack.c.bf16 %v3035_v8, %v3019_v4  ;;  %4294 = vmatpush.bf16.msra.mxu1 %v9854_v39  ;;  %v3049_v31 = vsel %vm2921_vm10, %v2600_v12, %v2985_v11  ;;  %v9850_v4 = vld [vmem:[%s11110_s11 + $0x210] sm:$0xff]  ;;  %v9859_v12 = vld [vmem:[%s11110_s11 + $0x258] sm:$0xff] }
 0x679   : > { %v2618_v42 = vpop.f32.mrf.mxu2  ;;  %4168 = vmatmul.bf16.vlgmr.msra.gmra.mxu2 %v3082_v5  ;;  %4351 = vmatpush.bf16.msrb.mxu0 %v9878_v40  ;;  %v3052_v49 = vsel %vm2924_vm12, %v2657_v13, %v2988_v9  ;;  %v9874_v5 = vld [vmem:[%s11110_s11 + $0x2d0] sm:$0xff]  ;;  %v9867_v13 = vld [vmem:[%s11110_s11 + $0x298] sm:$0xff] }
 0x67a   : > { %v2637_v14 = vpop.f32.mrf.mxu3  ;;  %4187 = vmatmul.bf16.vlgmr.msra.gmra.mxu3 %v3083_v43  ;;  %4312 = vmatpush.bf16.msra.mxu2 %v9863_v45  ;;  %v2619_v27 = vadd.f32 %v2618_v42, %v11660_v15  ;;  %v11724_v42 = vperm.slane %v11639_v0, 5 }
 0x67b   : > { %v2601_v17 = vpop.f32.mrf.mxu1  ;;  %4331 = vmatpush.bf16.msra.mxu3 %v9871_v44  ;;  %v11727_v44 = vperm.slane %v11639_v0, 6 }
 0x67c   : > { %v2602_v21 = vadd.f32 %v2601_v17, %v11646_v6  ;;  %v2658_v16 = vpop.f32.mrf.mxu0  ;;  %4295 = vmatpush.bf16.msra.mxu1 %v9853_v19  ;;  %v2638_v6 = vadd.f32 %v2637_v14, %v11663_v7  ;;  %v2986_v22 = vmul.f32 0.01, %v2619_v27  ;;  %vm2922_vm14 = vcmp.ge.f32.partialorder %v2619_v27, 0.0  ;;  %v9849_v17 = vld [vmem:[%s11110_s11 + $0x208] sm:$0xff] }
 0x67d   : > { %v2659_v24 = vadd.f32 %v2658_v16, %v11649_v10  ;;  %4352 = vmatpush.bf16.msrb.mxu0 %v9877_v20  ;;  %v9852_v10 = vld [vmem:[%s11110_s11 + $0x220] sm:$0xff]  ;;  %v9873_v19 = vld [vmem:[%s11110_s11 + $0x2c8] sm:$0xff] }
 0x67e   : > { %v3001_v28 = vmul.f32 0.01, %v2602_v21  ;;  %vm2937_vm11 = vcmp.ge.f32.partialorder %v2602_v21, 0.0  ;;  %4313 = vmatpush.bf16.msra.mxu2 %v9862_v25  ;;  %v2987_v52 = vmul.f32 0.01, %v2638_v6  ;;  %vm2923_vm0 = vcmp.ge.f32.partialorder %v2638_v6, 0.0 }
 0x67f   : > { %v3004_v29 = vmul.f32 0.01, %v2659_v24  ;;  %vm2940_vm13 = vcmp.ge.f32.partialorder %v2659_v24, 0.0  ;;  %4332 = vmatpush.bf16.msra.mxu3 %v9870_v26  ;;  %v3050_v62 = vsel %vm2922_vm14, %v2619_v27, %v2986_v22  ;;  %v9866_v25 = vld [vmem:[%s11110_s11 + $0x290] sm:$0xff] }
 0x680   : > { %v3065_v32 = vsel %vm2937_vm11, %v2602_v21, %v3001_v28  ;;  %4296 = vmatpush.bf16.msra.mxu1 %v9852_v10  ;;  %v3051_v2 = vsel %vm2923_vm0, %v2638_v6, %v2987_v52  ;;  %v9848_v6 = vld [vmem:[%s11110_s11 + $0x200] sm:$0xff] }
 0x681   : > { %v2620_v33 = vpop.f32.mrf.mxu2  ;;  %v3097_v37 = vpack.c.bf16 %v3065_v32, %v3049_v31  ;;  %v3068_v38 = vsel %vm2940_vm13, %v2659_v24, %v3004_v29  ;;  %4353 = vmatpush.bf16.msrb.mxu0 %v9876_v30  ;;  %v9858_v24 = vld [vmem:[%s11110_s11 + $0x250] sm:$0xff]  ;;  %v9872_v29 = vld [vmem:[%s11110_s11 + $0x2c0] sm:$0xff] }
 0x682   : > { %v2621_v47 = vadd.f32 %v2620_v33, %v11660_v15  ;;  %v2639_v50 = vpop.f32.mrf.mxu3  ;;  %v3100_v51 = vpack.c.bf16 %v3068_v38, %v3052_v49  ;;  %4314 = vmatpush.bf16.msra.mxu2 %v9861_v46  ;;  %v9857_v49 = vld [vmem:[%s11110_s11 + $0x248] sm:$0xff] }
 0x683   : > { %v2640_v54 = vadd.f32 %v2639_v50, %v11663_v7  ;;  %v2670_v55 = vpop.f32.mrf.mxu1  ;;  %4154 = vmatmul.bf16.gmra.mxu1 %v3097_v37  ;;  %4333 = vmatpush.bf16.msra.mxu3 %v9869_v41  ;;  %v11712_v7 = vperm.slane %v11639_v0, 7  ;;  %v9865_v38 = vld [vmem:[%s11110_s11 + $0x288] sm:$0xff] }
 0x684   : > { %v3002_v58 = vmul.f32 0.01, %v2621_v47  ;;  %v2727_v60 = vpop.f32.mrf.mxu0  ;;  %4211 = vmatmul.bf16.gmra.mxu0 %v3100_v51  ;;  %vm2938_vm15 = vcmp.ge.f32.partialorder %v2621_v47, 0.0  ;;  %4297 = vmatpush.bf16.msra.mxu1 %v9851_v56  ;;  %v2671_v8 = vadd.f32 %v2670_v55, %v11709_v59  ;;  %v11746_v55 = vld [vmem:[%s11110_s11 + $0x3f8] sm:$0xff] }
 0x685   : > { %v3003_v15 = vmul.f32 0.01, %v2640_v54  ;;  %vm2939_vm1 = vcmp.ge.f32.partialorder %v2640_v54, 0.0  ;;  %4354 = vmatpush.bf16.msrb.mxu0 %v9875_v57  ;;  %v2728_v40 = vadd.f32 %v2727_v60, %v11712_v7  ;;  %v9856_v60 = vld [vmem:[%s11110_s11 + $0x240] sm:$0xff] }
 0x686   : > { %v3066_v63 = vsel %vm2938_vm15, %v2621_v47, %v3002_v58  ;;  %4315 = vmatpush.bf16.msra.mxu2 %v9860_v36  ;;  %v2957_v20 = vmul.f32 0.01, %v2671_v8  ;;  %vm2893_vm2 = vcmp.ge.f32.partialorder %v2671_v8, 0.0 }
 0x687   : > { %v3098_v1 = vpack.c.bf16 %v3066_v63, %v3050_v62  ;;  %v3067_v3 = vsel %vm2939_vm1, %v2640_v54, %v3003_v15  ;;  %4334 = vmatpush.bf16.msra.mxu3 %v9868_v61  ;;  %v2960_v16 = vmul.f32 0.01, %v2728_v40  ;;  %vm2896_vm3 = vcmp.ge.f32.partialorder %v2728_v40, 0.0  ;;  %v9887_v54 = vld [vmem:[%s11110_s11 + $0x338] sm:$0xff]  ;;  %v9864_v15 = vld [vmem:[%s11110_s11 + $0x280] sm:$0xff] }
 0x688   : > { %v3099_v39 = vpack.c.bf16 %v3067_v3, %v3051_v2  ;;  %4298 = vmatpush.bf16.msra.mxu1 %v9850_v4  ;;  %v3021_v10 = vsel %vm2893_vm2, %v2671_v8, %v2957_v20  ;;  %v9886_v2 = vld [vmem:[%s11110_s11 + $0x330] sm:$0xff] }
 0x689   : > { %v2689_v43 = vpop.f32.mrf.mxu2  ;;  %4173 = vmatmul.bf16.gmra.mxu2 %v3098_v1  ;;  %4355 = vmatpush.bf16.msrb.mxu0 %v9874_v5  ;;  %v3024_v31 = vsel %vm2896_vm3, %v2728_v40, %v2960_v16  ;;  %v11754_v3 = vld [vmem:[%s11110_s11 + $0x3f0] sm:$0xff]  ;;  %v9895_v40 = vld [vmem:[%s11110_s11 + $0x378] sm:$0xff] }
 0x68a   : > { %v2708_v45 = vpop.f32.mrf.mxu3  ;;  %4192 = vmatmul.bf16.gmra.mxu3 %v3099_v39  ;;  %4316 = vmatpush.bf16.msra.mxu2 %v9859_v12  ;;  %v2690_v0 = vadd.f32 %v2689_v43, %v11724_v42  ;;  %v9903_v43 = vld [vmem:[%s11110_s11 + $0x3b8] sm:$0xff]  ;;  %v9894_v16 = vld [vmem:[%s11110_s11 + $0x370] sm:$0xff] }
 0x68b   : > { %v2672_v14 = vpop.f32.mrf.mxu1  ;;  %4335 = vmatpush.bf16.msra.mxu3 %v9867_v13  ;;  %v2709_v27 = vadd.f32 %v2708_v45, %v11727_v44  ;;  %v9885_v45 = vld [vmem:[%s11110_s11 + $0x328] sm:$0xff] }
 0x68c   : > { %v2673_v11 = vadd.f32 %v2672_v14, %v11709_v59  ;;  %v2729_v21 = vpop.f32.mrf.mxu0  ;;  %4299 = vmatpush.bf16.msra.mxu1 %v9849_v17  ;;  %v2958_v46 = vmul.f32 0.01, %v2690_v0  ;;  %vm2894_vm6 = vcmp.ge.f32.partialorder %v2690_v0, 0.0  ;;  %v11763_v14 = vld [vmem:[%s11110_s11 + $0x3e8] sm:$0xff] }
 0x68d   : > { %v2730_v9 = vadd.f32 %v2729_v21, %v11712_v7  ;;  %4356 = vmatpush.bf16.msrb.mxu0 %v9873_v19  ;;  %v2959_v50 = vmul.f32 0.01, %v2709_v27  ;;  %vm2895_vm7 = vcmp.ge.f32.partialorder %v2709_v27, 0.0 }
 0x68e   : > { %vm2909_vm4 = vcmp.ge.f32.partialorder %v2673_v11, 0.0  ;;  %v2973_v26 = vmul.f32 0.01, %v2673_v11  ;;  %4317 = vmatpush.bf16.msra.mxu2 %v9858_v24  ;;  %v3022_v36 = vsel %vm2894_vm6, %v2690_v0, %v2958_v46 }
 0x68f   : > { %vm2912_vm5 = vcmp.ge.f32.partialorder %v2730_v9, 0.0  ;;  %v2976_v28 = vmul.f32 0.01, %v2730_v9  ;;  %4336 = vmatpush.bf16.msra.mxu3 %v9866_v25  ;;  %v3023_v62 = vsel %vm2895_vm7, %v2709_v27, %v2959_v50  ;;  %v9883_v50 = vld [vmem:[%s11110_s11 + $0x318] sm:$0xff] }
 0x690   : > { %v3037_v30 = vsel %vm2909_vm4, %v2673_v11, %v2973_v26  ;;  %4300 = vmatpush.bf16.msra.mxu1 %v9848_v6  ;;  %v11774_v26 = vld [vmem:[%s11110_s11 + $0x3e0] sm:$0xff] }
 0x691   : > { %v3085_v32 = vpack.c.bf16 %v3037_v30, %v3021_v10  ;;  %v3040_v33 = vsel %vm2912_vm5, %v2730_v9, %v2976_v28  ;;  %v2691_v37 = vpop.f32.mrf.mxu2  ;;  %4357 = vmatpush.bf16.msrb.mxu0 %v9872_v29  ;;  %v9902_v9 = vld [vmem:[%s11110_s11 + $0x3b0] sm:$0xff]  ;;  %v11778_v29 = vld [vmem:[%s11106_s27 + $0x8] sm:$0xff] }
 0x692   : > { %v3088_v41 = vpack.c.bf16 %v3040_v33, %v3024_v31  ;;  %v2692_v22 = vadd.f32 %v2691_v37, %v11724_v42  ;;  %v2710_v47 = vpop.f32.mrf.mxu3  ;;  %4318 = vmatpush.bf16.msra.mxu2 %v9857_v49  ;;  %v9901_v33 = vld [vmem:[%s11110_s11 + $0x3a8] sm:$0xff] }
 0x693   : > { %v2711_v51 = vadd.f32 %v2710_v47, %v11727_v44  ;;  %v2675_v52 = vpop.f32.mrf.mxu1  ;;  %4225 = vmatmul.bf16.vlgmr.msrb.gmra.mxu1 %v3085_v32  ;;  %4337 = vmatpush.bf16.msra.mxu3 %v9865_v38  ;;  %v9893_v32 = vld [vmem:[%s11110_s11 + $0x368] sm:$0xff] }
 0x694   : > { %vm2910_vm8 = vcmp.ge.f32.partialorder %v2692_v22, 0.0  ;;  %v2974_v56 = vmul.f32 0.01, %v2692_v22  ;;  %v2732_v57 = vpop.f32.mrf.mxu0  ;;  %4282 = vmatmul.bf16.vlgmr.msra.gmra.mxu0 %v3088_v41  ;;  %4369 = vmatpush.bf16.msrb.mxu1 %v9887_v54  ;;  %v2676_v5 = vadd.f32 %v2675_v52, %v11709_v59  ;;  %v11791_v54 = vperm.slane %v11778_v29, 0 }
 0x695   : > { %vm2911_vm9 = vcmp.ge.f32.partialorder %v2711_v51, 0.0  ;;  %v2975_v58 = vmul.f32 0.01, %v2711_v51  ;;  %4426 = vmatpush.bf16.msra.mxu0 %v11746_v55  ;;  %v2733_v8 = vadd.f32 %v2732_v57, %v11712_v7  ;;  %v9892_v57 = vld [vmem:[%s11110_s11 + $0x360] sm:$0xff] }
 0x696   : > { %v3038_v61 = vsel %vm2910_vm8, %v2692_v22, %v2974_v56  ;;  %4319 = vmatpush.bf16.msra.mxu2 %v9856_v60  ;;  %v2989_v17 = vmul.f32 0.01, %v2676_v5  ;;  %vm2925_vm10 = vcmp.ge.f32.partialorder %v2676_v5, 0.0  ;;  %v11794_v56 = vperm.slane %v11778_v29, 3 }
 0x697   : > { %v3086_v63 = vpack.c.bf16 %v3038_v61, %v3022_v36  ;;  %v3039_v1 = vsel %vm2911_vm9, %v2711_v51, %v2975_v58  ;;  %4338 = vmatpush.bf16.msra.mxu3 %v9864_v15  ;;  %v2992_v11 = vmul.f32 0.01, %v2733_v8  ;;  %vm2928_vm11 = vcmp.ge.f32.partialorder %v2733_v8, 0.0  ;;  %v11788_v51 = vld [vmem:[%s11110_s11 + $0x3d8] sm:$0xff]  ;;  %v9900_v58 = vld [vmem:[%s11110_s11 + $0x3a0] sm:$0xff] }
 0x698   : > { %v3087_v4 = vpack.c.bf16 %v3039_v1, %v3023_v62  ;;  %4370 = vmatpush.bf16.msrb.mxu1 %v9886_v2  ;;  %v3053_v27 = vsel %vm2925_vm10, %v2676_v5, %v2989_v17  ;;  %v11802_v1 = vld [vmem:[%s11110_s11 + $0x3d0] sm:$0xff]  ;;  %v9881_v17 = vld [vmem:[%s11110_s11 + $0x308] sm:$0xff] }
 0x699   : > { %v2694_v39 = vpop.f32.mrf.mxu2  ;;  %4244 = vmatmul.bf16.vlgmr.msrb.gmra.mxu2 %v3086_v63  ;;  %4427 = vmatpush.bf16.msra.mxu0 %v11754_v3  ;;  %v3056_v30 = vsel %vm2928_vm11, %v2733_v8, %v2992_v11  ;;  %v9882_v63 = vld [vmem:[%s11110_s11 + $0x310] sm:$0xff] }
 0x69a   : > { %v2713_v12 = vpop.f32.mrf.mxu3  ;;  %4263 = vmatmul.bf16.vlgmr.msrb.gmra.mxu3 %v3087_v4  ;;  %4388 = vmatpush.bf16.msrb.mxu2 %v9895_v40  ;;  %v2695_v24 = vadd.f32 %v2694_v39, %v11724_v42  ;;  %v9891_v39 = vld [vmem:[%s11110_s11 + $0x358] sm:$0xff] }
 0x69b   : > { %v2677_v13 = vpop.f32.mrf.mxu1  ;;  %4407 = vmatpush.bf16.msrb.mxu3 %v9903_v43  ;;  %v9899_v40 = vld [vmem:[%s11110_s11 + $0x398] sm:$0xff]  ;;  %v11809_v43 = vperm.slane %v11778_v29, 1 }
 0x69c   : > { %v2678_v19 = vadd.f32 %v2677_v13, %v11709_v59  ;;  %v2734_v20 = vpop.f32.mrf.mxu0  ;;  %4371 = vmatpush.bf16.msrb.mxu1 %v9885_v45  ;;  %v2714_v59 = vadd.f32 %v2713_v12, %v11727_v44  ;;  %v2990_v37 = vmul.f32 0.01, %v2695_v24  ;;  %vm2926_vm14 = vcmp.ge.f32.partialorder %v2695_v24, 0.0 }
 0x69d   : > { %v2735_v21 = vadd.f32 %v2734_v20, %v11712_v7  ;;  %4428 = vmatpush.bf16.msra.mxu0 %v11763_v14  ;;  %v9884_v7 = vld [vmem:[%s11110_s11 + $0x320] sm:$0xff]  ;;  %v11813_v13 = vperm.slane %v11778_v29, 2 }
 0x69e   : > { %v3005_v25 = vmul.f32 0.01, %v2678_v19  ;;  %vm2941_vm12 = vcmp.ge.f32.partialorder %v2678_v19, 0.0  ;;  %4389 = vmatpush.bf16.msrb.mxu2 %v9894_v16  ;;  %v2991_v41 = vmul.f32 0.01, %v2714_v59  ;;  %vm2927_vm0 = vcmp.ge.f32.partialorder %v2714_v59, 0.0 }
 0x69f   : > { %vm2944_vm13 = vcmp.ge.f32.partialorder %v2735_v21, 0.0  ;;  %v3008_v0 = vmul.f32 0.01, %v2735_v21  ;;  %4408 = vmatpush.bf16.msrb.mxu3 %v9902_v9  ;;  %v3054_v60 = vsel %vm2926_vm14, %v2695_v24, %v2990_v37  ;;  %v9890_v24 = vld [vmem:[%s11110_s11 + $0x350] sm:$0xff] }
 0x6a0   : > { %v3069_v28 = vsel %vm2941_vm12, %v2678_v19, %v3005_v25  ;;  %4372 = vmatpush.bf16.msrb.mxu1 %v9884_v7  ;;  %v3055_v61 = vsel %vm2927_vm0, %v2714_v59, %v2991_v41  ;;  %v11817_v19 = vld [vmem:[%s11110_s11 + $0x3c8] sm:$0xff]  ;;  %v9898_v25 = vld [vmem:[%s11110_s11 + $0x390] sm:$0xff] }
 0x6a1   : > { %v2696_v6 = vpop.f32.mrf.mxu2  ;;  %v3101_v10 = vpack.c.bf16 %v3069_v28, %v3053_v27  ;;  %v3072_v31 = vsel %vm2944_vm13, %v2735_v21, %v3008_v0  ;;  %4429 = vmatpush.bf16.msra.mxu0 %v11774_v26  ;;  %v9880_v28 = vld [vmem:[%s11110_s11 + $0x300] sm:$0xff] }
 0x6a2   : > { %v2697_v49 = vadd.f32 %v2696_v6, %v11724_v42  ;;  %v2715_v38 = vpop.f32.mrf.mxu3  ;;  %v3104_v46 = vpack.c.bf16 %v3072_v31, %v3056_v30  ;;  %4390 = vmatpush.bf16.msrb.mxu2 %v9893_v32  ;;  %v11828_v6 = vld [vmem:[%s11110_s11 + $0x3c0] sm:$0xff] }
 0x6a3   : > { %v2716_v22 = vadd.f32 %v2715_v38, %v11727_v44  ;;  %v2746_v47 = vpop.f32.mrf.mxu1  ;;  %4230 = vmatmul.bf16.gmra.mxu1 %v3101_v10  ;;  %4409 = vmatpush.bf16.msrb.mxu3 %v9901_v33  ;;  %v9897_v38 = vld [vmem:[%s11110_s11 + $0x388] sm:$0xff] }
 0x6a4   : > { %v3006_v52 = vmul.f32 0.01, %v2697_v49  ;;  %v2803_v42 = vpop.f32.mrf.mxu0  ;;  %4287 = vmatmul.bf16.gmra.mxu0 %v3104_v46  ;;  %vm2942_vm15 = vcmp.ge.f32.partialorder %v2697_v49, 0.0  ;;  %4373 = vmatpush.bf16.msrb.mxu1 %v9883_v50  ;;  %v2747_v2 = vadd.f32 %v2746_v47, %v11791_v54 }
 0x6a5   : > { %v3007_v44 = vmul.f32 0.01, %v2716_v22  ;;  %vm2943_vm1 = vcmp.ge.f32.partialorder %v2716_v22, 0.0  ;;  %4430 = vmatpush.bf16.msra.mxu0 %v11788_v51  ;;  %v2804_v5 = vadd.f32 %v2803_v42, %v11794_v56 }
 0x6a6   : > { %v3070_v15 = vsel %vm2942_vm15, %v2697_v49, %v3006_v52  ;;  %4391 = vmatpush.bf16.msrb.mxu2 %v9892_v57  ;;  %v2961_v20 = vmul.f32 0.01, %v2747_v2  ;;  %vm2897_vm2 = vcmp.ge.f32.partialorder %v2747_v2, 0.0  ;;  %v9889_v49 = vld [vmem:[%s11110_s11 + $0x348] sm:$0xff] }
 0x6a7   : > { %v3102_v36 = vpack.c.bf16 %v3070_v15, %v3054_v60  ;;  %v3071_v62 = vsel %vm2943_vm1, %v2716_v22, %v3007_v44  ;;  %4410 = vmatpush.bf16.msrb.mxu3 %v9900_v58  ;;  %v2964_v16 = vmul.f32 0.01, %v2804_v5  ;;  %vm2900_vm3 = vcmp.ge.f32.partialorder %v2804_v5, 0.0  ;;  %v9888_v60 = vld [vmem:[%s11110_s11 + $0x340] sm:$0xff] }
 0x6a8   : > { %v3103_v4 = vpack.c.bf16 %v3071_v62, %v3055_v61  ;;  %4374 = vmatpush.bf16.msrb.mxu1 %v9882_v63  ;;  %v3025_v10 = vsel %vm2897_vm2, %v2747_v2, %v2961_v20  ;;  %v9896_v15 = vld [vmem:[%s11110_s11 + $0x380] sm:$0xff] }
 0x6a9   : > { %v2765_v8 = vpop.f32.mrf.mxu2  ;;  %4249 = vmatmul.bf16.gmra.mxu2 %v3102_v36  ;;  %4431 = vmatpush.bf16.msra.mxu0 %v11802_v1  ;;  %v3028_v31 = vsel %vm2900_vm3, %v2804_v5, %v2964_v16 }
 0x6aa   : > { %v2784_v12 = vpop.f32.mrf.mxu3  ;;  %4268 = vmatmul.bf16.gmra.mxu3 %v3103_v4  ;;  %4392 = vmatpush.bf16.msrb.mxu2 %v9891_v39  ;;  %v2766_v59 = vadd.f32 %v2765_v8, %v11809_v43 }
 0x6ab   : > { %v2748_v45 = vpop.f32.mrf.mxu1  ;;  %4411 = vmatpush.bf16.msrb.mxu3 %v9899_v40  ;;  %v2785_v7 = vadd.f32 %v2784_v12, %v11813_v13 }
 0x6ac   : > { %v2749_v11 = vadd.f32 %v2748_v45, %v11791_v54  ;;  %v2805_v21 = vpop.f32.mrf.mxu0  ;;  %4375 = vmatpush.bf16.msrb.mxu1 %v9881_v17  ;;  %v2962_v46 = vmul.f32 0.01, %v2766_v59  ;;  %vm2898_vm6 = vcmp.ge.f32.partialorder %v2766_v59, 0.0 }
 0x6ad   : > { %v2806_v9 = vadd.f32 %v2805_v21, %v11794_v56  ;;  %4432 = vmatpush.bf16.msra.mxu0 %v11817_v19  ;;  %v2963_v50 = vmul.f32 0.01, %v2785_v7  ;;  %vm2899_vm7 = vcmp.ge.f32.partialorder %v2785_v7, 0.0 }
 0x6ae   : > { %vm2913_vm4 = vcmp.ge.f32.partialorder %v2749_v11, 0.0  ;;  %v2977_v0 = vmul.f32 0.01, %v2749_v11  ;;  %4393 = vmatpush.bf16.msrb.mxu2 %v9890_v24  ;;  %v3026_v36 = vsel %vm2898_vm6, %v2766_v59, %v2962_v46 }
 0x6af   : > { %vm2916_vm5 = vcmp.ge.f32.partialorder %v2806_v9, 0.0  ;;  %v2980_v27 = vmul.f32 0.01, %v2806_v9  ;;  %4412 = vmatpush.bf16.msrb.mxu3 %v9898_v25  ;;  %v3027_v62 = vsel %vm2899_vm7, %v2785_v7, %v2963_v50 }
 0x6b0   : > { %v3041_v30 = vsel %vm2913_vm4, %v2749_v11, %v2977_v0  ;;  %4376 = vmatpush.bf16.msrb.mxu1 %v9880_v28 }
 0x6b1   : > { %v3089_v32 = vpack.c.bf16 %v3041_v30, %v3025_v10  ;;  %v3044_v33 = vsel %vm2916_vm5, %v2806_v9, %v2980_v27  ;;  %v2767_v37 = vpop.f32.mrf.mxu2  ;;  %4433 = vmatpush.bf16.msra.mxu0 %v11828_v6 }
 0x6b2   : > { %v3092_v41 = vpack.c.bf16 %v3044_v33, %v3028_v31  ;;  %v2768_v22 = vadd.f32 %v2767_v37, %v11809_v43  ;;  %v2786_v47 = vpop.f32.mrf.mxu3  ;;  %4394 = vmatpush.bf16.msrb.mxu2 %v9889_v49  ;;  %v11852_v33 = vperm.slane %v11778_v29, 4 }
 0x6b3   : > { %v2787_v52 = vadd.f32 %v2786_v47, %v11813_v13  ;;  %v2751_v42 = vpop.f32.mrf.mxu1  ;;  %4301 = vmatmul.bf16.vlgmr.msra.gmra.mxu1 %v3089_v32  ;;  %4413 = vmatpush.bf16.msrb.mxu3 %v9897_v38 }
 0x6b4   : > { %vm2914_vm8 = vcmp.ge.f32.partialorder %v2768_v22, 0.0  ;;  %v2978_v44 = vmul.f32 0.01, %v2768_v22  ;;  %v2808_v57 = vpop.f32.mrf.mxu0  ;;  %4358 = vmatmul.bf16.vlgmr.msrb.gmra.mxu0 %v3092_v41  ;;  %10192 = vmatpush.bf16.msra.mxu1 %v11746_v55  ;;  %v2752_v5 = vadd.f32 %v2751_v42, %v11791_v54  ;;  %v11862_v42 = vperm.slane %v11778_v29, 5 }
 0x6b5   : > { %vm2915_vm9 = vcmp.ge.f32.partialorder %v2787_v52, 0.0  ;;  %v2979_v58 = vmul.f32 0.01, %v2787_v52  ;;  %v2809_v8 = vadd.f32 %v2808_v57, %v11794_v56 }
 0x6b6   : > { %v3042_v61 = vsel %vm2914_vm8, %v2768_v22, %v2978_v44  ;;  %4395 = vmatpush.bf16.msrb.mxu2 %v9888_v60  ;;  %v2993_v12 = vmul.f32 0.01, %v2752_v5  ;;  %vm2929_vm10 = vcmp.ge.f32.partialorder %v2752_v5, 0.0 }
 0x6b7   : > { %v3090_v63 = vpack.c.bf16 %v3042_v61, %v3026_v36  ;;  %v3043_v2 = vsel %vm2915_vm9, %v2787_v52, %v2979_v58  ;;  %4414 = vmatpush.bf16.msrb.mxu3 %v9896_v15  ;;  %v2996_v20 = vmul.f32 0.01, %v2809_v8  ;;  %vm2932_vm11 = vcmp.ge.f32.partialorder %v2809_v8, 0.0 }
 0x6b8   : > { %v3091_v4 = vpack.c.bf16 %v3043_v2, %v3027_v62  ;;  %10193 = vmatpush.bf16.msra.mxu1 %v11754_v3  ;;  %v3057_v24 = vsel %vm2929_vm10, %v2752_v5, %v2993_v12 }
 0x6b9   : > { %v2770_v39 = vpop.f32.mrf.mxu2  ;;  %4320 = vmatmul.bf16.vlgmr.msra.gmra.mxu2 %v3090_v63  ;;  %v3060_v0 = vsel %vm2932_vm11, %v2809_v8, %v2996_v20 }
 0x6ba   : > { %v2789_v55 = vpop.f32.mrf.mxu3  ;;  %4339 = vmatmul.bf16.vlgmr.msra.gmra.mxu3 %v3091_v4  ;;  %v2771_v21 = vadd.f32 %v2770_v39, %v11809_v43 }
 0x6bb   : > { %v2753_v40 = vpop.f32.mrf.mxu1  ;;  %v2790_v3 = vadd.f32 %v2789_v55, %v11813_v13 }
 0x6bc   : > { %v2754_v45 = vadd.f32 %v2753_v40, %v11791_v54  ;;  %v2810_v17 = vpop.f32.mrf.mxu0  ;;  %10194 = vmatpush.bf16.msra.mxu1 %v11763_v14  ;;  %vm2930_vm14 = vcmp.ge.f32.partialorder %v2771_v21, 0.0 }
 0x6bd   : > { %v2811_v11 = vadd.f32 %v2810_v17, %v11794_v56  ;;  %v2994_v56 = vmul.f32 0.01, %v2771_v21  ;;  %v2995_v10 = vmul.f32 0.01, %v2790_v3  ;;  %vm2931_vm15 = vcmp.ge.f32.partialorder %v2790_v3, 0.0 }
 0x6be   : > { %vm2945_vm12 = vcmp.ge.f32.partialorder %v2754_v45, 0.0  ;;  %v3009_v16 = vmul.f32 0.01, %v2754_v45 }
 0x6bf   : > { %vm2948_vm13 = vcmp.ge.f32.partialorder %v2811_v11, 0.0  ;;  %v3012_v9 = vmul.f32 0.01, %v2811_v11  ;;  %v3058_v49 = vsel %vm2930_vm14, %v2771_v21, %v2994_v56  ;;  %v3059_v46 = vsel %vm2931_vm15, %v2790_v3, %v2995_v10 }
 0x6c0   : > { %v3073_v25 = vsel %vm2945_vm12, %v2754_v45, %v3009_v16  ;;  %10195 = vmatpush.bf16.msra.mxu1 %v11774_v26 }
 0x6c1   : > { %v2772_v59 = vpop.f32.mrf.mxu2  ;;  %v3105_v54 = vpack.c.bf16 %v3073_v25, %v3057_v24  ;;  %v3076_v7 = vsel %vm2948_vm13, %v2811_v11, %v3012_v9 }
 0x6c2   : > { %v2773_v14 = vadd.f32 %v2772_v59, %v11809_v43  ;;  %v2791_v27 = vpop.f32.mrf.mxu3  ;;  %v3108_v28 = vpack.c.bf16 %v3076_v7, %v3060_v0  ;;  %v11855_v43 = vperm.slane %v11778_v29, 7 }
 0x6c3   : > { %v2792_v30 = vadd.f32 %v2791_v27, %v11813_v13  ;;  %v2822_v31 = vpop.f32.mrf.mxu1  ;;  %4306 = vmatmul.bf16.gmra.mxu1 %v3105_v54 }
 0x6c4   : > { %vm2946_vm0 = vcmp.ge.f32.partialorder %v2773_v14, 0.0  ;;  %v3010_v32 = vmul.f32 0.01, %v2773_v14  ;;  %v2879_v37 = vpop.f32.mrf.mxu0  ;;  %4363 = vmatmul.bf16.gmra.mxu0 %v3108_v28  ;;  %10196 = vmatpush.bf16.msra.mxu1 %v11788_v51  ;;  %v2823_v22 = vadd.f32 %v2822_v31, %v11852_v33  ;;  %v11865_v51 = vperm.slane %v11778_v29, 6 }
 0x6c5   : > { %vm2947_vm1 = vcmp.ge.f32.partialorder %v2792_v30, 0.0  ;;  %v3011_v26 = vmul.f32 0.01, %v2792_v30  ;;  %v2880_v50 = vadd.f32 %v2879_v37, %v11855_v43 }
 0x6c6   : > { %v3074_v38 = vsel %vm2946_vm0, %v2773_v14, %v3010_v32  ;;  %v2965_v58 = vmul.f32 0.01, %v2823_v22  ;;  %vm2901_vm2 = vcmp.ge.f32.partialorder %v2823_v22, 0.0 }
 0x6c7   : > { %v3106_v13 = vpack.c.bf16 %v3074_v38, %v3058_v49  ;;  %v3075_v41 = vsel %vm2947_vm1, %v2792_v30, %v3011_v26  ;;  %v2968_v36 = vmul.f32 0.01, %v2880_v50  ;;  %vm2904_vm3 = vcmp.ge.f32.partialorder %v2880_v50, 0.0 }
 0x6c8   : > { %v3107_v47 = vpack.c.bf16 %v3075_v41, %v3059_v46  ;;  %10197 = vmatpush.bf16.msra.mxu1 %v11802_v1  ;;  %v3029_v2 = vsel %vm2901_vm2, %v2823_v22, %v2965_v58 }
 0x6c9   : > { %v2841_v52 = vpop.f32.mrf.mxu2  ;;  %4325 = vmatmul.bf16.gmra.mxu2 %v3106_v13  ;;  %v3032_v5 = vsel %vm2904_vm3, %v2880_v50, %v2968_v36 }
 0x6ca   : > { %v2860_v44 = vpop.f32.mrf.mxu3  ;;  %4344 = vmatmul.bf16.gmra.mxu3 %v3107_v47  ;;  %v2842_v1 = vadd.f32 %v2841_v52, %v11862_v42 }
 0x6cb   : > { %v2824_v57 = vpop.f32.mrf.mxu1  ;;  %v2861_v63 = vadd.f32 %v2860_v44, %v11865_v51 }
 0x6cc   : > { %v2825_v60 = vadd.f32 %v2824_v57, %v11852_v33  ;;  %v2881_v15 = vpop.f32.mrf.mxu0  ;;  %10198 = vmatpush.bf16.msra.mxu1 %v11817_v19  ;;  %v2966_v40 = vmul.f32 0.01, %v2842_v1  ;;  %vm2902_vm6 = vcmp.ge.f32.partialorder %v2842_v1, 0.0 }
 0x6cd   : > { %v2882_v61 = vadd.f32 %v2881_v15, %v11855_v43  ;;  %v2967_v17 = vmul.f32 0.01, %v2861_v63  ;;  %vm2903_vm7 = vcmp.ge.f32.partialorder %v2861_v63, 0.0 }
 0x6ce   : > { %vm2917_vm4 = vcmp.ge.f32.partialorder %v2825_v60, 0.0  ;;  %v2981_v62 = vmul.f32 0.01, %v2825_v60  ;;  %v3030_v3 = vsel %vm2902_vm6, %v2842_v1, %v2966_v40 }
 0x6cf   : > { %vm2920_vm5 = vcmp.ge.f32.partialorder %v2882_v61, 0.0  ;;  %v2984_v29 = vmul.f32 0.01, %v2882_v61 }
 0x6d0   : > { %v3045_v4 = vsel %vm2917_vm4, %v2825_v60, %v2981_v62  ;;  %10199 = vmatpush.bf16.msra.mxu1 %v11828_v6  ;;  %v3031_v6 = vsel %vm2903_vm7, %v2861_v63, %v2967_v17 }
 0x6d1   : > { %v3093_v8 = vpack.c.bf16 %v3045_v4, %v3029_v2  ;;  %v3048_v39 = vsel %vm2920_vm5, %v2882_v61, %v2984_v29  ;;  %v2843_v55 = vpop.f32.mrf.mxu2  ;;  %v10366_v4 = vld [vmem:[%s810_s10] ss:$0 sm:$0xff] }
 0x6d2   : > { %v3096_v12 = vpack.c.bf16 %v3048_v39, %v3032_v5  ;;  %v2844_v19 = vadd.f32 %v2843_v55, %v11862_v42  ;;  %v2862_v45 = vpop.f32.mrf.mxu3 }
 0x6d3   : > { %v2863_v20 = vadd.f32 %v2862_v45, %v11865_v51  ;;  %v2827_v11 = vpop.f32.mrf.mxu1  ;;  %4377 = vmatmul.bf16.vlgmr.msrb.gmra.mxu1 %v3093_v8 }
 0x6d4   : > { %vm2918_vm8 = vcmp.ge.f32.partialorder %v2844_v19, 0.0  ;;  %v2982_v21 = vmul.f32 0.01, %v2844_v19  ;;  %4434 = vmatmul.bf16.vlgmr.msra.gmra.mxu0 %v3096_v12  ;;  %v2828_v54 = vadd.f32 %v2827_v11, %v11852_v33  ;;  %v2884_v0 = vpop.f32.mrf.mxu0 }
 0x6d5   : > { %vm2919_vm9 = vcmp.ge.f32.partialorder %v2863_v20, 0.0  ;;  %v2983_v16 = vmul.f32 0.01, %v2863_v20  ;;  %v2885_v15 = vadd.f32 %v2884_v0, %v11855_v43 }
 0x6d6   : > { %v3046_v9 = vsel %vm2918_vm8, %v2844_v19, %v2982_v21  ;;  %v2997_v27 = vmul.f32 0.01, %v2828_v54  ;;  %vm2933_vm10 = vcmp.ge.f32.partialorder %v2828_v54, 0.0 }
 0x6d7   : > { %v3094_v24 = vpack.c.bf16 %v3046_v9, %v3030_v3  ;;  %v3047_v25 = vsel %vm2919_vm9, %v2863_v20, %v2983_v16  ;;  %vm2936_vm1 = vcmp.ge.f32.partialorder %v2885_v15, 0.0 }
 0x6d8   : > { %v3095_v59 = vpack.c.bf16 %v3047_v25, %v3031_v6  ;;  %v3061_v32 = vsel %vm2933_vm10, %v2828_v54, %v2997_v27 }
 0x6d9   : > { %v2846_v7 = vpop.f32.mrf.mxu2  ;;  %4396 = vmatmul.bf16.vlgmr.msrb.gmra.mxu2 %v3094_v24 }
 0x6da   : > { %v2865_v56 = vpop.f32.mrf.mxu3  ;;  %4415 = vmatmul.bf16.vlgmr.msrb.gmra.mxu3 %v3095_v59  ;;  %v2847_v10 = vadd.f32 %v2846_v7, %v11862_v42 }
 0x6db   : > { %v2829_v14 = vpop.f32.mrf.mxu1  ;;  %v2866_v31 = vadd.f32 %v2865_v56, %v11865_v51 }
 0x6dc   : > { %v2830_v28 = vadd.f32 %v2829_v14, %v11852_v33  ;;  %v2998_v38 = vmul.f32 0.01, %v2847_v10  ;;  %vm2934_vm12 = vcmp.ge.f32.partialorder %v2847_v10, 0.0  ;;  %v2886_v22 = vpop.f32.mrf.mxu0 }
 0x6dd   : > { %v2999_v41 = vmul.f32 0.01, %v2866_v31  ;;  %vm2935_vm13 = vcmp.ge.f32.partialorder %v2866_v31, 0.0  ;;  %v2887_v52 = vadd.f32 %v2886_v22, %v11855_v43 }
 0x6de   : > { %vm2949_vm11 = vcmp.ge.f32.partialorder %v2830_v28, 0.0  ;;  %v3013_v30 = vmul.f32 0.01, %v2830_v28  ;;  %v3062_v44 = vsel %vm2934_vm12, %v2847_v10, %v2998_v38 }
 0x6df   : > { %v3063_v60 = vsel %vm2935_vm13, %v2866_v31, %v2999_v41  ;;  %v3016_v61 = vmul.f32 0.01, %v2887_v52  ;;  %vm2952_vm0 = vcmp.ge.f32.partialorder %v2887_v52, 0.0 }
 0x6e0   : > { %v3077_v37 = vsel %vm2949_vm11, %v2830_v28, %v3013_v30 }
 0x6e1   : > { %v2848_v26 = vpop.f32.mrf.mxu2  ;;  %v3109_v49 = vpack.c.bf16 %v3077_v37, %v3061_v32  ;;  %v3080_v1 = vsel %vm2952_vm0, %v2887_v52, %v3016_v61 }
 0x6e2   : > { %v2849_v13 = vadd.f32 %v2848_v26, %v11862_v42  ;;  %v2867_v46 = vpop.f32.mrf.mxu3 }
 0x6e3   : > { %v2868_v33 = vadd.f32 %v2867_v46, %v11865_v51  ;;  %4382 = vmatmul.bf16.gmra.mxu1 %v3109_v49  ;;  %v3000_v51 = vmul.f32 0.01, %v2885_v15 }
 0x6e4   : > { %vm2950_vm14 = vcmp.ge.f32.partialorder %v2849_v13, 0.0  ;;  %v3014_v47 = vmul.f32 0.01, %v2849_v13 }
 0x6e5   : > { %vm2951_vm15 = vcmp.ge.f32.partialorder %v2868_v33, 0.0  ;;  %v3015_v50 = vmul.f32 0.01, %v2868_v33  ;;  %v3064_v62 = vsel %vm2936_vm1, %v2885_v15, %v3000_v51 }
 0x6e6   : > { %v3078_v57 = vsel %vm2950_vm14, %v2849_v13, %v3014_v47  ;;  %v3112_v29 = vpack.c.bf16 %v3080_v1, %v3064_v62 }
 0x6e7   : > { %v3110_v58 = vpack.c.bf16 %v3078_v57, %v3062_v44  ;;  %v3079_v42 = vsel %vm2951_vm15, %v2868_v33, %v3015_v50 }
 0x6e8   : > { %v3111_v36 = vpack.c.bf16 %v3079_v42, %v3063_v60 }
 0x6e9   : > { %4401 = vmatmul.bf16.gmra.mxu2 %v3110_v58 }
 0x6ea   : > { %4420 = vmatmul.bf16.gmra.mxu3 %v3111_v36 }
 0x6f0   : > { %v4150_v63 = vpop.f32.mrf.mxu1 }
 0x6f1   : > { %v4207_v2 = vpop.f32.mrf.mxu0  ;;  %v4151_v39 = vadd.f32 %v10366_v4, %v4150_v63 }
 0x6f3   : > { %4439 = vmatmul.bf16.vlgmr.msra.gmra.mxu1 %v3112_v29 }
 0x6f8   : > { %v4152_v5 = vpop.f32.mrf.mxu1 }
 0x6f9   : > { %v4209_v8 = vpop.f32.mrf.mxu0  ;;  %v4153_v20 = vadd.f32 %v10366_v4, %v4152_v5 }
 0x6fc   : > { %v4169_v55 = vpop.f32.mrf.mxu2 }
 0x6fd   : > { %v4170_v43 = vadd.f32 %v4169_v55, %v4151_v39  ;;  %v4188_v40 = vpop.f32.mrf.mxu3 }
 0x6ff   : > { %v4189_v12 = vadd.f32 %v4188_v40, %v4170_v43 }
 0x700   : > { %v4155_v19 = vpop.f32.mrf.mxu1 }
 0x701   : > { %v4212_v45 = vpop.f32.mrf.mxu0  ;;  %v4208_v17 = vadd.f32 %v4207_v2, %v4189_v12  ;;  %v4156_v25 = vadd.f32 %v10366_v4, %v4155_v19 }
 0x704   : > { %v4171_v11 = vpop.f32.mrf.mxu2 }
 0x705   : > { %v4172_v21 = vadd.f32 %v4171_v11, %v4153_v20  ;;  %v4190_v16 = vpop.f32.mrf.mxu3 }
 0x707   : > { %v4191_v3 = vadd.f32 %v4190_v16, %v4172_v21 }
 0x708   : > { %v4157_v9 = vpop.f32.mrf.mxu1 }
 0x709   : > { %v4214_v6 = vpop.f32.mrf.mxu0  ;;  %v4210_v24 = vadd.f32 %v4209_v8, %v4191_v3  ;;  %v4158_v28 = vadd.f32 %v10366_v4, %v4157_v9 }
 0x70c   : > { %v4174_v59 = vpop.f32.mrf.mxu2 }
 0x70d   : > { %v4175_v54 = vadd.f32 %v4174_v59, %v4156_v25  ;;  %v4193_v0 = vpop.f32.mrf.mxu3 }
 0x70f   : > { %v4194_v7 = vadd.f32 %v4193_v0, %v4175_v54 }
 0x710   : > { %v4226_v56 = vpop.f32.mrf.mxu1 }
 0x711   : > { %v4283_v14 = vpop.f32.mrf.mxu0  ;;  %v4213_v27 = vadd.f32 %v4212_v45, %v4194_v7  ;;  %v4227_v62 = vadd.f32 %v4226_v56, %v4208_v17 }
 0x714   : > { %v4176_v10 = vpop.f32.mrf.mxu2 }
 0x715   : > { %v4177_v30 = vadd.f32 %v4176_v10, %v4158_v28  ;;  %v4195_v31 = vpop.f32.mrf.mxu3 }
 0x717   : > { %v4196_v32 = vadd.f32 %v4195_v31, %v4177_v30 }
 0x718   : > { %v4228_v37 = vpop.f32.mrf.mxu1 }
 0x719   : > { %v4285_v26 = vpop.f32.mrf.mxu0  ;;  %v4215_v49 = vadd.f32 %v4214_v6, %v4196_v32  ;;  %v4229_v39 = vadd.f32 %v4228_v37, %v4210_v24 }
 0x71c   : > { %v4245_v38 = vpop.f32.mrf.mxu2 }
 0x71d   : > { %v4264_v13 = vpop.f32.mrf.mxu3  ;;  %v4246_v29 = vadd.f32 %v4245_v38, %v4227_v62 }
 0x71f   : > { %v4265_v5 = vadd.f32 %v4264_v13, %v4246_v29 }
 0x720   : > { %v4231_v46 = vpop.f32.mrf.mxu1 }
 0x721   : > { %v4288_v41 = vpop.f32.mrf.mxu0  ;;  %v4284_v40 = vadd.f32 %v4283_v14, %v4265_v5  ;;  %v4232_v21 = vadd.f32 %v4231_v46, %v4213_v27 }
 0x724   : > { %v4247_v22 = vpop.f32.mrf.mxu2 }
 0x725   : > { %v4266_v33 = vpop.f32.mrf.mxu3  ;;  %v4248_v43 = vadd.f32 %v4247_v22, %v4229_v39 }
 0x727   : > { %v4267_v20 = vadd.f32 %v4266_v33, %v4248_v43 }
 0x728   : > { %v4233_v47 = vpop.f32.mrf.mxu1 }
 0x729   : > { %v4290_v50 = vpop.f32.mrf.mxu0  ;;  %v4286_v17 = vadd.f32 %v4285_v26, %v4267_v20  ;;  %v4234_v56 = vadd.f32 %v4233_v47, %v4215_v49 }
 0x72c   : > { %v4250_v52 = vpop.f32.mrf.mxu2 }
 0x72d   : > { %v4269_v44 = vpop.f32.mrf.mxu3  ;;  %v4251_v9 = vadd.f32 %v4250_v52, %v4232_v21 }
 0x72f   : > { %v4270_v0 = vadd.f32 %v4269_v44, %v4251_v9 }
 0x730   : > { %v4302_v57 = vpop.f32.mrf.mxu1 }
 0x731   : > { %v4359_v42 = vpop.f32.mrf.mxu0  ;;  %v4303_v19 = vadd.f32 %v4302_v57, %v4284_v40  ;;  %v4289_v30 = vadd.f32 %v4288_v41, %v4270_v0 }
 0x734   : > { %v4252_v58 = vpop.f32.mrf.mxu2 }
 0x735   : > { %v4271_v60 = vpop.f32.mrf.mxu3  ;;  %v4253_v14 = vadd.f32 %v4252_v58, %v4234_v56 }
 0x737   : > { %v4272_v46 = vadd.f32 %v4271_v60, %v4253_v14 }
 0x738   : > { %v4304_v15 = vpop.f32.mrf.mxu1 }
 0x739   : > { %v4361_v51 = vpop.f32.mrf.mxu0  ;;  %v4305_v59 = vadd.f32 %v4304_v15, %v4286_v17 }
 0x73c   : > { %v4321_v36 = vpop.f32.mrf.mxu2 }
 0x73d   : > { %v4340_v61 = vpop.f32.mrf.mxu3  ;;  %v4322_v11 = vadd.f32 %v4321_v36, %v4303_v19 }
 0x73f   : > { %v4341_v6 = vadd.f32 %v4340_v61, %v4322_v11 }
 0x740   : > { %v4307_v1 = vpop.f32.mrf.mxu1 }
 0x741   : > { %v4364_v8 = vpop.f32.mrf.mxu0  ;;  %v4360_v24 = vadd.f32 %v4359_v42, %v4341_v6  ;;  %v4308_v38 = vadd.f32 %v4307_v1, %v4289_v30  ;;  %v4291_v42 = vadd.f32 %v4290_v50, %v4272_v46 }
 0x744   : > { %v4323_v63 = vpop.f32.mrf.mxu2 }
 0x745   : > { %v4342_v2 = vpop.f32.mrf.mxu3  ;;  %v4324_v7 = vadd.f32 %v4323_v63, %v4305_v59 }
 0x747   : > { %v4343_v31 = vadd.f32 %v4342_v2, %v4324_v7 }
 0x748   : > { %v4309_v4 = vpop.f32.mrf.mxu1 }
 0x749   : > { %v4366_v16 = vpop.f32.mrf.mxu0  ;;  %v4362_v33 = vadd.f32 %v4361_v51, %v4343_v31  ;;  %v4310_v36 = vadd.f32 %v4309_v4, %v4291_v42 }
 0x74c   : > { %v4326_v55 = vpop.f32.mrf.mxu2 }
 0x74d   : > { %v4345_v12 = vpop.f32.mrf.mxu3  ;;  %v4327_v22 = vadd.f32 %v4326_v55, %v4308_v38 }
 0x74f   : > { %v4346_v47 = vadd.f32 %v4345_v12, %v4327_v22 }
 0x750   : > { %v4378_v45 = vpop.f32.mrf.mxu1 }
 0x751   : > { %v4379_v28 = vadd.f32 %v4378_v45, %v4360_v24  ;;  %v4435_v27 = vpop.f32.mrf.mxu0 }
 0x754   : > { %v4328_v3 = vpop.f32.mrf.mxu2 }
 0x755   : > { %v4347_v25 = vpop.f32.mrf.mxu3  ;;  %v4329_v63 = vadd.f32 %v4328_v3, %v4310_v36 }
 0x757   : > { %v4348_v39 = vadd.f32 %v4347_v25, %v4329_v63 }
 0x758   : > { %v4380_v54 = vpop.f32.mrf.mxu1 }
 0x759   : > { %v4381_v57 = vadd.f32 %v4380_v54, %v4362_v33  ;;  %v4437_v1 = vpop.f32.mrf.mxu0  ;;  %v4367_v45 = vadd.f32 %v4366_v16, %v4348_v39  ;;  %v10368_v39 = vld [vmem:[%s828_s18] ss:$0 sm:$0xff] }
 0x75c   : > { %v4397_v10 = vpop.f32.mrf.mxu2 }
 0x75d   : > { %v4398_v32 = vadd.f32 %v4397_v10, %v4379_v28  ;;  %v4416_v37 = vpop.f32.mrf.mxu3 }
 0x75f   : > { %v4417_v13 = vadd.f32 %v4416_v37, %v4398_v32 }
 0x760   : > { %v4383_v26 = vpop.f32.mrf.mxu1 }
 0x761   : > { %v4436_v52 = vadd.f32 %v4435_v27, %v4417_v13 }
 0x763   : > { %v4445_v44 = vadd.f32 %v4436_v52, %v11415_v48  ;;  %v4365_v48 = vadd.f32 %v4364_v8, %v4346_v47 }
 0x764   : > { %v4399_v49 = vpop.f32.mrf.mxu2 }
 0x765   : > { %v4400_v58 = vadd.f32 %v4399_v49, %v4381_v57  ;;  %v4418_v15 = vpop.f32.mrf.mxu3  ;;  %vm4449_vm2 = vcmp.ge.f32.partialorder %v4445_v44, 0.0  ;;  %v4453_v41 = vmul.f32 0.01, %v4445_v44  ;;  %v4384_v29 = vadd.f32 %v4383_v26, %v4365_v48 }
 0x767   : > { %v4419_v61 = vadd.f32 %v4418_v15, %v4400_v58  ;;  %v11886_v62 = vsel %vm4449_vm2, %v4445_v44, %v4453_v41 }
 0x768   : > { %v4385_v60 = vpop.f32.mrf.mxu1  ;;  %4463 = vadd.xlane.f32.xlu0 %v11886_v62  ;;  %v4475_v51 = vmul.f32 %v11886_v62, %v11886_v62 }
 0x769   : > { %v4438_v50 = vadd.f32 %v4437_v1, %v4419_v61  ;;  %v4386_v11 = vadd.f32 %v4385_v60, %v4367_v45 }
 0x76a   : > { %4479 = vadd.xlane.f32.xlu2 %v4475_v51 }
 0x76b   : > { %v4446_v2 = vadd.f32 %v4438_v50, %v11418_v18 }
 0x76c   : > { %v4402_v5 = vpop.f32.mrf.mxu2 }
 0x76d   : > { %v4403_v4 = vadd.f32 %v4402_v5, %v4384_v29  ;;  %v4421_v55 = vpop.f32.mrf.mxu3  ;;  %vm4450_vm3 = vcmp.ge.f32.partialorder %v4446_v2, 0.0  ;;  %v4454_v43 = vmul.f32 0.01, %v4446_v2  ;;  %v10367_v29 = vld [vmem:[%s819_s13] ss:$0 sm:$0xff] }
 0x76f   : > { %v4422_v40 = vadd.f32 %v4421_v55, %v4403_v4  ;;  %v11892_v12 = vsel %vm4450_vm3, %v4446_v2, %v4454_v43 }
 0x770   : > { %v4440_v19 = vpop.f32.mrf.mxu1  ;;  %4465 = vadd.xlane.f32.xlu0 %v11892_v12  ;;  %v4476_v8 = vmul.f32 %v11892_v12, %v11892_v12 }
 0x771   : > { %v4441_v20 = vadd.f32 %v4440_v19, %v4422_v40 }
 0x772   : > { %4481 = vadd.xlane.f32.xlu2 %v4476_v8 }
 0x773   : > { %v4447_v18 = vadd.f32 %v4441_v20, %v11461_v34 }
 0x774   : > { %v4404_v21 = vpop.f32.mrf.mxu2 }
 0x775   : > { %v4405_v3 = vadd.f32 %v4404_v21, %v4386_v11  ;;  %vm4451_vm4 = vcmp.ge.f32.partialorder %v4447_v18, 0.0  ;;  %v4455_v9 = vmul.f32 0.01, %v4447_v18  ;;  %v4423_v17 = vpop.f32.mrf.mxu3 }
 0x777   : > { %v4424_v6 = vadd.f32 %v4423_v17, %v4405_v3  ;;  %v11898_v25 = vsel %vm4451_vm4, %v4447_v18, %v4455_v9 }
 0x778   : > { %v4442_v59 = vpop.f32.mrf.mxu1  ;;  %4467 = vadd.xlane.f32.xlu1 %v11898_v25  ;;  %v4477_v54 = vmul.f32 %v11898_v25, %v11898_v25 }
 0x779   : > { %v4443_v16 = vadd.f32 %v4442_v59, %v4424_v6 }
 0x77a   : > { %4483 = vadd.xlane.f32.xlu0 %v4477_v54 }
 0x77b   : > { %v4448_v0 = vadd.f32 %v4443_v16, %v11464_v35 }
 0x77d   : > { %vm4452_vm5 = vcmp.ge.f32.partialorder %v4448_v0, 0.0  ;;  %v4456_v34 = vmul.f32 0.01, %v4448_v0 }
 0x77f   : > { %v11904_v7 = vsel %vm4452_vm5, %v4448_v0, %v4456_v34 }
 0x780   : > { %4469 = vadd.xlane.f32.xlu1 %v11904_v7  ;;  %v4478_v24 = vmul.f32 %v11904_v7, %v11904_v7 }
 0x788   : > { %4485 = vadd.xlane.f32.xlu1 %v4478_v24 }
 0x7db   : > { %v4464_v56 = vpop.xlane.xlu0 %4463 }
 0x7dc   : > { %v4471_v28 = vmul.f32 0.03125, %v4464_v56 }
 0x7dd   : > { %v4480_v14 = vpop.xlane.xlu2 %4479 }
 0x7de   : > { %v4491_v10 = vmul.f32 %v4471_v28, %v4471_v28  ;;  %v4487_v30 = vmul.f32 0.03125, %v4480_v14  ;;  %v4503_v50 = vsub.f32 %v11886_v62, %v4471_v28 }
 0x7e0   : > { %v4495_v31 = vsub.f32 %v4487_v30, %v4491_v10 }
 0x7e2   : > { %v4499_v32 = vmax.f32 %v4495_v31, 0.0 }
 0x7e3   : > { %v4466_v37 = vpop.xlane.xlu0 %4465 }
 0x7e4   : > { %v4507_v27 = vadd.f32 1e-05, %v4499_v32  ;;  %v4472_v35 = vmul.f32 0.03125, %v4466_v37 }
 0x7e5   : > { %v4482_v38 = vpop.xlane.xlu2 %4481 }
 0x7e6   : > { %10369 = vrsqrt.f32 %v4507_v27  ;;  %v4492_v13 = vmul.f32 %v4472_v35, %v4472_v35  ;;  %v4488_v46 = vmul.f32 0.03125, %v4482_v38  ;;  %vm4517_vm7 = vweird.f32 %v4507_v27 }
 0x7e7   : > { %v4504_v17 = vsub.f32 %v11892_v12, %v4472_v35 }
 0x7e8   : > { %v4496_v26 = vsub.f32 %v4488_v46, %v4492_v13 }
 0x7ea   : > { %v4500_v22 = vmax.f32 %v4496_v26, 0.0 }
 0x7eb   : > { %v4468_v33 = vpop.xlane.xlu1 %4467 }
 0x7ec   : > { %v10370_v52 = vpop.eup %10369  ;;  %v4473_v57 = vmul.f32 0.03125, %v4468_v33  ;;  %v4508_v42 = vadd.f32 1e-05, %v4500_v22 }
 0x7ed   : > { %v4512_v44 = vmul.f32 %v10370_v52, %v4507_v27  ;;  %v4484_v49 = vpop.xlane.xlu0 %4483  ;;  %vm4518_vm6 = vweird.f32 %v10370_v52 }
 0x7ee   : > { %v4493_v47 = vmul.f32 %v4473_v57, %v4473_v57  ;;  %v4489_v58 = vmul.f32 0.03125, %v4484_v49  ;;  %10371 = vrsqrt.f32 %v4508_v42  ;;  %vm4519_vm8 = vmor %vm4517_vm7, %vm4518_vm6  ;;  %vm4527_vm10 = vweird.f32 %v4508_v42 }
 0x7ef   : > { %v4513_v15 = vmul.f32 %v10370_v52, %v4512_v44  ;;  %v4505_v10 = vsub.f32 %v11898_v25, %v4473_v57 }
 0x7f0   : > { %v4497_v41 = vsub.f32 %v4489_v58, %v4493_v47 }
 0x7f1   : > { %v4514_v36 = vmul.f32 0.5, %v4513_v15 }
 0x7f2   : > { %v4501_v61 = vmax.f32 %v4497_v41, 0.0 }
 0x7f3   : > { %v4515_v1 = vsub.f32 1.5, %v4514_v36  ;;  %v4470_v60 = vpop.xlane.xlu1 %4469 }
 0x7f4   : > { %v4509_v51 = vadd.f32 1e-05, %v4501_v61  ;;  %v10372_v63 = vpop.eup %10371  ;;  %v4474_v43 = vmul.f32 0.03125, %v4470_v60 }
 0x7f5   : > { %v4516_v48 = vmul.f32 %v10370_v52, %v4515_v1  ;;  %v4522_v2 = vmul.f32 %v10372_v63, %v4508_v42  ;;  %vm4528_vm9 = vweird.f32 %v10372_v63 }
 0x7f6   : > { %10373 = vrsqrt.f32 %v4509_v51  ;;  %v4494_v18 = vmul.f32 %v4474_v43, %v4474_v43  ;;  %vm4529_vm11 = vmor %vm4527_vm10, %vm4528_vm9  ;;  %vm4537_vm13 = vweird.f32 %v4509_v51  ;;  %v4506_v26 = vsub.f32 %v11904_v7, %v4474_v43 }
 0x7f7   : > { %v4520_v5 = vsel %vm4519_vm8, %v10370_v52, %v4516_v48  ;;  %v4523_v55 = vmul.f32 %v10372_v63, %v4522_v2 }
 0x7f8   : > { %v4551_v4 = vmul.f32 %v4520_v5, %v4503_v50 }
 0x7f9   : > { %v4524_v19 = vmul.f32 0.5, %v4523_v55 }
 0x7fa   : > { %v4558_v40 = vmul.f32 %v10367_v29, %v4551_v4 }
 0x7fb   : > { %v4486_v8 = vpop.xlane.xlu1 %4485  ;;  %v4525_v11 = vsub.f32 1.5, %v4524_v19 }
 0x7fc   : > { %v10374_v45 = vpop.eup %10373  ;;  %v4565_v20 = vadd.f32 %v10368_v39, %v4558_v40  ;;  %v4490_v62 = vmul.f32 0.03125, %v4486_v8 }
 0x7fd   : > { %v4532_v21 = vmul.f32 %v10374_v45, %v4509_v51  ;;  %v4526_v3 = vmul.f32 %v10372_v63, %v4525_v11  ;;  %vm4538_vm12 = vweird.f32 %v10374_v45 }
 0x7fe   : > { %4569 = vst [vmem:[#allocation2 + $0x10] sm:$0xff] %v4565_v20  ;;  %v4498_v9 = vsub.f32 %v4490_v62, %v4494_v18  ;;  %vm4539_vm14 = vmor %vm4537_vm13, %vm4538_vm12 }
 0x7ff   : > { %v4533_v6 = vmul.f32 %v10374_v45, %v4532_v21  ;;  %v4530_v59 = vsel %vm4529_vm11, %v10372_v63, %v4526_v3 }
 0x800   : > { %v4502_v54 = vmax.f32 %v4498_v9, 0.0  ;;  %v4552_v16 = vmul.f32 %v4530_v59, %v4504_v17 }
 0x801   : > { %v4534_v0 = vmul.f32 0.5, %v4533_v6 }
 0x802   : > { %v4510_v34 = vadd.f32 1e-05, %v4502_v54  ;;  %v4559_v24 = vmul.f32 %v10367_v29, %v4552_v16 }
 0x803   : > { %v4535_v56 = vsub.f32 1.5, %v4534_v0 }
 0x804   : > { %10375 = vrsqrt.f32 %v4510_v34  ;;  %v4566_v28 = vadd.f32 %v10368_v39, %v4559_v24  ;;  %vm4547_vm0 = vweird.f32 %v4510_v34 }
 0x805   : > { %v4536_v14 = vmul.f32 %v10374_v45, %v4535_v56 }
 0x806   : > { %4570 = vst [vmem:[#allocation2] sm:$0xff] %v4566_v28 }
 0x807   : > { %v4540_v30 = vsel %vm4539_vm14, %v10374_v45, %v4536_v14 }
 0x808   : > { %v4553_v12 = vmul.f32 %v4540_v30, %v4505_v10 }
 0x80a   : > { %v10376_v31 = vpop.eup %10375  ;;  %v4560_v32 = vmul.f32 %v10367_v29, %v4553_v12 }
 0x80b   : > { %v4542_v37 = vmul.f32 %v10376_v31, %v4510_v34  ;;  %vm4548_vm15 = vweird.f32 %v10376_v31 }
 0x80c   : > { %v4567_v27 = vadd.f32 %v10368_v39, %v4560_v32  ;;  %vm4549_vm1 = vmor %vm4547_vm0, %vm4548_vm15 }
 0x80d   : > { %v4543_v35 = vmul.f32 %v10376_v31, %v4542_v37 }
 0x80e   : > { %4571 = vst [vmem:[#allocation2 + $0x18] sm:$0xff] %v4567_v27 }
 0x80f   : > { %v4544_v38 = vmul.f32 0.5, %v4543_v35 }
 0x811   : > { %v4545_v13 = vsub.f32 1.5, %v4544_v38 }
 0x813   : > { %v4546_v46 = vmul.f32 %v10376_v31, %v4545_v13 }
 0x815   : > { %v4550_v22 = vsel %vm4549_vm1, %v10376_v31, %v4546_v46 }
 0x816   : > { %v4554_v25 = vmul.f32 %v4550_v22, %v4506_v26 }
 0x818   : > { %v4561_v33 = vmul.f32 %v10367_v29, %v4554_v25 }
 0x81a   : > { %v4568_v52 = vadd.f32 %v10368_v39, %v4561_v33 }
 0x81c   : > { %4572 = vst [vmem:[#allocation2 + $0x8] sm:$0xff] %v4568_v52 }
 0x81d PF: > { %s12475_s8 = sld [smem:[#allocation24_spill]] }
 0x823   : > { %p8544_p4 = scmp.ne.s32.totalorder %s12475_s8, 1 }
 0x825   : > { %4576 = sbr.rel (%p8544_p4) target bundleno = 2757 (0xac5), region = 144 }
 0x82a   : > { %v9919_v7 = vld [vmem:[%s11081_s6 + $0x38] sm:$0xff]  ;;  %v9918_v57 = vld [vmem:[%s11081_s6 + $0x30] sm:$0xff]  ;;  %v9027_v44 = vld [vmem:[%s11108_s24 + $0x380] sm:$0xf]  ;;  %v4594_v59 = vpack.c.bf16 %v11268_v23, %v11268_v23  ;;  %v4593_v31 = vpack.c.bf16 %v11256_v53, %v11256_v53  ;;  %vm4604_vm2 = vcmask 1041409  }
 0x82b   : > { %4656 = vmatpush.bf16.msra.mxu0 %v9919_v7  ;;  %v10040_v42 = vld [vmem:[%s11108_s24 + $0x3bc] sm:$0xf0]  ;;  %v10032_v49 = vld [vmem:[%s11108_s24 + $0x384] sm:$0xf]  ;;  %v9035_v41 = vld [vmem:[%s11108_s24 + $0x388] sm:$0xf] }
 0x82c   : > { %v9029_v47 = vld [vmem:[%s11108_s24 + $0x3c0] sm:$0xf0]  ;;  %v9028_v58 = vor.u32 %v10040_v42, %v9027_v44  ;;  %v10041_v36 = vld [vmem:[%s11108_s24 + $0x3c4] sm:$0xf0]  ;;  %v8963_v60 = vld [vmem:[%s11108_s24 + $0x300] sm:$0xf]  ;;  %v4602_v30 = vunpack.c.l.b16 %v4594_v59  ;;  %v4601_v33 = vunpack.c.l.b16 %v4593_v31 }
 0x82d   : > { %v9032_v15 = vor.u32 %v10032_v49, %v9029_v47  ;;  %v9917_v61 = vld [vmem:[%s11081_s6 + $0x28] sm:$0xff]  ;;  %v9036_v1 = vor.u32 %v10041_v36, %v9035_v41  ;;  %v10024_v51 = vld [vmem:[%s11108_s24 + $0x33c] sm:$0xf0]  ;;  %v9915_v54 = vld [vmem:[%s11081_s6 + $0x18] sm:$0xff] }
 0x82e   : > { %5474 = vmatpush.bf16.msra.mxu1 %v9028_v58  ;;  %v10016_v63 = vld [vmem:[%s11108_s24 + $0x304] sm:$0xf]  ;;  %v8964_v50 = vor.u32 %v10024_v51, %v8963_v60  ;;  %v8971_v2 = vld [vmem:[%s11108_s24 + $0x308] sm:$0xf]  ;;  %v8899_v4 = vld [vmem:[%s11108_s24 + $0x280] sm:$0xf] }
 0x82f   : > { %4657 = vmatpush.bf16.msra.mxu0 %v9918_v57  ;;  %v8965_v48 = vld [vmem:[%s11108_s24 + $0x340] sm:$0xf0]  ;;  %5487 = vmatpush.bf16.msra.mxu2 %v9032_v15  ;;  %v10025_v5 = vld [vmem:[%s11108_s24 + $0x344] sm:$0xf0]  ;;  %v10008_v55 = vld [vmem:[%s11108_s24 + $0x2bc] sm:$0xf0] }
 0x830   : > { %5500 = vmatpush.bf16.msra.mxu3 %v9036_v1  ;;  %v8968_v29 = vor.u32 %v10016_v63, %v8965_v48  ;;  %v8972_v39 = vor.u32 %v10025_v5, %v8971_v2  ;;  %v10000_v43 = vld [vmem:[%s11108_s24 + $0x284] sm:$0xf]  ;;  %v8907_v19 = vld [vmem:[%s11108_s24 + $0x288] sm:$0xf]  ;;  %v9916_v8 = vld [vmem:[%s11081_s6 + $0x20] sm:$0xff]  ;;  %v8900_v45 = vor.u32 %v10008_v55, %v8899_v4  ;;  %v4603_v53 = vrot.slane %v4602_v30, 7 }
 0x831   : > { %v8901_v40 = vld [vmem:[%s11108_s24 + $0x2c0] sm:$0xf0]  ;;  %v10009_v20 = vld [vmem:[%s11108_s24 + $0x2c4] sm:$0xf0]  ;;  %v8835_v62 = vld [vmem:[%s11108_s24 + $0x200] sm:$0xf] }
 0x832   : > { %5475 = vmatpush.bf16.msra.mxu1 %v8964_v50  ;;  %v8904_v11 = vor.u32 %v10000_v43, %v8901_v40  ;;  %v8908_v18 = vor.u32 %v10009_v20, %v8907_v19  ;;  %v9992_v21 = vld [vmem:[%s11108_s24 + $0x23c] sm:$0xf0]  ;;  %v9984_v3 = vld [vmem:[%s11108_s24 + $0x204] sm:$0xf]  ;;  %v8843_v17 = vld [vmem:[%s11108_s24 + $0x208] sm:$0xf]  ;;  %v4605_v1 = vsel %vm4604_vm2, %v4603_v53, %v4601_v33 }
 0x833   : > { %4658 = vmatpush.bf16.msra.mxu0 %v9917_v61  ;;  %5488 = vmatpush.bf16.msra.mxu2 %v8968_v29  ;;  %v8837_v9 = vld [vmem:[%s11108_s24 + $0x240] sm:$0xf0]  ;;  %v9993_v6 = vld [vmem:[%s11108_s24 + $0x244] sm:$0xf0]  ;;  %v8836_v16 = vor.u32 %v9992_v21, %v8835_v62  ;;  %v8771_v24 = vld [vmem:[%s11108_s24 + $0x180] sm:$0xf]  ;;  %v4606_v40 = vpack.c.b16 %v4605_v1, %v4605_v1 }
 0x834   : > { %5501 = vmatpush.bf16.msra.mxu3 %v8972_v39  ;;  %v8840_v0 = vor.u32 %v9984_v3, %v8837_v9  ;;  %v8844_v34 = vor.u32 %v9993_v6, %v8843_v17  ;;  %v9976_v56 = vld [vmem:[%s11108_s24 + $0x1bc] sm:$0xf0]  ;;  %v9968_v28 = vld [vmem:[%s11108_s24 + $0x184] sm:$0xf]  ;;  %v8779_v10 = vld [vmem:[%s11108_s24 + $0x188] sm:$0xf] }
 0x835   : > { %v8773_v14 = vld [vmem:[%s11108_s24 + $0x1c0] sm:$0xf0]  ;;  %v9977_v23 = vld [vmem:[%s11108_s24 + $0x1c4] sm:$0xf0]  ;;  %v9914_v12 = vld [vmem:[%s11081_s6 + $0x10] sm:$0xff]  ;;  %v8772_v32 = vor.u32 %v9976_v56, %v8771_v24 }
 0x836   : > { %5476 = vmatpush.bf16.msra.mxu1 %v8900_v45  ;;  %v8776_v37 = vor.u32 %v9968_v28, %v8773_v14  ;;  %v8780_v27 = vor.u32 %v9977_v23, %v8779_v10  ;;  %v8707_v35 = vld [vmem:[%s11108_s24 + $0x100] sm:$0xf]  ;;  %v9952_v13 = vld [vmem:[%s11108_s24 + $0x104] sm:$0xf]  ;;  %v8715_v26 = vld [vmem:[%s11108_s24 + $0x108] sm:$0xf] }
 0x837   : > { %4659 = vmatpush.bf16.msra.mxu0 %v9916_v8  ;;  %5489 = vmatpush.bf16.msra.mxu2 %v8904_v11  ;;  %v9960_v38 = vld [vmem:[%s11108_s24 + $0x13c] sm:$0xf0]  ;;  %v8709_v46 = vld [vmem:[%s11108_s24 + $0x140] sm:$0xf0]  ;;  %v9961_v22 = vld [vmem:[%s11108_s24 + $0x144] sm:$0xf0] }
 0x838   : > { %5502 = vmatpush.bf16.msra.mxu3 %v8908_v18  ;;  %v9913_v25 = vld [vmem:[%s11081_s6 + $0x8] sm:$0xff]  ;;  %v8708_v52 = vor.u32 %v9960_v38, %v8707_v35  ;;  %v10033_v7 = vld [vmem:[%s11108_s24 + $0x38c] sm:$0xf]  ;;  %v8712_v57 = vor.u32 %v9952_v13, %v8709_v46  ;;  %v8716_v44 = vor.u32 %v9961_v22, %v8715_v26  ;;  %v8643_v42 = vld [vmem:[%s11108_s24 + $0x80] sm:$0xf] }
 0x839   : > { %v9944_v49 = vld [vmem:[%s11108_s24 + $0xbc] sm:$0xf0]  ;;  %v9037_v47 = vld [vmem:[%s11108_s24 + $0x3c8] sm:$0xf0]  ;;  %v9936_v58 = vld [vmem:[%s11108_s24 + $0x84] sm:$0xf] }
 0x83a   : > { %5477 = vmatpush.bf16.msra.mxu1 %v8836_v16  ;;  %v8645_v15 = vld [vmem:[%s11108_s24 + $0xc0] sm:$0xf0]  ;;  %v8651_v41 = vld [vmem:[%s11108_s24 + $0x88] sm:$0xf]  ;;  %v9912_v61 = vld [vmem:[%s11081_s6] sm:$0xff]  ;;  %v8644_v63 = vor.u32 %v9944_v49, %v8643_v42  ;;  %v9040_v48 = vor.u32 %v10033_v7, %v9037_v47 }
 0x83b   : > { %4660 = vmatpush.bf16.msra.mxu0 %v9915_v54  ;;  %5490 = vmatpush.bf16.msra.mxu2 %v8840_v0  ;;  %v9945_v36 = vld [vmem:[%s11108_s24 + $0xc4] sm:$0xf0]  ;;  %v10017_v60 = vld [vmem:[%s11108_s24 + $0x30c] sm:$0xf]  ;;  %v8648_v50 = vor.u32 %v9936_v58, %v8645_v15  ;;  %v8579_v29 = vld [vmem:[%s11108_s24] sm:$0xf] }
 0x83c   : > { %5503 = vmatpush.bf16.msra.mxu3 %v8844_v34  ;;  %v8973_v51 = vld [vmem:[%s11108_s24 + $0x348] sm:$0xf0]  ;;  %v9928_v2 = vld [vmem:[%s11108_s24 + $0x3c] sm:$0xf0]  ;;  %v9920_v5 = vld [vmem:[%s11108_s24 + $0x4] sm:$0xf]  ;;  %v8652_v39 = vor.u32 %v9945_v36, %v8651_v41 }
 0x83d   : > { %v8581_v4 = vld [vmem:[%s11108_s24 + $0x40] sm:$0xf0]  ;;  %v8587_v55 = vld [vmem:[%s11108_s24 + $0x8] sm:$0xf]  ;;  %v9043_v19 = vld [vmem:[%s11108_s24 + $0x390] sm:$0xf]  ;;  %v8580_v20 = vor.u32 %v9928_v2, %v8579_v29  ;;  %v8976_v21 = vor.u32 %v10017_v60, %v8973_v51 }
 0x83e   : > { %5478 = vmatpush.bf16.msra.mxu1 %v8772_v32  ;;  %v9929_v43 = vld [vmem:[%s11108_s24 + $0x44] sm:$0xf0]  ;;  %v10042_v8 = vld [vmem:[%s11108_s24 + $0x3cc] sm:$0xf0]  ;;  %v10034_v45 = vld [vmem:[%s11108_s24 + $0x394] sm:$0xf]  ;;  %v8584_v3 = vor.u32 %v9920_v5, %v8581_v4 }
 0x83f   : > { %4661 = vmatpush.bf16.msra.mxu0 %v9914_v12  ;;  %5491 = vmatpush.bf16.msra.mxu2 %v8776_v37  ;;  %v9045_v11 = vld [vmem:[%s11108_s24 + $0x3d0] sm:$0xf0]  ;;  %v9051_v18 = vld [vmem:[%s11108_s24 + $0x398] sm:$0xf]  ;;  %v10001_v9 = vld [vmem:[%s11108_s24 + $0x28c] sm:$0xf]  ;;  %v8588_v6 = vor.u32 %v9929_v43, %v8587_v55  ;;  %v9044_v59 = vor.u32 %v10042_v8, %v9043_v19 }
 0x840   : > { %5504 = vmatpush.bf16.msra.mxu3 %v8780_v27  ;;  %v10043_v62 = vld [vmem:[%s11108_s24 + $0x3d4] sm:$0xf0]  ;;  %v8909_v17 = vld [vmem:[%s11108_s24 + $0x2c8] sm:$0xf0]  ;;  %v9048_v54 = vor.u32 %v10034_v45, %v9045_v11  ;;  %v8979_v0 = vld [vmem:[%s11108_s24 + $0x310] sm:$0xf] }
 0x841   : > { %v9052_v16 = vor.u32 %v10043_v62, %v9051_v18  ;;  %v10026_v34 = vld [vmem:[%s11108_s24 + $0x34c] sm:$0xf0]  ;;  %v10018_v24 = vld [vmem:[%s11108_s24 + $0x314] sm:$0xf]  ;;  %v8987_v28 = vld [vmem:[%s11108_s24 + $0x318] sm:$0xf]  ;;  %v8912_v10 = vor.u32 %v10001_v9, %v8909_v17 }
 0x842   : > { %5479 = vmatpush.bf16.msra.mxu1 %v8708_v52  ;;  %v8981_v56 = vld [vmem:[%s11108_s24 + $0x350] sm:$0xf0]  ;;  %v10027_v14 = vld [vmem:[%s11108_s24 + $0x354] sm:$0xf0]  ;;  %v9985_v23 = vld [vmem:[%s11108_s24 + $0x20c] sm:$0xf]  ;;  %v8980_v12 = vor.u32 %v10026_v34, %v8979_v0 }
 0x843   : > { %4662 = vmatpush.bf16.msra.mxu0 %v9913_v25  ;;  %5492 = vmatpush.bf16.msra.mxu2 %v8712_v57  ;;  %v8845_v30 = vld [vmem:[%s11108_s24 + $0x248] sm:$0xf0]  ;;  %v8984_v31 = vor.u32 %v10018_v24, %v8981_v56  ;;  %v8988_v32 = vor.u32 %v10027_v14, %v8987_v28  ;;  %v8915_v37 = vld [vmem:[%s11108_s24 + $0x290] sm:$0xf]  ;;  %v10002_v35 = vld [vmem:[%s11108_s24 + $0x294] sm:$0xf] }
 0x844   : > { %5505 = vmatpush.bf16.msra.mxu3 %v8716_v44  ;;  %v10010_v27 = vld [vmem:[%s11108_s24 + $0x2cc] sm:$0xf0]  ;;  %v8917_v38 = vld [vmem:[%s11108_s24 + $0x2d0] sm:$0xf0]  ;;  %v8923_v13 = vld [vmem:[%s11108_s24 + $0x298] sm:$0xf]  ;;  %v8848_v26 = vor.u32 %v9985_v23, %v8845_v30 }
 0x845   : > { %v10011_v46 = vld [vmem:[%s11108_s24 + $0x2d4] sm:$0xf0]  ;;  %v9969_v22 = vld [vmem:[%s11108_s24 + $0x18c] sm:$0xf]  ;;  %v8916_v53 = vor.u32 %v10010_v27, %v8915_v37  ;;  %v8920_v33 = vor.u32 %v10002_v35, %v8917_v38  ;;  %v8851_v7 = vld [vmem:[%s11108_s24 + $0x210] sm:$0xf] }
 0x846   : > { %5480 = vmatpush.bf16.msra.mxu1 %v8644_v63  ;;  %v8781_v25 = vld [vmem:[%s11108_s24 + $0x1c8] sm:$0xf0]  ;;  %v8924_v52 = vor.u32 %v10011_v46, %v8923_v13  ;;  %v9994_v57 = vld [vmem:[%s11108_s24 + $0x24c] sm:$0xf0]  ;;  %v9986_v44 = vld [vmem:[%s11108_s24 + $0x214] sm:$0xf] }
 0x847   : > { %4663 = vmatpush.bf16.msra.mxu0 %v9912_v61  ;;  %5493 = vmatpush.bf16.msra.mxu2 %v8648_v50  ;;  %v8853_v42 = vld [vmem:[%s11108_s24 + $0x250] sm:$0xf0]  ;;  %v8859_v49 = vld [vmem:[%s11108_s24 + $0x218] sm:$0xf]  ;;  %v8784_v58 = vor.u32 %v9969_v22, %v8781_v25  ;;  %v9953_v15 = vld [vmem:[%s11108_s24 + $0x10c] sm:$0xf]  ;;  %v8852_v36 = vor.u32 %v9994_v57, %v8851_v7 }
 0x848   : > { %5506 = vmatpush.bf16.msra.mxu3 %v8652_v39  ;;  %v9995_v47 = vld [vmem:[%s11108_s24 + $0x254] sm:$0xf0]  ;;  %v8717_v41 = vld [vmem:[%s11108_s24 + $0x148] sm:$0xf0]  ;;  %v8856_v61 = vor.u32 %v9986_v44, %v8853_v42  ;;  %v8787_v60 = vld [vmem:[%s11108_s24 + $0x190] sm:$0xf] }
 0x849   : > { %v8860_v1 = vor.u32 %v9995_v47, %v8859_v49  ;;  %v9978_v51 = vld [vmem:[%s11108_s24 + $0x1cc] sm:$0xf0]  ;;  %v9970_v63 = vld [vmem:[%s11108_s24 + $0x194] sm:$0xf]  ;;  %v8795_v50 = vld [vmem:[%s11108_s24 + $0x198] sm:$0xf]  ;;  %v8720_v2 = vor.u32 %v9953_v15, %v8717_v41 }
 0x84a   : > { %4664 = vmatmul.bf16.vlgmr.msra.gmra.mxu0 %v4606_v40  ;;  %5481 = vmatpush.bf16.msra.mxu1 %v8580_v20  ;;  %v9979_v29 = vld [vmem:[%s11108_s24 + $0x1d4] sm:$0xf0]  ;;  %v9937_v5 = vld [vmem:[%s11108_s24 + $0x8c] sm:$0xf]  ;;  %v8788_v4 = vor.u32 %v9978_v51, %v8787_v60  ;;  %v8723_v40 = vld [vmem:[%s11108_s24 + $0x110] sm:$0xf] }
 0x84b   : > { %5513 = vmatpush.bf16.msrb.mxu0 %v9040_v48  ;;  %5494 = vmatpush.bf16.msra.mxu2 %v8584_v3  ;;  %v8789_v48 = vld [vmem:[%s11108_s24 + $0x1d0] sm:$0xf0]  ;;  %v8653_v39 = vld [vmem:[%s11108_s24 + $0xc8] sm:$0xf0]  ;;  %v8796_v43 = vor.u32 %v9979_v29, %v8795_v50  ;;  %v9962_v19 = vld [vmem:[%s11108_s24 + $0x14c] sm:$0xf0] }
 0x84c   : > { %5507 = vmatpush.bf16.msra.mxu3 %v8588_v6  ;;  %v8792_v55 = vor.u32 %v9970_v63, %v8789_v48  ;;  %v9954_v8 = vld [vmem:[%s11108_s24 + $0x114] sm:$0xf]  ;;  %v8731_v20 = vld [vmem:[%s11108_s24 + $0x118] sm:$0xf]  ;;  %v8656_v18 = vor.u32 %v9937_v5, %v8653_v39  ;;  %v9921_v62 = vld [vmem:[%s11108_s24 + $0xc] sm:$0xf]  ;;  %v8724_v3 = vor.u32 %v9962_v19, %v8723_v40 }
 0x84d   : > { %v8725_v45 = vld [vmem:[%s11108_s24 + $0x150] sm:$0xf0]  ;;  %v9963_v11 = vld [vmem:[%s11108_s24 + $0x154] sm:$0xf0]  ;;  %v10035_v9 = vld [vmem:[%s11108_s24 + $0x39c] sm:$0xf] }
 0x84e   : > { %5526 = vmatpush.bf16.msrb.mxu1 %v9044_v59  ;;  %v9053_v17 = vld [vmem:[%s11108_s24 + $0x3d8] sm:$0xf0]  ;;  %v8728_v6 = vor.u32 %v9954_v8, %v8725_v45  ;;  %v8732_v59 = vor.u32 %v9963_v11, %v8731_v20  ;;  %v8659_v38 = vld [vmem:[%s11108_s24 + $0x90] sm:$0xf]  ;;  %v9938_v46 = vld [vmem:[%s11108_s24 + $0x94] sm:$0xf] }
 0x84f   : > { %5514 = vmatpush.bf16.msrb.mxu0 %v8976_v21  ;;  %5539 = vmatpush.bf16.msrb.mxu2 %v9048_v54  ;;  %v8589_v21 = vld [vmem:[%s11108_s24 + $0x48] sm:$0xf0]  ;;  %v10019_v0 = vld [vmem:[%s11108_s24 + $0x31c] sm:$0xf]  ;;  %v9946_v13 = vld [vmem:[%s11108_s24 + $0xcc] sm:$0xf0] }
 0x850   : > { %5552 = vmatpush.bf16.msrb.mxu3 %v9052_v16  ;;  %v8592_v54 = vor.u32 %v9921_v62, %v8589_v21  ;;  %v9056_v16 = vor.u32 %v10035_v9, %v9053_v17  ;;  %v8989_v34 = vld [vmem:[%s11108_s24 + $0x358] sm:$0xf0]  ;;  %v8661_v22 = vld [vmem:[%s11108_s24 + $0xd0] sm:$0xf0]  ;;  %v8667_v25 = vld [vmem:[%s11108_s24 + $0x98] sm:$0xf] }
 0x851   : > { %v8992_v24 = vor.u32 %v10019_v0, %v8989_v34  ;;  %v10003_v56 = vld [vmem:[%s11108_s24 + $0x29c] sm:$0xf]  ;;  %v8595_v42 = vld [vmem:[%s11108_s24 + $0x10] sm:$0xf]  ;;  %v9922_v47 = vld [vmem:[%s11108_s24 + $0x14] sm:$0xf] }
 0x852   : > { %5527 = vmatpush.bf16.msrb.mxu1 %v8980_v12  ;;  %v8925_v28 = vld [vmem:[%s11108_s24 + $0x2d8] sm:$0xf0]  ;;  %v9930_v49 = vld [vmem:[%s11108_s24 + $0x4c] sm:$0xf0]  ;;  %v8597_v15 = vld [vmem:[%s11108_s24 + $0x50] sm:$0xf0] }
 0x853   : > { %5515 = vmatpush.bf16.msrb.mxu0 %v8912_v10  ;;  %5540 = vmatpush.bf16.msrb.mxu2 %v8984_v31  ;;  %v8928_v14 = vor.u32 %v10003_v56, %v8925_v28  ;;  %v9987_v10 = vld [vmem:[%s11108_s24 + $0x21c] sm:$0xf]  ;;  %v8603_v41 = vld [vmem:[%s11108_s24 + $0x18] sm:$0xf]  ;;  %v9059_v50 = vld [vmem:[%s11108_s24 + $0x3a0] sm:$0xf] }
 0x854   : > { %5553 = vmatpush.bf16.msrb.mxu3 %v8988_v32  ;;  %v8861_v23 = vld [vmem:[%s11108_s24 + $0x258] sm:$0xf0]  ;;  %v10044_v29 = vld [vmem:[%s11108_s24 + $0x3dc] sm:$0xf0]  ;;  %v10036_v5 = vld [vmem:[%s11108_s24 + $0x3a4] sm:$0xf] }
 0x855   : > { %v8864_v30 = vor.u32 %v9987_v10, %v8861_v23  ;;  %v9971_v12 = vld [vmem:[%s11108_s24 + $0x19c] sm:$0xf]  ;;  %v9061_v39 = vld [vmem:[%s11108_s24 + $0x3e0] sm:$0xf0]  ;;  %v10037_v40 = vld [vmem:[%s11108_s24 + $0x3ac] sm:$0xf]  ;;  %v9060_v45 = vor.u32 %v10044_v29, %v9059_v50 }
 0x856   : > { %5528 = vmatpush.bf16.msrb.mxu1 %v8916_v53  ;;  %v8797_v31 = vld [vmem:[%s11108_s24 + $0x1d8] sm:$0xf0]  ;;  %v9947_v53 = vld [vmem:[%s11108_s24 + $0xd4] sm:$0xf0]  ;;  %v9069_v19 = vld [vmem:[%s11108_s24 + $0x3e8] sm:$0xf0]  ;;  %v9064_v20 = vor.u32 %v10036_v5, %v9061_v39 }
 0x857   : > { %5516 = vmatpush.bf16.msrb.mxu0 %v8848_v26  ;;  %5541 = vmatpush.bf16.msrb.mxu2 %v8920_v33  ;;  %v8800_v32 = vor.u32 %v9971_v12, %v8797_v31  ;;  %v9955_v37 = vld [vmem:[%s11108_s24 + $0x11c] sm:$0xf]  ;;  %v8660_v26 = vor.u32 %v9946_v13, %v8659_v38  ;;  %v8664_v33 = vor.u32 %v9938_v46, %v8661_v22  ;;  %v8995_v11 = vld [vmem:[%s11108_s24 + $0x320] sm:$0xf]  ;;  %v8997_v9 = vld [vmem:[%s11108_s24 + $0x360] sm:$0xf0] }
 0x858   : > { %5554 = vmatpush.bf16.msrb.mxu3 %v8924_v52  ;;  %v8733_v27 = vld [vmem:[%s11108_s24 + $0x158] sm:$0xf0]  ;;  %v8668_v52 = vor.u32 %v9947_v53, %v8667_v25  ;;  %v9072_v21 = vor.u32 %v10037_v40, %v9069_v19  ;;  %v9003_v17 = vld [vmem:[%s11108_s24 + $0x328] sm:$0xf]  ;;  %v8931_v34 = vld [vmem:[%s11108_s24 + $0x2a0] sm:$0xf] }
 0x859   : > { %v8736_v35 = vor.u32 %v9955_v37, %v8733_v27  ;;  %v9939_v7 = vld [vmem:[%s11108_s24 + $0x9c] sm:$0xf]  ;;  %v10004_v10 = vld [vmem:[%s11108_s24 + $0x2a4] sm:$0xf]  ;;  %v10013_v12 = vld [vmem:[%s11108_s24 + $0x2e4] sm:$0xf0] }
 0x85a   : > { %5529 = vmatpush.bf16.msrb.mxu1 %v8852_v36  ;;  %v8669_v57 = vld [vmem:[%s11108_s24 + $0xd8] sm:$0xf0]  ;;  %v9931_v36 = vld [vmem:[%s11108_s24 + $0x54] sm:$0xf0]  ;;  %v8933_v23 = vld [vmem:[%s11108_s24 + $0x2e0] sm:$0xf0] }
 0x85b   : > { %5517 = vmatpush.bf16.msrb.mxu0 %v8784_v58  ;;  %5542 = vmatpush.bf16.msrb.mxu2 %v8856_v61  ;;  %v8672_v44 = vor.u32 %v9939_v7, %v8669_v57  ;;  %v8596_v58 = vor.u32 %v9930_v49, %v8595_v42  ;;  %v8600_v61 = vor.u32 %v9922_v47, %v8597_v15  ;;  %v9923_v60 = vld [vmem:[%s11108_s24 + $0x1c] sm:$0xf]  ;;  %v10005_v31 = vld [vmem:[%s11108_s24 + $0x2ac] sm:$0xf]  ;;  %v9996_v38 = vld [vmem:[%s11108_s24 + $0x25c] sm:$0xf0] }
 0x85c   : > { %5555 = vmatpush.bf16.msrb.mxu3 %v8860_v1  ;;  %v8604_v1 = vor.u32 %v9931_v36, %v8603_v41  ;;  %v8605_v51 = vld [vmem:[%s11108_s24 + $0x58] sm:$0xf0]  ;;  %v8936_v27 = vor.u32 %v10004_v10, %v8933_v23  ;;  %v8869_v22 = vld [vmem:[%s11108_s24 + $0x260] sm:$0xf0]  ;;  %v8875_v25 = vld [vmem:[%s11108_s24 + $0x228] sm:$0xf] }
 0x85d   : > { %v8608_v63 = vor.u32 %v9923_v60, %v8605_v51  ;;  %v10377_v48 = vld [vmem:[%s11087_s2] ss:$0 sm:$0xff]  ;;  %v9997_v53 = vld [vmem:[%s11108_s24 + $0x264] sm:$0xf0]  ;;  %v9980_v42 = vld [vmem:[%s11108_s24 + $0x1dc] sm:$0xf0] }
 0x85e   : > { %5530 = vmatpush.bf16.msrb.mxu1 %v8788_v4  ;;  %v9067_v4 = vld [vmem:[%s11108_s24 + $0x3a8] sm:$0xf]  ;;  %v8876_v49 = vor.u32 %v9997_v53, %v8875_v25  ;;  %v8805_v15 = vld [vmem:[%s11108_s24 + $0x1e0] sm:$0xf0]  ;;  %v8749_v40 = vld [vmem:[%s11108_s24 + $0x168] sm:$0xf0] }
 0x85f   : > { %5518 = vmatpush.bf16.msrb.mxu0 %v8720_v2  ;;  %5543 = vmatpush.bf16.msrb.mxu2 %v8792_v55  ;;  %v8811_v41 = vld [vmem:[%s11108_s24 + $0x1a8] sm:$0xf]  ;;  %v8741_v5 = vld [vmem:[%s11108_s24 + $0x160] sm:$0xf0] }
 0x860   : > { %5556 = vmatpush.bf16.msrb.mxu3 %v8796_v43  ;;  %v10045_v43 = vld [vmem:[%s11108_s24 + $0x3e4] sm:$0xf0] }
 0x861   : > { %v9068_v62 = vor.u32 %v10045_v43, %v9067_v4  ;;  %v9981_v36 = vld [vmem:[%s11108_s24 + $0x1e4] sm:$0xf0]  ;;  %v9957_v43 = vld [vmem:[%s11108_s24 + $0x12c] sm:$0xf] }
 0x862   : > { %5531 = vmatpush.bf16.msrb.mxu1 %v8724_v3  ;;  %v10020_v3 = vld [vmem:[%s11108_s24 + $0x324] sm:$0xf]  ;;  %v8812_v50 = vor.u32 %v9981_v36, %v8811_v41  ;;  %v8747_v39 = vld [vmem:[%s11108_s24 + $0x128] sm:$0xf]  ;;  %v10023_v41 = vld [vmem:[%s11108_s24 + $0x33c] sm:$0xf] }
 0x863   : > { %5519 = vmatpush.bf16.msrb.mxu0 %v8656_v18  ;;  %5544 = vmatpush.bf16.msrb.mxu2 %v8728_v6  ;;  %v10028_v18 = vld [vmem:[%s11108_s24 + $0x35c] sm:$0xf0]  ;;  %v10029_v6 = vld [vmem:[%s11108_s24 + $0x364] sm:$0xf0]  ;;  %v9000_v0 = vor.u32 %v10020_v3, %v8997_v9  ;;  %v8677_v3 = vld [vmem:[%s11108_s24 + $0xe0] sm:$0xf0] }
 0x864   : > { %5557 = vmatpush.bf16.msrb.mxu3 %v8732_v59  ;;  %v10021_v59 = vld [vmem:[%s11108_s24 + $0x32c] sm:$0xf]  ;;  %v9004_v28 = vor.u32 %v10029_v6, %v9003_v17  ;;  %v9965_v4 = vld [vmem:[%s11108_s24 + $0x164] sm:$0xf0]  ;;  %v9021_v36 = vld [vmem:[%s11108_s24 + $0x378] sm:$0xf0] }
 0x865   : > { %v8683_v9 = vld [vmem:[%s11108_s24 + $0xa8] sm:$0xf]  ;;  %v9941_v6 = vld [vmem:[%s11108_s24 + $0xac] sm:$0xf] }
 0x866   : > { %5532 = vmatpush.bf16.msrb.mxu1 %v8660_v26  ;;  %v9988_v26 = vld [vmem:[%s11108_s24 + $0x224] sm:$0xf]  ;;  %v9949_v17 = vld [vmem:[%s11108_s24 + $0xe4] sm:$0xf0] }
 0x867   : > { %5520 = vmatpush.bf16.msrb.mxu0 %v8592_v54  ;;  %5545 = vmatpush.bf16.msrb.mxu2 %v8664_v33  ;;  %v9005_v54 = vld [vmem:[%s11108_s24 + $0x368] sm:$0xf0]  ;;  %v8872_v57 = vor.u32 %v9988_v26, %v8869_v22  ;;  %v8619_v10 = vld [vmem:[%s11108_s24 + $0x28] sm:$0xf]  ;;  %v10039_v26 = vld [vmem:[%s11108_s24 + $0x3bc] sm:$0xf] }
 0x868   : > { %5558 = vmatpush.bf16.msrb.mxu3 %v8668_v52  ;;  %v9989_v33 = vld [vmem:[%s11108_s24 + $0x22c] sm:$0xf]  ;;  %v9933_v23 = vld [vmem:[%s11108_s24 + $0x64] sm:$0xf0]  ;;  %v9085_v22 = vld [vmem:[%s11108_s24 + $0x3f8] sm:$0xf0] }
 0x869   : > { %v8877_v52 = vld [vmem:[%s11108_s24 + $0x268] sm:$0xf0]  ;;  %v8620_v25 = vor.u32 %v9933_v23, %v8619_v10  ;;  %v9975_v10 = vld [vmem:[%s11108_s24 + $0x1bc] sm:$0xf] }
 0x86a   : > { %5533 = vmatpush.bf16.msrb.mxu1 %v8596_v58  ;;  %v8880_v47 = vor.u32 %v9989_v33, %v8877_v52  ;;  %v9972_v58 = vld [vmem:[%s11108_s24 + $0x1a4] sm:$0xf]  ;;  %v8829_v23 = vld [vmem:[%s11108_s24 + $0x1f8] sm:$0xf0] }
 0x86b   : > { %5565 = vmatpush.bf16.msra.mxu0 %v9056_v16  ;;  %5546 = vmatpush.bf16.msrb.mxu2 %v8600_v61  ;;  %v8996_v16 = vor.u32 %v10028_v18, %v8995_v11  ;;  %v9973_v61 = vld [vmem:[%s11108_s24 + $0x1ac] sm:$0xf]  ;;  %v8808_v51 = vor.u32 %v9972_v58, %v8805_v15  ;;  %v9948_v11 = vld [vmem:[%s11108_s24 + $0xdc] sm:$0xf0]  ;;  %v8748_v18 = vor.u32 %v9965_v4, %v8747_v39  ;;  %v9019_v58 = vld [vmem:[%s11108_s24 + $0x338] sm:$0xf] }
 0x86c   : > { %5559 = vmatpush.bf16.msrb.mxu3 %v8604_v1  ;;  %v8813_v1 = vld [vmem:[%s11108_s24 + $0x1e8] sm:$0xf0]  ;;  %v10031_v15 = vld [vmem:[%s11108_s24 + $0x374] sm:$0xf0]  ;;  %v10007_v39 = vld [vmem:[%s11108_s24 + $0x2bc] sm:$0xf] }
 0x86d   : > { %v8816_v29 = vor.u32 %v9973_v61, %v8813_v1  ;;  %v8957_v4 = vld [vmem:[%s11108_s24 + $0x2f8] sm:$0xf0] }
 0x86f   : > { %5566 = vmatpush.bf16.msra.mxu0 %v8992_v24  ;;  %v10012_v24 = vld [vmem:[%s11108_s24 + $0x2dc] sm:$0xf0] }
 0x870   : > { %v8932_v37 = vor.u32 %v10012_v24, %v8931_v34  ;;  %v9932_v34 = vld [vmem:[%s11108_s24 + $0x5c] sm:$0xf0]  ;;  %v9924_v24 = vld [vmem:[%s11108_s24 + $0x24] sm:$0xf] }
 0x873   : > { %5567 = vmatpush.bf16.msra.mxu0 %v8928_v14  ;;  %v9008_v14 = vor.u32 %v10021_v59, %v9005_v54  ;;  %v8685_v59 = vld [vmem:[%s11108_s24 + $0xe8] sm:$0xf0]  ;;  %v8611_v54 = vld [vmem:[%s11108_s24 + $0x20] sm:$0xf] }
 0x877   : > { %5568 = vmatpush.bf16.msra.mxu0 %v8864_v30  ;;  %v8939_v30 = vld [vmem:[%s11108_s24 + $0x2a8] sm:$0xf] }
 0x878   : > { %v8940_v13 = vor.u32 %v10013_v12, %v8939_v30  ;;  %v9925_v30 = vld [vmem:[%s11108_s24 + $0x2c] sm:$0xf] }
 0x879   : > { %v8621_v12 = vld [vmem:[%s11108_s24 + $0x68] sm:$0xf0] }
 0x87a   : > { %v8624_v53 = vor.u32 %v9925_v30, %v8621_v12 }
 0x87b   : > { %5569 = vmatpush.bf16.msra.mxu0 %v8800_v32  ;;  %v8941_v32 = vld [vmem:[%s11108_s24 + $0x2e8] sm:$0xf0] }
 0x87c   : > { %v8944_v46 = vor.u32 %v10005_v31, %v8941_v32  ;;  %v9075_v31 = vld [vmem:[%s11108_s24 + $0x3b0] sm:$0xf] }
 0x87d   : > { %v10046_v32 = vld [vmem:[%s11108_s24 + $0x3ec] sm:$0xf0] }
 0x87e   : > { %v9076_v33 = vor.u32 %v10046_v32, %v9075_v31  ;;  %v8755_v31 = vld [vmem:[%s11108_s24 + $0x130] sm:$0xf] }
 0x87f   : > { %5570 = vmatpush.bf16.msra.mxu0 %v8736_v35  ;;  %v8867_v35 = vld [vmem:[%s11108_s24 + $0x220] sm:$0xf]  ;;  %v9966_v32 = vld [vmem:[%s11108_s24 + $0x16c] sm:$0xf0] }
 0x880   : > { %v8868_v7 = vor.u32 %v9996_v38, %v8867_v35  ;;  %v9083_v35 = vld [vmem:[%s11108_s24 + $0x3b8] sm:$0xf]  ;;  %v8612_v38 = vor.u32 %v9932_v34, %v8611_v54  ;;  %v8819_v54 = vld [vmem:[%s11108_s24 + $0x1b0] sm:$0xf] }
 0x883   : > { %5571 = vmatpush.bf16.msra.mxu0 %v8672_v44  ;;  %v8803_v44 = vld [vmem:[%s11108_s24 + $0x1a0] sm:$0xf] }
 0x884   : > { %v8804_v60 = vor.u32 %v9980_v42, %v8803_v44  ;;  %v9088_v42 = vor.u32 %v10039_v26, %v9085_v22  ;;  %v9959_v26 = vld [vmem:[%s11108_s24 + $0x13c] sm:$0xf] }
 0x885   : > { %v8765_v22 = vld [vmem:[%s11108_s24 + $0x178] sm:$0xf0] }
 0x887   : > { %5572 = vmatpush.bf16.msra.mxu0 %v8608_v63  ;;  %v8739_v63 = vld [vmem:[%s11108_s24 + $0x120] sm:$0xf] }
 0x8c7   : > { %v4665_v2 = vpop.f32.mrf.mxu0 }
 0x8c8   : > { %v12065_v55 = vadd.f32 %v10377_v48, %v4665_v2  ;;  %v9964_v48 = vld [vmem:[%s11108_s24 + $0x15c] sm:$0xf0]  ;;  %v9956_v2 = vld [vmem:[%s11108_s24 + $0x124] sm:$0xf] }
 0x8c9   : > { %v8740_v19 = vor.u32 %v9964_v48, %v8739_v63  ;;  %v9020_v63 = vor.u32 %v10031_v15, %v9019_v58  ;;  %v9024_v48 = vor.u32 %v10023_v41, %v9021_v36  ;;  %v9943_v58 = vld [vmem:[%s11108_s24 + $0xbc] sm:$0xf] }
 0x8ca   : > { %v12072_v8 = vpack.c.bf16 %v12065_v55, %v12065_v55  ;;  %v8701_v15 = vld [vmem:[%s11108_s24 + $0xf8] sm:$0xf0] }
 0x8cc   : > { %5482 = vmatmul.bf16.vlgmr.msra.gmra.mxu1 %v12072_v8  ;;  %5495 = vmatmul.bf16.vlgmr.msra.gmra.mxu2 %v12072_v8 }
 0x8cd   : > { %5508 = vmatmul.bf16.vlgmr.msra.gmra.mxu3 %v12072_v8  ;;  %5521 = vmatmul.bf16.vlgmr.msrb.gmra.mxu0 %v12072_v8 }
 0x8ce   : > { %5578 = vmatpush.bf16.msra.mxu1 %v9060_v45  ;;  %5591 = vmatpush.bf16.msra.mxu2 %v9064_v20  ;;  %v8744_v45 = vor.u32 %v9956_v2, %v8741_v5  ;;  %v8675_v20 = vld [vmem:[%s11108_s24 + $0xa0] sm:$0xf]  ;;  %v8955_v2 = vld [vmem:[%s11108_s24 + $0x2b8] sm:$0xf] }
 0x8cf   : > { %5604 = vmatpush.bf16.msra.mxu3 %v9068_v62  ;;  %5617 = vmatpush.bf16.msrb.mxu0 %v9072_v21  ;;  %v4667_v56 = vpop.f32.mrf.mxu0  ;;  %v8752_v62 = vor.u32 %v9957_v43, %v8749_v40  ;;  %v9940_v21 = vld [vmem:[%s11108_s24 + $0xa4] sm:$0xf]  ;;  %v10015_v5 = vld [vmem:[%s11108_s24 + $0x2f4] sm:$0xf0] }
 0x8d0   : > { %v8613_v56 = vld [vmem:[%s11108_s24 + $0x60] sm:$0xf0] }
 0x8d2   : > { %5579 = vmatpush.bf16.msra.mxu1 %v8996_v16  ;;  %5592 = vmatpush.bf16.msra.mxu2 %v9000_v0  ;;  %v8676_v16 = vor.u32 %v9948_v11, %v8675_v20  ;;  %v8680_v0 = vor.u32 %v9940_v21, %v8677_v3  ;;  %v8956_v20 = vor.u32 %v10015_v5, %v8955_v2  ;;  %v8891_v21 = vld [vmem:[%s11108_s24 + $0x238] sm:$0xf]  ;;  %v9927_v2 = vld [vmem:[%s11108_s24 + $0x3c] sm:$0xf] }
 0x8d3   : > { %5605 = vmatpush.bf16.msra.mxu3 %v9004_v28  ;;  %5618 = vmatpush.bf16.msrb.mxu0 %v9008_v14  ;;  %v8684_v28 = vor.u32 %v9949_v17, %v8683_v9  ;;  %v8688_v14 = vor.u32 %v9941_v6, %v8685_v59  ;;  %v8960_v11 = vor.u32 %v10007_v39, %v8957_v4  ;;  %v9999_v3 = vld [vmem:[%s11108_s24 + $0x274] sm:$0xf0]  ;;  %v9991_v9 = vld [vmem:[%s11108_s24 + $0x23c] sm:$0xf] }
 0x8d4   : > { %v8893_v17 = vld [vmem:[%s11108_s24 + $0x278] sm:$0xf0] }
 0x8d5   : > { %v8896_v34 = vor.u32 %v9991_v9, %v8893_v17  ;;  %v8637_v5 = vld [vmem:[%s11108_s24 + $0x78] sm:$0xf0]  ;;  %v10053_v9 = vld [vmem:[%s11110_s11 + $0x28] sm:$0xff] }
 0x8d6   : > { %5580 = vmatpush.bf16.msra.mxu1 %v8932_v37  ;;  %5593 = vmatpush.bf16.msra.mxu2 %v8936_v27  ;;  %v10038_v37 = vld [vmem:[%s11108_s24 + $0x3b4] sm:$0xf]  ;;  %v10077_v17 = vld [vmem:[%s11110_s11 + $0xe8] sm:$0xff] }
 0x8d7   : > { %5606 = vmatpush.bf16.msra.mxu3 %v8940_v13  ;;  %5619 = vmatpush.bf16.msrb.mxu0 %v8944_v46  ;;  %v9077_v27 = vld [vmem:[%s11108_s24 + $0x3f0] sm:$0xf0]  ;;  %v8616_v13 = vor.u32 %v9924_v24, %v8613_v56  ;;  %v10047_v46 = vld [vmem:[%s11108_s24 + $0x3f4] sm:$0xf0] }
 0x8d8   : > { %v9080_v52 = vor.u32 %v10038_v37, %v9077_v27  ;;  %v9084_v44 = vor.u32 %v10047_v46, %v9083_v35  ;;  %v9974_v24 = vld [vmem:[%s11108_s24 + $0x1b4] sm:$0xf]  ;;  %v8832_v27 = vor.u32 %v9975_v10, %v8829_v23  ;;  %v9967_v46 = vld [vmem:[%s11108_s24 + $0x174] sm:$0xf0] }
 0x8d9   : > { %v8821_v56 = vld [vmem:[%s11108_s24 + $0x1f0] sm:$0xf0] }
 0x8da   : > { %5581 = vmatpush.bf16.msra.mxu1 %v8868_v7  ;;  %5594 = vmatpush.bf16.msra.mxu2 %v8872_v57  ;;  %v9011_v7 = vld [vmem:[%s11108_s24 + $0x330] sm:$0xf]  ;;  %v8824_v12 = vor.u32 %v9974_v24, %v8821_v56  ;;  %v9958_v35 = vld [vmem:[%s11108_s24 + $0x134] sm:$0xf]  ;;  %v10075_v24 = vld [vmem:[%s11110_s11 + $0xd8] sm:$0xff] }
 0x8db   : > { %5607 = vmatpush.bf16.msra.mxu3 %v8876_v49  ;;  %5620 = vmatpush.bf16.msrb.mxu0 %v8880_v47  ;;  %v10030_v57 = vld [vmem:[%s11108_s24 + $0x36c] sm:$0xf0]  ;;  %v10022_v49 = vld [vmem:[%s11108_s24 + $0x334] sm:$0xf]  ;;  %v10059_v56 = vld [vmem:[%s11110_s11 + $0x58] sm:$0xff] }
 0x8dc   : > { %5534 = vmatmul.bf16.vlgmr.msrb.gmra.mxu1 %v12072_v8  ;;  %5547 = vmatmul.bf16.vlgmr.msrb.gmra.mxu2 %v12072_v8  ;;  %v9013_v47 = vld [vmem:[%s11108_s24 + $0x370] sm:$0xf0]  ;;  %v9012_v61 = vor.u32 %v10030_v57, %v9011_v7  ;;  %v8768_v57 = vor.u32 %v9959_v26, %v8765_v22  ;;  %v10064_v26 = vld [vmem:[%s11110_s11 + $0x80] sm:$0xff]  ;;  %v10095_v22 = vld [vmem:[%s11110_s11 + $0x178] sm:$0xff] }
 0x8dd   : > { %5560 = vmatmul.bf16.vlgmr.msrb.gmra.mxu3 %v12072_v8  ;;  %5573 = vmatmul.bf16.vlgmr.msra.gmra.mxu0 %v12072_v8  ;;  %v9016_v1 = vor.u32 %v10022_v49, %v9013_v47  ;;  %v8699_v49 = vld [vmem:[%s11108_s24 + $0xb8] sm:$0xf]  ;;  %v10074_v10 = vld [vmem:[%s11110_s11 + $0xd0] sm:$0xff] }
 0x8de   : > { %5582 = vmatpush.bf16.msra.mxu1 %v8804_v60  ;;  %5595 = vmatpush.bf16.msra.mxu2 %v8808_v51  ;;  %v8947_v60 = vld [vmem:[%s11108_s24 + $0x2b0] sm:$0xf]  ;;  %v9951_v47 = vld [vmem:[%s11108_s24 + $0xf4] sm:$0xf0] }
 0x8df   : > { %5608 = vmatpush.bf16.msra.mxu3 %v8812_v50  ;;  %5621 = vmatpush.bf16.msrb.mxu0 %v8816_v29  ;;  %v10014_v51 = vld [vmem:[%s11108_s24 + $0x2ec] sm:$0xf0]  ;;  %v10006_v50 = vld [vmem:[%s11108_s24 + $0x2b4] sm:$0xf] }
 0x8e0   : > { %v8949_v29 = vld [vmem:[%s11108_s24 + $0x2f0] sm:$0xf0]  ;;  %v8948_v43 = vor.u32 %v10014_v51, %v8947_v60  ;;  %v8700_v60 = vor.u32 %v9951_v47, %v8699_v49  ;;  %v8704_v51 = vor.u32 %v9943_v58, %v8701_v15  ;;  %v10101_v49 = vld [vmem:[%s11110_s11 + $0x1a8] sm:$0xff]  ;;  %v10084_v47 = vld [vmem:[%s11110_s11 + $0x120] sm:$0xff] }
 0x8e1   : > { %v8952_v40 = vor.u32 %v10006_v50, %v8949_v29  ;;  %v8635_v50 = vld [vmem:[%s11108_s24 + $0x38] sm:$0xf]  ;;  %v10058_v23 = vld [vmem:[%s11110_s11 + $0x50] sm:$0xff]  ;;  %v10108_v58 = vld [vmem:[%s11110_s11 + $0x1e0] sm:$0xff] }
 0x8e2   : > { %5583 = vmatpush.bf16.msra.mxu1 %v8740_v19  ;;  %5596 = vmatpush.bf16.msra.mxu2 %v8744_v45  ;;  %v8883_v19 = vld [vmem:[%s11108_s24 + $0x230] sm:$0xf]  ;;  %v9935_v29 = vld [vmem:[%s11108_s24 + $0x74] sm:$0xf0]  ;;  %v10092_v15 = vld [vmem:[%s11110_s11 + $0x160] sm:$0xff] }
 0x8e3   : > { %5609 = vmatpush.bf16.msra.mxu3 %v8748_v18  ;;  %5622 = vmatpush.bf16.msrb.mxu0 %v8752_v62  ;;  %v9998_v45 = vld [vmem:[%s11108_s24 + $0x26c] sm:$0xf0]  ;;  %v9990_v18 = vld [vmem:[%s11108_s24 + $0x234] sm:$0xf] }
 0x8e4   : > { %v8885_v62 = vld [vmem:[%s11108_s24 + $0x270] sm:$0xf0]  ;;  %v8884_v6 = vor.u32 %v9998_v45, %v8883_v19  ;;  %v10055_v19 = vld [vmem:[%s11110_s11 + $0x38] sm:$0xff] }
 0x8e5   : > { %v8888_v59 = vor.u32 %v9990_v18, %v8885_v62  ;;  %v10079_v45 = vld [vmem:[%s11110_s11 + $0xf8] sm:$0xff]  ;;  %v10054_v18 = vld [vmem:[%s11110_s11 + $0x30] sm:$0xff] }
 0x8e6   : > { %5584 = vmatpush.bf16.msra.mxu1 %v8676_v16  ;;  %5597 = vmatpush.bf16.msra.mxu2 %v8680_v0  ;;  %v9982_v16 = vld [vmem:[%s11108_s24 + $0x1ec] sm:$0xf0]  ;;  %v8892_v0 = vor.u32 %v9999_v3, %v8891_v21 }
 0x8e7   : > { %5610 = vmatpush.bf16.msra.mxu3 %v8684_v28  ;;  %5623 = vmatpush.bf16.msrb.mxu0 %v8688_v14  ;;  %v8827_v28 = vld [vmem:[%s11108_s24 + $0x1b8] sm:$0xf]  ;;  %v8820_v30 = vor.u32 %v9982_v16, %v8819_v54  ;;  %v10078_v62 = vld [vmem:[%s11110_s11 + $0xf0] sm:$0xff]  ;;  %v10076_v54 = vld [vmem:[%s11110_s11 + $0xe0] sm:$0xff] }
 0x8e8   : > { %v9983_v14 = vld [vmem:[%s11108_s24 + $0x1f4] sm:$0xf0]  ;;  %v10062_v21 = vld [vmem:[%s11110_s11 + $0x70] sm:$0xff]  ;;  %v10060_v16 = vld [vmem:[%s11110_s11 + $0x60] sm:$0xff] }
 0x8e9   : > { %v8828_v37 = vor.u32 %v9983_v14, %v8827_v28  ;;  %v10070_v3 = vld [vmem:[%s11110_s11 + $0xb0] sm:$0xff]  ;;  %v10067_v28 = vld [vmem:[%s11110_s11 + $0x98] sm:$0xff] }
 0x8ea   : > { %5585 = vmatpush.bf16.msra.mxu1 %v8612_v38  ;;  %5598 = vmatpush.bf16.msra.mxu2 %v8616_v13  ;;  %v8757_v38 = vld [vmem:[%s11108_s24 + $0x170] sm:$0xf0]  ;;  %v8763_v13 = vld [vmem:[%s11108_s24 + $0x138] sm:$0xf] }
 0x8eb   : > { %5611 = vmatpush.bf16.msra.mxu3 %v8620_v25  ;;  %5624 = vmatpush.bf16.msrb.mxu0 %v8624_v53  ;;  %v8756_v25 = vor.u32 %v9966_v32, %v8755_v31  ;;  %v8760_v53 = vor.u32 %v9958_v35, %v8757_v38  ;;  %v8764_v7 = vor.u32 %v9967_v46, %v8763_v13  ;;  %v10050_v14 = vld [vmem:[%s11110_s11 + $0x10] sm:$0xff]  ;;  %v10073_v31 = vld [vmem:[%s11110_s11 + $0xc8] sm:$0xff]  ;;  %v10072_v35 = vld [vmem:[%s11110_s11 + $0xc0] sm:$0xff] }
 0x8ec   : > { %v10057_v32 = vld [vmem:[%s11110_s11 + $0x48] sm:$0xff]  ;;  %v10087_v38 = vld [vmem:[%s11110_s11 + $0x138] sm:$0xff]  ;;  %v10056_v46 = vld [vmem:[%s11110_s11 + $0x40] sm:$0xff] }
 0x8ed   : > { %5586 = vmatmul.bf16.vlgmr.msra.gmra.mxu1 %v12072_v8  ;;  %5599 = vmatmul.bf16.vlgmr.msra.gmra.mxu2 %v12072_v8  ;;  %v10111_v13 = vld [vmem:[%s11110_s11 + $0x1f8] sm:$0xff] }
 0x8ee   : > { %5630 = vmatpush.bf16.msrb.mxu1 %v9076_v33  ;;  %5643 = vmatpush.bf16.msrb.mxu2 %v9080_v52  ;;  %v8691_v33 = vld [vmem:[%s11108_s24 + $0xb0] sm:$0xf] }
 0x8ef   : > { %5656 = vmatpush.bf16.msrb.mxu3 %v9084_v44  ;;  %5669 = vmatpush.bf16.msra.mxu0 %v9088_v42  ;;  %v9950_v52 = vld [vmem:[%s11108_s24 + $0xec] sm:$0xf0]  ;;  %v9942_v44 = vld [vmem:[%s11108_s24 + $0xb4] sm:$0xf] }
 0x8f0   : > { %5612 = vmatmul.bf16.vlgmr.msra.gmra.mxu3 %v12072_v8  ;;  %5625 = vmatmul.bf16.vlgmr.msrb.gmra.mxu0 %v12072_v8  ;;  %v8693_v42 = vld [vmem:[%s11108_s24 + $0xf0] sm:$0xf0]  ;;  %v8692_v41 = vor.u32 %v9950_v52, %v8691_v33 }
 0x8f1   : > { %v8696_v36 = vor.u32 %v9942_v44, %v8693_v42  ;;  %v10110_v33 = vld [vmem:[%s11110_s11 + $0x1f0] sm:$0xff]  ;;  %v10109_v44 = vld [vmem:[%s11110_s11 + $0x1e8] sm:$0xff] }
 0x8f2   : > { %5631 = vmatpush.bf16.msrb.mxu1 %v9012_v61  ;;  %5644 = vmatpush.bf16.msrb.mxu2 %v9016_v1  ;;  %v8627_v61 = vld [vmem:[%s11108_s24 + $0x30] sm:$0xf]  ;;  %v10093_v42 = vld [vmem:[%s11110_s11 + $0x168] sm:$0xff] }
 0x8f3   : > { %5657 = vmatpush.bf16.msrb.mxu3 %v9020_v63  ;;  %5670 = vmatpush.bf16.msra.mxu0 %v9024_v48  ;;  %v9934_v1 = vld [vmem:[%s11108_s24 + $0x6c] sm:$0xf0]  ;;  %v9926_v63 = vld [vmem:[%s11108_s24 + $0x34] sm:$0xf] }
 0x8f4   : > { %v8629_v48 = vld [vmem:[%s11108_s24 + $0x70] sm:$0xf0]  ;;  %v8628_v39 = vor.u32 %v9934_v1, %v8627_v61  ;;  %v10107_v61 = vld [vmem:[%s11110_s11 + $0x1d8] sm:$0xff] }
 0x8f5   : > { %v8632_v4 = vor.u32 %v9926_v63, %v8629_v48  ;;  %v10094_v52 = vld [vmem:[%s11110_s11 + $0x170] sm:$0xff]  ;;  %v10091_v1 = vld [vmem:[%s11110_s11 + $0x158] sm:$0xff] }
 0x8f6   : > { %5632 = vmatpush.bf16.msrb.mxu1 %v8948_v43  ;;  %5645 = vmatpush.bf16.msrb.mxu2 %v8952_v40  ;;  %v8636_v43 = vor.u32 %v9935_v29, %v8635_v50  ;;  %v8640_v40 = vor.u32 %v9927_v2, %v8637_v5  ;;  %v10106_v63 = vld [vmem:[%s11110_s11 + $0x1d0] sm:$0xff]  ;;  %v10081_v29 = vld [vmem:[%s11110_s11 + $0x108] sm:$0xff] }
 0x8f7   : > { %5658 = vmatpush.bf16.msrb.mxu3 %v8956_v20  ;;  %5671 = vmatpush.bf16.msra.mxu0 %v8960_v11  ;;  %v10063_v20 = vld [vmem:[%s11110_s11 + $0x78] sm:$0xff]  ;;  %v10090_v48 = vld [vmem:[%s11110_s11 + $0x150] sm:$0xff]  ;;  %v10105_v2 = vld [vmem:[%s11110_s11 + $0x1c8] sm:$0xff] }
 0x8f8   : > { %v10071_v11 = vld [vmem:[%s11110_s11 + $0xb8] sm:$0xff]  ;;  %v10098_v50 = vld [vmem:[%s11110_s11 + $0x190] sm:$0xff]  ;;  %v10089_v5 = vld [vmem:[%s11110_s11 + $0x148] sm:$0xff] }
 0x8fa   : > { %5633 = vmatpush.bf16.msrb.mxu1 %v8884_v6  ;;  %5646 = vmatpush.bf16.msrb.mxu2 %v8888_v59  ;;  %v10061_v6 = vld [vmem:[%s11110_s11 + $0x68] sm:$0xff] }
 0x8fb   : > { %5659 = vmatpush.bf16.msrb.mxu3 %v8892_v0  ;;  %5672 = vmatpush.bf16.msra.mxu0 %v8896_v34  ;;  %v10069_v59 = vld [vmem:[%s11110_s11 + $0xa8] sm:$0xff]  ;;  %v10068_v0 = vld [vmem:[%s11110_s11 + $0xa0] sm:$0xff]  ;;  %v10051_v34 = vld [vmem:[%s11110_s11 + $0x18] sm:$0xff] }
 0x8fe   : > { %5634 = vmatpush.bf16.msrb.mxu1 %v8820_v30  ;;  %5647 = vmatpush.bf16.msrb.mxu2 %v8824_v12  ;;  %v10066_v30 = vld [vmem:[%s11110_s11 + $0x90] sm:$0xff]  ;;  %v10049_v12 = vld [vmem:[%s11110_s11 + $0x8] sm:$0xff] }
 0x8ff   : > { %5660 = vmatpush.bf16.msrb.mxu3 %v8828_v37  ;;  %5673 = vmatpush.bf16.msra.mxu0 %v8832_v27  ;;  %v10065_v37 = vld [vmem:[%s11110_s11 + $0x88] sm:$0xff]  ;;  %v10048_v27 = vld [vmem:[%s11110_s11] sm:$0xff] }
 0x902   : > { %5635 = vmatpush.bf16.msrb.mxu1 %v8756_v25  ;;  %5648 = vmatpush.bf16.msrb.mxu2 %v8760_v53  ;;  %v10103_v25 = vld [vmem:[%s11110_s11 + $0x1b8] sm:$0xff]  ;;  %v10086_v53 = vld [vmem:[%s11110_s11 + $0x130] sm:$0xff] }
 0x903   : > { %5661 = vmatpush.bf16.msrb.mxu3 %v8764_v7  ;;  %5674 = vmatpush.bf16.msra.mxu0 %v8768_v57  ;;  %v10102_v7 = vld [vmem:[%s11110_s11 + $0x1b0] sm:$0xff]  ;;  %v10085_v57 = vld [vmem:[%s11110_s11 + $0x128] sm:$0xff] }
 0x906   : > { %5636 = vmatpush.bf16.msrb.mxu1 %v8692_v41  ;;  %5649 = vmatpush.bf16.msrb.mxu2 %v8696_v36  ;;  %v10100_v41 = vld [vmem:[%s11110_s11 + $0x1a0] sm:$0xff]  ;;  %v10083_v36 = vld [vmem:[%s11110_s11 + $0x118] sm:$0xff] }
 0x907   : > { %5662 = vmatpush.bf16.msrb.mxu3 %v8700_v60  ;;  %5675 = vmatpush.bf16.msra.mxu0 %v8704_v51  ;;  %v10099_v60 = vld [vmem:[%s11110_s11 + $0x198] sm:$0xff]  ;;  %v10082_v51 = vld [vmem:[%s11110_s11 + $0x110] sm:$0xff] }
 0x90a   : > { %5637 = vmatpush.bf16.msrb.mxu1 %v8628_v39  ;;  %5650 = vmatpush.bf16.msrb.mxu2 %v8632_v4  ;;  %v10097_v39 = vld [vmem:[%s11110_s11 + $0x188] sm:$0xff]  ;;  %v10080_v4 = vld [vmem:[%s11110_s11 + $0x100] sm:$0xff] }
 0x90b   : > { %5663 = vmatpush.bf16.msrb.mxu3 %v8636_v43  ;;  %5676 = vmatpush.bf16.msra.mxu0 %v8640_v40  ;;  %v10104_v43 = vld [vmem:[%s11110_s11 + $0x1c0] sm:$0xff] }
 0x90c   : > { %v10088_v40 = vld [vmem:[%s11110_s11 + $0x140] sm:$0xff] }
 0x90d   : > { %5638 = vmatmul.bf16.vlgmr.msrb.gmra.mxu1 %v12072_v8  ;;  %5651 = vmatmul.bf16.vlgmr.msrb.gmra.mxu2 %v12072_v8 }
 0x90e   : > { %6774 = vmatpush.bf16.msra.mxu1 %v10055_v19  ;;  %5664 = vmatmul.bf16.vlgmr.msrb.gmra.mxu3 %v12072_v8  ;;  %v10096_v19 = vld [vmem:[%s11110_s11 + $0x180] sm:$0xff] }
 0x90f   : > { %6813 = vmatpush.bf16.msrb.mxu0 %v10079_v45  ;;  %6787 = vmatpush.bf16.msra.mxu2 %v10063_v20  ;;  %v12275_v45 = vld [vmem:[%s11106_s27] sm:$0xff] }
 0x910   : > { %5677 = vmatmul.bf16.vlgmr.msra.gmra.mxu0 %v12072_v8  ;;  %6800 = vmatpush.bf16.msra.mxu3 %v10071_v11  ;;  %v10052_v8 = vld [vmem:[%s11110_s11 + $0x20] sm:$0xff]  ;;  %v4802_v20 = vperm.slane %v12275_v45, 0  ;;  %v4805_v11 = vperm.slane %v12275_v45, 3 }
 0x912   : > { %6775 = vmatpush.bf16.msra.mxu1 %v10054_v18 }
 0x913   : > { %6814 = vmatpush.bf16.msrb.mxu0 %v10078_v62  ;;  %6788 = vmatpush.bf16.msra.mxu2 %v10062_v21 }
 0x914   : > { %6801 = vmatpush.bf16.msra.mxu3 %v10070_v3 }
 0x916   : > { %6776 = vmatpush.bf16.msra.mxu1 %v10053_v9 }
 0x917   : > { %6815 = vmatpush.bf16.msrb.mxu0 %v10077_v17  ;;  %6789 = vmatpush.bf16.msra.mxu2 %v10061_v6  ;;  %v4803_v17 = vperm.slane %v12275_v45, 1 }
 0x918   : > { %6802 = vmatpush.bf16.msra.mxu3 %v10069_v59  ;;  %v4804_v59 = vperm.slane %v12275_v45, 2 }
 0x91a   : > { %6777 = vmatpush.bf16.msra.mxu1 %v10052_v8 }
 0x91b   : > { %6816 = vmatpush.bf16.msrb.mxu0 %v10076_v54  ;;  %6790 = vmatpush.bf16.msra.mxu2 %v10060_v16  ;;  %v10119_v54 = vld [vmem:[%s11110_s11 + $0x238] sm:$0xff] }
 0x91c   : > { %6803 = vmatpush.bf16.msra.mxu3 %v10068_v0 }
 0x91e   : > { %6778 = vmatpush.bf16.msra.mxu1 %v10051_v34 }
 0x91f   : > { %6817 = vmatpush.bf16.msrb.mxu0 %v10075_v24  ;;  %6791 = vmatpush.bf16.msra.mxu2 %v10059_v56  ;;  %v10143_v24 = vld [vmem:[%s11110_s11 + $0x2f8] sm:$0xff] }
 0x920   : > { %6804 = vmatpush.bf16.msra.mxu3 %v10067_v28 }
 0x922   : > { %6779 = vmatpush.bf16.msra.mxu1 %v10050_v14 }
 0x923   : > { %6818 = vmatpush.bf16.msrb.mxu0 %v10074_v10  ;;  %6792 = vmatpush.bf16.msra.mxu2 %v10058_v23 }
 0x924   : > { %6805 = vmatpush.bf16.msra.mxu3 %v10066_v30 }
 0x926   : > { %6780 = vmatpush.bf16.msra.mxu1 %v10049_v12 }
 0x927   : > { %6819 = vmatpush.bf16.msrb.mxu0 %v10073_v31  ;;  %6793 = vmatpush.bf16.msra.mxu2 %v10057_v32  ;;  %v10118_v31 = vld [vmem:[%s11110_s11 + $0x230] sm:$0xff] }
 0x928   : > { %6806 = vmatpush.bf16.msra.mxu3 %v10065_v37  ;;  %v10142_v37 = vld [vmem:[%s11110_s11 + $0x2f0] sm:$0xff] }
 0x92a   : > { %6781 = vmatpush.bf16.msra.mxu1 %v10048_v27 }
 0x92b   : > { %6820 = vmatpush.bf16.msrb.mxu0 %v10072_v35  ;;  %6794 = vmatpush.bf16.msra.mxu2 %v10056_v46  ;;  %v10127_v35 = vld [vmem:[%s11110_s11 + $0x278] sm:$0xff] }
 0x92c   : > { %6807 = vmatpush.bf16.msra.mxu3 %v10064_v26  ;;  %v10135_v46 = vld [vmem:[%s11110_s11 + $0x2b8] sm:$0xff] }
 0x92e   : > { %6826 = vmatpush.bf16.msrb.mxu1 %v10087_v38 }
 0x92f   : > { %6865 = vmatpush.bf16.msra.mxu0 %v10111_v13  ;;  %6839 = vmatpush.bf16.msrb.mxu2 %v10095_v22  ;;  %v4806_v22 = vperm.slane %v12275_v45, 4 }
 0x930   : > { %6852 = vmatpush.bf16.msrb.mxu3 %v10103_v25  ;;  %v10117_v25 = vld [vmem:[%s11110_s11 + $0x228] sm:$0xff] }
 0x932   : > { %6827 = vmatpush.bf16.msrb.mxu1 %v10086_v53 }
 0x933   : > { %6866 = vmatpush.bf16.msra.mxu0 %v10110_v33  ;;  %6840 = vmatpush.bf16.msrb.mxu2 %v10094_v52  ;;  %v4809_v33 = vperm.slane %v12275_v45, 7  ;;  %v10141_v52 = vld [vmem:[%s11110_s11 + $0x2e8] sm:$0xff] }
 0x934   : > { %6853 = vmatpush.bf16.msrb.mxu3 %v10102_v7 }
 0x936   : > { %6828 = vmatpush.bf16.msrb.mxu1 %v10085_v57  ;;  %v10126_v57 = vld [vmem:[%s11110_s11 + $0x270] sm:$0xff] }
 0x937   : > { %6867 = vmatpush.bf16.msra.mxu0 %v10109_v44  ;;  %6841 = vmatpush.bf16.msrb.mxu2 %v10093_v42  ;;  %v10134_v42 = vld [vmem:[%s11110_s11 + $0x2b0] sm:$0xff] }
 0x938   : > { %6854 = vmatpush.bf16.msrb.mxu3 %v10101_v49 }
 0x93a   : > { %6829 = vmatpush.bf16.msrb.mxu1 %v10084_v47 }
 0x93b   : > { %6868 = vmatpush.bf16.msra.mxu0 %v10108_v58  ;;  %6842 = vmatpush.bf16.msrb.mxu2 %v10092_v15  ;;  %v10116_v58 = vld [vmem:[%s11110_s11 + $0x220] sm:$0xff] }
 0x93c   : > { %6855 = vmatpush.bf16.msrb.mxu3 %v10100_v41  ;;  %v10140_v41 = vld [vmem:[%s11110_s11 + $0x2e0] sm:$0xff] }
 0x93e   : > { %6830 = vmatpush.bf16.msrb.mxu1 %v10083_v36 }
 0x93f   : > { %6869 = vmatpush.bf16.msra.mxu0 %v10107_v61  ;;  %6843 = vmatpush.bf16.msrb.mxu2 %v10091_v1  ;;  %v4807_v61 = vperm.slane %v12275_v45, 5  ;;  %v10125_v1 = vld [vmem:[%s11110_s11 + $0x268] sm:$0xff] }
 0x940   : > { %6856 = vmatpush.bf16.msrb.mxu3 %v10099_v60 }
 0x942   : > { %6831 = vmatpush.bf16.msrb.mxu1 %v10082_v51  ;;  %v4808_v51 = vperm.slane %v12275_v45, 6 }
 0x943   : > { %6870 = vmatpush.bf16.msra.mxu0 %v10106_v63  ;;  %6844 = vmatpush.bf16.msrb.mxu2 %v10090_v48  ;;  %v10133_v63 = vld [vmem:[%s11110_s11 + $0x2a8] sm:$0xff] }
 0x944   : > { %6857 = vmatpush.bf16.msrb.mxu3 %v10098_v50  ;;  %v10115_v50 = vld [vmem:[%s11110_s11 + $0x218] sm:$0xff] }
 0x946   : > { %6832 = vmatpush.bf16.msrb.mxu1 %v10081_v29 }
 0x947   : > { %6871 = vmatpush.bf16.msra.mxu0 %v10105_v2  ;;  %6845 = vmatpush.bf16.msrb.mxu2 %v10089_v5 }
 0x948   : > { %6858 = vmatpush.bf16.msrb.mxu3 %v10097_v39  ;;  %v10139_v39 = vld [vmem:[%s11110_s11 + $0x2d8] sm:$0xff] }
 0x949   : > { %v5483_v18 = vpop.f32.mrf.mxu1 }
 0x94a   : > { %6833 = vmatpush.bf16.msrb.mxu1 %v10080_v4  ;;  %v5484_v62 = vadd.f32 %v5483_v18, %v4802_v20  ;;  %v5522_v21 = vpop.f32.mrf.mxu0 }
 0x94b   : > { %6872 = vmatpush.bf16.msra.mxu0 %v10104_v43  ;;  %6846 = vmatpush.bf16.msrb.mxu2 %v10088_v40  ;;  %v5523_v3 = vadd.f32 %v5522_v21, %v4805_v11  ;;  %v10132_v11 = vld [vmem:[%s11110_s11 + $0x2a0] sm:$0xff]  ;;  %v10114_v21 = vld [vmem:[%s11110_s11 + $0x210] sm:$0xff] }
 0x94c   : > { %6859 = vmatpush.bf16.msrb.mxu3 %v10096_v19  ;;  %vm5682_vm3 = vcmp.ge.f32.partialorder %v5484_v62, 0.0  ;;  %v5698_v9 = vmul.f32 0.01, %v5484_v62  ;;  %v10124_v19 = vld [vmem:[%s11110_s11 + $0x260] sm:$0xff] }
 0x94d   : > { %vm5685_vm4 = vcmp.ge.f32.partialorder %v5523_v3, 0.0  ;;  %v5701_v6 = vmul.f32 0.01, %v5523_v3 }
 0x94e   : > { %v5714_v8 = vsel %vm5682_vm3, %v5484_v62, %v5698_v9  ;;  %v10138_v9 = vld [vmem:[%s11110_s11 + $0x2d0] sm:$0xff] }
 0x94f   : > { %v5730_v16 = vpack.c.bf16 %v5714_v8, %v5714_v8  ;;  %v5717_v0 = vsel %vm5685_vm4, %v5523_v3, %v5701_v6  ;;  %v5496_v34 = vpop.f32.mrf.mxu2  ;;  %v10123_v6 = vld [vmem:[%s11110_s11 + $0x258] sm:$0xff]  ;;  %vm6988_vm4 = vcmask 1041408  }
 0x950   : > { %v5733_v56 = vpack.c.bf16 %v5717_v0, %v5717_v0  ;;  %v5497_v28 = vadd.f32 %v5496_v34, %v4803_v17  ;;  %v5509_v14 = vpop.f32.mrf.mxu3  ;;  %v10113_v34 = vld [vmem:[%s11110_s11 + $0x208] sm:$0xff] }
 0x951   : > { %v5510_v10 = vadd.f32 %v5509_v14, %v4804_v59  ;;  %v5485_v23 = vpop.f32.mrf.mxu1  ;;  %6782 = vmatmul.bf16.vlgmr.msra.gmra.mxu1 %v5730_v16  ;;  %v12308_v16 = vld [vmem:[%s11106_s27 + $0x8] sm:$0xff] }
 0x952   : > { %vm5683_vm5 = vcmp.ge.f32.partialorder %v5497_v28, 0.0  ;;  %v5699_v30 = vmul.f32 0.01, %v5497_v28  ;;  %v5524_v12 = vpop.f32.mrf.mxu0  ;;  %6821 = vmatmul.bf16.vlgmr.msrb.gmra.mxu0 %v5733_v56  ;;  %6878 = vmatpush.bf16.msra.mxu1 %v10119_v54  ;;  %v10131_v54 = vld [vmem:[%s11110_s11 + $0x298] sm:$0xff]  ;;  %v10137_v56 = vld [vmem:[%s11110_s11 + $0x2c8] sm:$0xff]  ;;  %v4810_v14 = vperm.slane %v12308_v16, 0 }
 0x953   : > { %vm5684_vm6 = vcmp.ge.f32.partialorder %v5510_v10, 0.0  ;;  %v5700_v32 = vmul.f32 0.01, %v5510_v10  ;;  %6917 = vmatpush.bf16.msrb.mxu0 %v10143_v24  ;;  %v4813_v23 = vperm.slane %v12308_v16, 3  ;;  %v10112_v12 = vld [vmem:[%s11110_s11 + $0x200] sm:$0xff] }
 0x954   : > { %v5715_v27 = vsel %vm5683_vm5, %v5497_v28, %v5699_v30  ;;  %v10130_v30 = vld [vmem:[%s11110_s11 + $0x290] sm:$0xff] }
 0x955   : > { %v5731_v38 = vpack.c.bf16 %v5715_v27, %v5715_v27  ;;  %v5716_v13 = vsel %vm5684_vm6, %v5510_v10, %v5700_v32  ;;  %v10122_v10 = vld [vmem:[%s11110_s11 + $0x250] sm:$0xff]  ;;  %v10136_v32 = vld [vmem:[%s11110_s11 + $0x2c0] sm:$0xff] }
 0x956   : > { %v5732_v26 = vpack.c.bf16 %v5716_v13, %v5716_v13  ;;  %6879 = vmatpush.bf16.msra.mxu1 %v10118_v31  ;;  %v10121_v13 = vld [vmem:[%s11110_s11 + $0x248] sm:$0xff] }
 0x957   : > { %6918 = vmatpush.bf16.msrb.mxu0 %v10142_v37  ;;  %v5498_v53 = vpop.f32.mrf.mxu2  ;;  %6795 = vmatmul.bf16.vlgmr.msra.gmra.mxu2 %v5731_v38  ;;  %v10151_v37 = vld [vmem:[%s11110_s11 + $0x338] sm:$0xff] }
 0x958   : > { %v5511_v7 = vpop.f32.mrf.mxu3  ;;  %6808 = vmatmul.bf16.vlgmr.msra.gmra.mxu3 %v5732_v26  ;;  %6891 = vmatpush.bf16.msra.mxu2 %v10127_v35  ;;  %v10175_v38 = vld [vmem:[%s11110_s11 + $0x3f8] sm:$0xff]  ;;  %v10129_v26 = vld [vmem:[%s11110_s11 + $0x288] sm:$0xff] }
 0x959   : > { %6904 = vmatpush.bf16.msra.mxu3 %v10135_v46  ;;  %v5535_v44 = vpop.f32.mrf.mxu1  ;;  %v10150_v7 = vld [vmem:[%s11110_s11 + $0x330] sm:$0xff] }
 0x95a   : > { %v5536_v49 = vadd.f32 %v5535_v44, %v4806_v22  ;;  %v5574_v47 = vpop.f32.mrf.mxu0  ;;  %6880 = vmatpush.bf16.msra.mxu1 %v10117_v25  ;;  %v4811_v25 = vperm.slane %v12308_v16, 1 }
 0x95b   : > { %v5575_v15 = vadd.f32 %v5574_v47, %v4809_v33  ;;  %6919 = vmatpush.bf16.msrb.mxu0 %v10141_v52  ;;  %v4812_v33 = vperm.slane %v12308_v16, 2  ;;  %v10120_v47 = vld [vmem:[%s11110_s11 + $0x240] sm:$0xff] }
 0x95c   : > { %vm5686_vm7 = vcmp.ge.f32.partialorder %v5536_v49, 0.0  ;;  %v5702_v36 = vmul.f32 0.01, %v5536_v49  ;;  %6892 = vmatpush.bf16.msra.mxu2 %v10126_v57 }
 0x95d   : > { %vm5689_vm8 = vcmp.ge.f32.partialorder %v5575_v15, 0.0  ;;  %v5705_v60 = vmul.f32 0.01, %v5575_v15  ;;  %6905 = vmatpush.bf16.msra.mxu3 %v10134_v42 }
 0x95e   : > { %v5718_v48 = vsel %vm5686_vm7, %v5536_v49, %v5702_v36  ;;  %6881 = vmatpush.bf16.msra.mxu1 %v10116_v58  ;;  %v10174_v49 = vld [vmem:[%s11110_s11 + $0x3f0] sm:$0xff]  ;;  %v10128_v36 = vld [vmem:[%s11110_s11 + $0x280] sm:$0xff] }
 0x95f   : > { %v5734_v29 = vpack.c.bf16 %v5718_v48, %v5718_v48  ;;  %v5721_v2 = vsel %vm5689_vm8, %v5575_v15, %v5705_v60  ;;  %6920 = vmatpush.bf16.msrb.mxu0 %v10140_v41  ;;  %v5548_v5 = vpop.f32.mrf.mxu2 }
 0x960   : > { %v5737_v4 = vpack.c.bf16 %v5721_v2, %v5721_v2  ;;  %v5549_v43 = vadd.f32 %v5548_v5, %v4807_v61  ;;  %v5561_v40 = vpop.f32.mrf.mxu3  ;;  %6893 = vmatpush.bf16.msra.mxu2 %v10125_v1  ;;  %v10159_v61 = vld [vmem:[%s11110_s11 + $0x378] sm:$0xff]  ;;  %v10173_v2 = vld [vmem:[%s11110_s11 + $0x3e8] sm:$0xff] }
 0x961   : > { %v5562_v20 = vadd.f32 %v5561_v40, %v4808_v51  ;;  %6906 = vmatpush.bf16.msra.mxu3 %v10133_v63  ;;  %v5537_v45 = vpop.f32.mrf.mxu1  ;;  %6834 = vmatmul.bf16.vlgmr.msrb.gmra.mxu1 %v5734_v29  ;;  %v10167_v51 = vld [vmem:[%s11110_s11 + $0x3b8] sm:$0xff]  ;;  %v10166_v40 = vld [vmem:[%s11110_s11 + $0x3b0] sm:$0xff] }
 0x962   : > { %vm5687_vm9 = vcmp.ge.f32.partialorder %v5549_v43, 0.0  ;;  %v5703_v18 = vmul.f32 0.01, %v5549_v43  ;;  %v5576_v62 = vpop.f32.mrf.mxu0  ;;  %6873 = vmatmul.bf16.vlgmr.msra.gmra.mxu0 %v5737_v4  ;;  %6882 = vmatpush.bf16.msra.mxu1 %v10115_v50  ;;  %v10149_v50 = vld [vmem:[%s11110_s11 + $0x328] sm:$0xff] }
 0x963   : > { %vm5688_vm10 = vcmp.ge.f32.partialorder %v5562_v20, 0.0  ;;  %v5704_v3 = vmul.f32 0.01, %v5562_v20  ;;  %6921 = vmatpush.bf16.msrb.mxu0 %v10139_v39  ;;  %v10158_v39 = vld [vmem:[%s11110_s11 + $0x370] sm:$0xff]  ;;  %v10157_v62 = vld [vmem:[%s11110_s11 + $0x368] sm:$0xff] }
 0x964   : > { %v5719_v17 = vsel %vm5687_vm9, %v5549_v43, %v5703_v18  ;;  %6894 = vmatpush.bf16.msra.mxu2 %v10124_v19 }
 0x965   : > { %v5735_v59 = vpack.c.bf16 %v5719_v17, %v5719_v17  ;;  %v5720_v8 = vsel %vm5688_vm10, %v5562_v20, %v5704_v3  ;;  %6907 = vmatpush.bf16.msra.mxu3 %v10132_v11  ;;  %v10148_v20 = vld [vmem:[%s11110_s11 + $0x320] sm:$0xff]  ;;  %v10147_v3 = vld [vmem:[%s11110_s11 + $0x318] sm:$0xff] }
 0x966   : > { %v5736_v0 = vpack.c.bf16 %v5720_v8, %v5720_v8  ;;  %6883 = vmatpush.bf16.msra.mxu1 %v10114_v21  ;;  %v10172_v11 = vld [vmem:[%s11110_s11 + $0x3e0] sm:$0xff]  ;;  %v10165_v21 = vld [vmem:[%s11110_s11 + $0x3a8] sm:$0xff]  ;;  %v10170_v8 = vld [vmem:[%s11110_s11 + $0x3d0] sm:$0xff] }
 0x967   : > { %6922 = vmatpush.bf16.msrb.mxu0 %v10138_v9  ;;  %v5550_v24 = vpop.f32.mrf.mxu2  ;;  %6847 = vmatmul.bf16.vlgmr.msrb.gmra.mxu2 %v5735_v59  ;;  %v10171_v9 = vld [vmem:[%s11110_s11 + $0x3d8] sm:$0xff]  ;;  %v10156_v17 = vld [vmem:[%s11110_s11 + $0x360] sm:$0xff]  ;;  %v10146_v59 = vld [vmem:[%s11110_s11 + $0x310] sm:$0xff] }
 0x968   : > { %v5563_v28 = vpop.f32.mrf.mxu3  ;;  %6860 = vmatmul.bf16.vlgmr.msrb.gmra.mxu3 %v5736_v0  ;;  %6895 = vmatpush.bf16.msra.mxu2 %v10123_v6  ;;  %v10164_v6 = vld [vmem:[%s11110_s11 + $0x3a0] sm:$0xff]  ;;  %v10163_v0 = vld [vmem:[%s11110_s11 + $0x398] sm:$0xff]  ;;  %v4814_v24 = vperm.slane %v12308_v16, 4 }
 0x969   : > { %6908 = vmatpush.bf16.msra.mxu3 %v10131_v54  ;;  %v10155_v54 = vld [vmem:[%s11110_s11 + $0x358] sm:$0xff]  ;;  %v4817_v28 = vperm.slane %v12308_v16, 7 }
 0x96a   : > { %6884 = vmatpush.bf16.msra.mxu1 %v10113_v34  ;;  %v5587_v31 = vpop.f32.mrf.mxu1  ;;  %v10145_v34 = vld [vmem:[%s11110_s11 + $0x308] sm:$0xff] }
 0x96b   : > { %6923 = vmatpush.bf16.msrb.mxu0 %v10137_v56  ;;  %v5588_v27 = vadd.f32 %v5587_v31, %v4810_v14  ;;  %v10169_v56 = vld [vmem:[%s11110_s11 + $0x3c8] sm:$0xff]  ;;  %v10154_v14 = vld [vmem:[%s11110_s11 + $0x350] sm:$0xff] }
 0x96c   : > { %6896 = vmatpush.bf16.msra.mxu2 %v10122_v10  ;;  %v10162_v10 = vld [vmem:[%s11110_s11 + $0x390] sm:$0xff] }
 0x96d   : > { %v5626_v35 = vpop.f32.mrf.mxu0  ;;  %6909 = vmatpush.bf16.msra.mxu3 %v10130_v30  ;;  %vm5690_vm11 = vcmp.ge.f32.partialorder %v5588_v27, 0.0  ;;  %v5706_v22 = vmul.f32 0.01, %v5588_v27  ;;  %v10144_v30 = vld [vmem:[%s11110_s11 + $0x300] sm:$0xff] }
 0x96e   : > { %v5627_v46 = vadd.f32 %v5626_v35, %v4813_v23  ;;  %6885 = vmatpush.bf16.msra.mxu1 %v10112_v12 }
 0x96f   : > { %6924 = vmatpush.bf16.msrb.mxu0 %v10136_v32  ;;  %v5722_v52 = vsel %vm5690_vm11, %v5588_v27, %v5706_v22  ;;  %v10168_v32 = vld [vmem:[%s11110_s11 + $0x3c0] sm:$0xff]  ;;  %v10153_v27 = vld [vmem:[%s11110_s11 + $0x348] sm:$0xff] }
 0x970   : > { %vm5693_vm12 = vcmp.ge.f32.partialorder %v5627_v46, 0.0  ;;  %v5709_v53 = vmul.f32 0.01, %v5627_v46  ;;  %6897 = vmatpush.bf16.msra.mxu2 %v10121_v13  ;;  %v5738_v57 = vpack.c.bf16 %v5722_v52, %v5722_v52  ;;  %v5600_v42 = vpop.f32.mrf.mxu2  ;;  %v10161_v13 = vld [vmem:[%s11110_s11 + $0x388] sm:$0xff]  ;;  %v10152_v52 = vld [vmem:[%s11110_s11 + $0x340] sm:$0xff] }
 0x971   : > { %6910 = vmatpush.bf16.msra.mxu3 %v10129_v26  ;;  %v5601_v15 = vadd.f32 %v5600_v42, %v4811_v25  ;;  %v4816_v26 = vperm.slane %v12308_v16, 6  ;;  %v10160_v42 = vld [vmem:[%s11110_s11 + $0x380] sm:$0xff] }
 0x972   : > { %6930 = vmatpush.bf16.msrb.mxu1 %v10151_v37  ;;  %v5725_v44 = vsel %vm5693_vm12, %v5627_v46, %v5709_v53  ;;  %v5589_v60 = vpop.f32.mrf.mxu1 }
 0x973   : > { %6969 = vmatpush.bf16.msra.mxu0 %v10175_v38  ;;  %v5741_v58 = vpack.c.bf16 %v5725_v44, %v5725_v44  ;;  %v5613_v41 = vpop.f32.mrf.mxu3  ;;  %6886 = vmatmul.bf16.vlgmr.msra.gmra.mxu1 %v5738_v57  ;;  %vm5691_vm13 = vcmp.ge.f32.partialorder %v5601_v15, 0.0  ;;  %v5707_v63 = vmul.f32 0.01, %v5601_v15  ;;  %v4815_v38 = vperm.slane %v12308_v16, 5 }
 0x974   : > { %v5614_v1 = vadd.f32 %v5613_v41, %v4812_v33  ;;  %6898 = vmatpush.bf16.msra.mxu2 %v10120_v47 }
 0x975   : > { %v5628_v48 = vpop.f32.mrf.mxu0  ;;  %6925 = vmatmul.bf16.vlgmr.msrb.gmra.mxu0 %v5741_v58  ;;  %v5723_v5 = vsel %vm5691_vm13, %v5601_v15, %v5707_v63  ;;  %6911 = vmatpush.bf16.msra.mxu3 %v10128_v36 }
 0x976   : > { %6931 = vmatpush.bf16.msrb.mxu1 %v10150_v7  ;;  %vm5692_vm14 = vcmp.ge.f32.partialorder %v5614_v1, 0.0  ;;  %v5708_v29 = vmul.f32 0.01, %v5614_v1  ;;  %v5739_v4 = vpack.c.bf16 %v5723_v5, %v5723_v5 }
 0x977   : > { %6970 = vmatpush.bf16.msra.mxu0 %v10174_v49 }
 0x978   : > { %6943 = vmatpush.bf16.msrb.mxu2 %v10159_v61  ;;  %v5724_v43 = vsel %vm5692_vm14, %v5614_v1, %v5708_v29  ;;  %v5602_v45 = vpop.f32.mrf.mxu2 }
 0x979   : > { %6956 = vmatpush.bf16.msrb.mxu3 %v10167_v51  ;;  %v5740_v19 = vpack.c.bf16 %v5724_v43, %v5724_v43  ;;  %6899 = vmatmul.bf16.vlgmr.msra.gmra.mxu2 %v5739_v4 }
 0x97a   : > { %6932 = vmatpush.bf16.msrb.mxu1 %v10149_v50 }
 0x97b   : > { %6971 = vmatpush.bf16.msra.mxu0 %v10173_v2  ;;  %v5615_v18 = vpop.f32.mrf.mxu3  ;;  %6912 = vmatmul.bf16.vlgmr.msra.gmra.mxu3 %v5740_v19 }
 0x97c   : > { %6944 = vmatpush.bf16.msrb.mxu2 %v10158_v39  ;;  %v10378_v18 = vld [vmem:[%s810_s10] ss:$0 sm:$0xff] }
 0x97d   : > { %6957 = vmatpush.bf16.msrb.mxu3 %v10166_v40 }
 0x97e   : > { %6933 = vmatpush.bf16.msrb.mxu1 %v10148_v20 }
 0x97f   : > { %6972 = vmatpush.bf16.msra.mxu0 %v10172_v11 }
 0x980   : > { %6945 = vmatpush.bf16.msrb.mxu2 %v10157_v62 }
 0x981   : > { %6958 = vmatpush.bf16.msrb.mxu3 %v10165_v21 }
 0x982   : > { %6934 = vmatpush.bf16.msrb.mxu1 %v10147_v3 }
 0x983   : > { %6973 = vmatpush.bf16.msra.mxu0 %v10171_v9 }
 0x984   : > { %6946 = vmatpush.bf16.msrb.mxu2 %v10156_v17 }
 0x985   : > { %6959 = vmatpush.bf16.msrb.mxu3 %v10164_v6 }
 0x986   : > { %6935 = vmatpush.bf16.msrb.mxu1 %v10146_v59 }
 0x987   : > { %6974 = vmatpush.bf16.msra.mxu0 %v10170_v8 }
 0x988   : > { %6947 = vmatpush.bf16.msrb.mxu2 %v10155_v54 }
 0x989   : > { %6960 = vmatpush.bf16.msrb.mxu3 %v10163_v0 }
 0x98a   : > { %v5639_v23 = vpop.f32.mrf.mxu1  ;;  %6936 = vmatpush.bf16.msrb.mxu1 %v10145_v34 }
 0x98b   : > { %v5640_v12 = vadd.f32 %v5639_v23, %v4814_v24  ;;  %6975 = vmatpush.bf16.msra.mxu0 %v10169_v56 }
 0x98c   : > { %6948 = vmatpush.bf16.msrb.mxu2 %v10154_v14 }
 0x98d   : > { %v5678_v31 = vpop.f32.mrf.mxu0  ;;  %vm5694_vm15 = vcmp.ge.f32.partialorder %v5640_v12, 0.0  ;;  %v5710_v35 = vmul.f32 0.01, %v5640_v12  ;;  %6961 = vmatpush.bf16.msrb.mxu3 %v10162_v10 }
 0x98e   : > { %v5679_v37 = vadd.f32 %v5678_v31, %v4817_v28  ;;  %6937 = vmatpush.bf16.msrb.mxu1 %v10144_v30 }
 0x98f   : > { %v5726_v22 = vsel %vm5694_vm15, %v5640_v12, %v5710_v35  ;;  %6976 = vmatpush.bf16.msra.mxu0 %v10168_v32 }
 0x990   : > { %vm5697_vm0 = vcmp.ge.f32.partialorder %v5679_v37, 0.0  ;;  %v5713_v46 = vmul.f32 0.01, %v5679_v37  ;;  %v5742_v25 = vpack.c.bf16 %v5726_v22, %v5726_v22  ;;  %v5652_v33 = vpop.f32.mrf.mxu2  ;;  %6949 = vmatpush.bf16.msrb.mxu2 %v10153_v27 }
 0x991   : > { %v5653_v57 = vadd.f32 %v5652_v33, %v4815_v38  ;;  %v5665_v44 = vpop.f32.mrf.mxu3  ;;  %6962 = vmatpush.bf16.msrb.mxu3 %v10161_v13 }
 0x992   : > { %v5729_v53 = vsel %vm5697_vm0, %v5679_v37, %v5713_v46  ;;  %v5666_v49 = vadd.f32 %v5665_v44, %v4816_v26  ;;  %v5641_v47 = vpop.f32.mrf.mxu1  ;;  %6938 = vmatmul.bf16.vlgmr.msrb.gmra.mxu1 %v5742_v25 }
 0x993   : > { %v5745_v7 = vpack.c.bf16 %v5729_v53, %v5729_v53  ;;  %vm5695_vm1 = vcmp.ge.f32.partialorder %v5653_v57, 0.0  ;;  %v5711_v58 = vmul.f32 0.01, %v5653_v57 }
 0x994   : > { %vm5696_vm2 = vcmp.ge.f32.partialorder %v5666_v49, 0.0  ;;  %v5712_v16 = vmul.f32 0.01, %v5666_v49  ;;  %6950 = vmatpush.bf16.msrb.mxu2 %v10152_v52 }
 0x995   : > { %v5680_v15 = vpop.f32.mrf.mxu0  ;;  %6977 = vmatmul.bf16.vlgmr.msra.gmra.mxu0 %v5745_v7  ;;  %v5727_v41 = vsel %vm5695_vm1, %v5653_v57, %v5711_v58  ;;  %6963 = vmatpush.bf16.msrb.mxu3 %v10160_v42 }
 0x996   : > { %v5743_v36 = vpack.c.bf16 %v5727_v41, %v5727_v41  ;;  %v5728_v61 = vsel %vm5696_vm2, %v5666_v49, %v5712_v16 }
 0x997   : > { %v5744_v1 = vpack.c.bf16 %v5728_v61, %v5728_v61 }
 0x998   : > { %v5654_v60 = vpop.f32.mrf.mxu2  ;;  %6951 = vmatmul.bf16.vlgmr.msrb.gmra.mxu2 %v5743_v36 }
 0x999   : > { %v5667_v51 = vpop.f32.mrf.mxu3  ;;  %6964 = vmatmul.bf16.vlgmr.msrb.gmra.mxu3 %v5744_v1 }
 0x9ce   : > { %v6783_v63 = vpop.f32.mrf.mxu1 }
 0x9cf   : > { %v6822_v48 = vpop.f32.mrf.mxu0  ;;  %v6784_v62 = vadd.f32 %v10378_v18, %v6783_v63 }
 0x9d6   : > { %v6785_v50 = vpop.f32.mrf.mxu1 }
 0x9d7   : > { %v6824_v29 = vpop.f32.mrf.mxu0 }
 0x9da   : > { %v6796_v2 = vpop.f32.mrf.mxu2 }
 0x9db   : > { %v6809_v5 = vpop.f32.mrf.mxu3  ;;  %v6797_v9 = vadd.f32 %v6796_v2, %v6784_v62 }
 0x9dd   : > { %v6810_v59 = vadd.f32 %v6809_v5, %v6797_v9 }
 0x9de   : > { %v6835_v39 = vpop.f32.mrf.mxu1 }
 0x9df   : > { %v6874_v4 = vpop.f32.mrf.mxu0  ;;  %v6823_v0 = vadd.f32 %v6822_v48, %v6810_v59 }
 0x9e1   : > { %v6836_v56 = vadd.f32 %v6835_v39, %v6823_v0  ;;  %v10379_v39 = vld [vmem:[%s819_s13] ss:$0 sm:$0xff] }
 0x9e2   : > { %v6798_v43 = vpop.f32.mrf.mxu2 }
 0x9e3   : > { %v6811_v40 = vpop.f32.mrf.mxu3  ;;  %v10380_v43 = vld [vmem:[%s828_s18] ss:$0 sm:$0xff] }
 0x9e6   : > { %v6837_v19 = vpop.f32.mrf.mxu1 }
 0x9e7   : > { %v6876_v20 = vpop.f32.mrf.mxu0 }
 0x9ea   : > { %v6848_v45 = vpop.f32.mrf.mxu2 }
 0x9eb   : > { %v6861_v11 = vpop.f32.mrf.mxu3  ;;  %v6849_v28 = vadd.f32 %v6848_v45, %v6836_v56 }
 0x9ed   : > { %v6862_v14 = vadd.f32 %v6861_v11, %v6849_v28 }
 0x9ef   : > { %v6875_v30 = vadd.f32 %v6874_v4, %v6862_v14 }
 0x9f0   : > { %v6887_v21 = vpop.f32.mrf.mxu1 }
 0x9f1   : > { %v6888_v12 = vadd.f32 %v6887_v21, %v6875_v30 }
 0x9f2   : > { %v6926_v3 = vpop.f32.mrf.mxu0  ;;  %v6850_v17 = vpop.f32.mrf.mxu2 }
 0x9f3   : > { %v6863_v6 = vpop.f32.mrf.mxu3 }
 0x9f8   : > { %v6889_v8 = vpop.f32.mrf.mxu1 }
 0x9fa   : > { %v6928_v54 = vpop.f32.mrf.mxu0 }
 0x9fc   : > { %v6900_v34 = vpop.f32.mrf.mxu2 }
 0x9fd   : > { %v6901_v32 = vadd.f32 %v6900_v34, %v6888_v12 }
 0x9fe   : > { %v6913_v24 = vpop.f32.mrf.mxu3 }
 0x9ff   : > { %v6914_v27 = vadd.f32 %v6913_v24, %v6901_v32 }
 0xa01   : > { %v6927_v38 = vadd.f32 %v6926_v3, %v6914_v27 }
 0xa04   : > { %v6902_v10 = vpop.f32.mrf.mxu2 }
 0xa06   : > { %v6915_v23 = vpop.f32.mrf.mxu3 }
 0xa0f   : > { %v6939_v31 = vpop.f32.mrf.mxu1 }
 0xa10   : > { %v6940_v46 = vadd.f32 %v6939_v31, %v6927_v38 }
 0xa12   : > { %v6978_v37 = vpop.f32.mrf.mxu0 }
 0xa17   : > { %v6941_v35 = vpop.f32.mrf.mxu1 }
 0xa1a   : > { %v6980_v13 = vpop.f32.mrf.mxu0 }
 0xa1b   : > { %v6952_v26 = vpop.f32.mrf.mxu2 }
 0xa1c   : > { %v6953_v22 = vadd.f32 %v6952_v26, %v6940_v46  ;;  %v6965_v25 = vpop.f32.mrf.mxu3 }
 0xa1e   : > { %v6966_v53 = vadd.f32 %v6965_v25, %v6953_v22 }
 0xa20   : > { %v6979_v33 = vadd.f32 %v6978_v37, %v6966_v53 }
 0xa22   : > { %v6982_v52 = vadd.f32 %v6979_v33, %v12065_v55 }
 0xa23   : > { %v6954_v7 = vpop.f32.mrf.mxu2 }
 0xa24   : > { %v6967_v57 = vpop.f32.mrf.mxu3  ;;  %vm6983_vm3 = vcmp.ge.f32.partialorder %v6982_v52, 0.0  ;;  %v6984_v44 = vmul.f32 0.01, %v6982_v52 }
 0xa26   : > { %v6985_v42 = vsel %vm6983_vm3, %v6982_v52, %v6984_v44 }
 0xa27   : > { %v6989_v49 = vsel %vm6988_vm4, %v6985_v42, 0.0  ;;  %v6993_v47 = vmul.f32 %v6985_v42, %v6985_v42 }
 0xa28   : > { %6990 = vadd.xlane.f32.xlu0 %v6989_v49 }
 0xa29   : > { %v6994_v58 = vsel %vm6988_vm4, %v6993_v47, 0.0 }
 0xa30   : > { %6995 = vadd.xlane.f32.xlu0 %v6994_v58 }
 0xa9b   : > { %v6991_v15 = vpop.xlane.xlu0 %6990 }
 0xa9c   : > { %v6992_v16 = vmul.f32 0.03125, %v6991_v15 }
 0xa9e   : > { %v6998_v36 = vmul.f32 %v6992_v16, %v6992_v16  ;;  %v7001_v5 = vsub.f32 %v6985_v42, %v6992_v16 }
 0xaa3   : > { %v6996_v41 = vpop.xlane.xlu0 %6995 }
 0xaa4   : > { %v6997_v61 = vmul.f32 0.03125, %v6996_v41 }
 0xaa6   : > { %v6999_v1 = vsub.f32 %v6997_v61, %v6998_v36 }
 0xaa8   : > { %v7000_v55 = vmax.f32 %v6999_v1, 0.0 }
 0xaaa   : > { %v7002_v60 = vadd.f32 1e-05, %v7000_v55 }
 0xaac   : > { %10381 = vrsqrt.f32 %v7002_v60  ;;  %vm7009_vm6 = vweird.f32 %v7002_v60 }
 0xab2   : > { %v10382_v51 = vpop.eup %10381 }
 0xab3   : > { %v7004_v63 = vmul.f32 %v10382_v51, %v7002_v60  ;;  %vm7010_vm5 = vweird.f32 %v10382_v51 }
 0xab4   : > { %vm7011_vm7 = vmor %vm7009_vm6, %vm7010_vm5 }
 0xab5   : > { %v7005_v48 = vmul.f32 %v10382_v51, %v7004_v63 }
 0xab7   : > { %v7006_v50 = vmul.f32 0.5, %v7005_v48 }
 0xab9   : > { %v7007_v29 = vsub.f32 1.5, %v7006_v50 }
 0xabb   : > { %v7008_v2 = vmul.f32 %v10382_v51, %v7007_v29 }
 0xabd   : > { %v7012_v4 = vsel %vm7011_vm7, %v10382_v51, %v7008_v2 }
 0xabe   : > { %v7013_v40 = vmul.f32 %v7012_v4, %v7001_v5 }
 0xac0   : > { %v7017_v19 = vmul.f32 %v10379_v39, %v7013_v40 }
 0xac2   : > { %v7021_v20 = vadd.f32 %v10380_v43, %v7017_v19 }
 0xac4   : > { %7022 = vst [vmem:[#allocation17] sm:$0x3] %v7021_v20 }
 0xac5 PF: > { %p10277_p5 = scmp.eq.s32.totalorder %s10913_s1, 1  ;;  %s12476_s30 = sld [smem:[#allocation46_spill]] }
 0xac6   : > { %s10788_s24 = smov [#allocation17]  }
 0xac7   : > { %s7031_s11 = sshll.u32 %s10788_s24, 4  ;;  %s7032_s11 = int_to_ptr.vmem [resolvable:$true] %s7031_s11 }
 0xacb   : > { %s7033_s27 = sshll.u32 %s12476_s30, 4  ;;  %s7034_s27 = int_to_ptr.hbm [resolvable:$true] %s7033_s27 }
 0xacc   : > { %10233 = dma.vmem_to_hbm [thread:$0]  (%p10277_p5), %s7032_s11, 32, %s7034_s27, [#allocation5]  }
 0xacd   : > { %10752 = dma.done.wait (%p10277_p5), [#allocation5], 32  }
 0xace   : > { %10754 = vsyncadd (%p10277_p5), [#allocation5], 4294967264 }
 0xacf PF: > { %s32_s19 = sadd.s32 1, %s10777_s19   ;;  %s12477_s27 = sld [smem:[#allocation23_spill]] }
 0xad0   : > { %p29_p6 = scmp.ge.s32.totalorder %s32_s19, 4   ;;  %s12478_s22 = sld [smem:[#allocation27_spill]] }
 0xad1   : > { %s12479_s1 = sld [smem:[#allocation26_spill]]  ;;  %s12480_s28 = smov %s10765_s29 }
 0xad2   : > { %s12482_s30 = smov %s10773_s0 }
 0xad3   :  { %31 = sbr.rel (!%p29_p6) target bundleno = 26 (0x1a), region = 233 }
 0xad6   : > { %s12481_s29 = smov %s12478_s22 }
 0xad7   : > { %s12483_s0 = smov %s12479_s1 }
 0xad8   :  { %7047 = vsyncpa [#allocation4], 1 }
 0xad9   :  { %7049 = vsyncpa [#allocation4 + $0x1], 1 }
 0xada   :  { %7050 = vsyncpa [#allocation7], 1 }
 0xadb   :  { %7051 = vsyncpa [#allocation10], 1 }
 0xadc   :  { %7052 = vsyncpa [#allocation5], 1 }
 0xadd   :  { %7054 = vsyncpa [#allocation5 + $0x1], 1 }

</bundles_post_ra>
